<compile_context>
chip_gen: v6e
topology: v6e:2x2x1
jax: 0.10.0
libtpu: 0.0.40
codegen_flags: <defaults>
</compile_context>

<pallas_src>
import jax
import jax.numpy as jnp
import numpy as np
from jax.experimental import pallas as pl
from jax.experimental.pallas import tpu as pltpu


# --------------------------------------------------------------------------
# Pallas kernel 1: fused multi-input pointwise (1x1) conv
#   out = PReLU(sum_i A_i @ W_i + b)   -- replaces concat + 1x1 conv
# --------------------------------------------------------------------------
def _make_pointwise_kernel(n_in):
    def kernel(*args):
        a_refs = args[:n_in]
        w_ref, b_ref, alpha_ref, o_ref = args[n_in:]
        acc = jnp.dot(a_refs[0][...], w_ref[0],
                      preferred_element_type=jnp.float32)
        for i in range(1, n_in):
            acc = acc + jnp.dot(a_refs[i][...], w_ref[i],
                                preferred_element_type=jnp.float32)
        acc = acc + b_ref[...]
        alpha = alpha_ref[0, 0]
        o_ref[...] = jnp.where(acc >= 0, acc, alpha * acc).astype(o_ref.dtype)
    return kernel


def fused_conv1x1_prelu(feats, w, b2, alpha2, out_dtype=jnp.bfloat16):
    """PReLU(concat(feats, -1) @ W + b) without materializing the concat.

    feats: list of (M, C) bf16 matrices (one row per pixel).
    w: (len(feats)*C, Cout) bf16; b2: (1, Cout) f32; alpha2: (1, 1) f32.
    """
    n = len(feats)
    M, C = feats[0].shape
    Cout = w.shape[-1]
    w_stack = w.reshape(n, C, Cout)

    TM = M if M <= 512 else 512          # bigger row tile; HBM-bound layers
    grid_m = pl.cdiv(M, TM)              # ragged tail handled by Pallas masking

    out = pl.pallas_call(
        _make_pointwise_kernel(n),
        out_shape=jax.ShapeDtypeStruct((M, Cout), out_dtype),
        grid=(grid_m,),
        in_specs=(
            [pl.BlockSpec((TM, C), lambda m: (m, 0)) for _ in range(n)]
            + [
                pl.BlockSpec((n, C, Cout), lambda m: (0, 0, 0)),
                pl.BlockSpec((1, Cout), lambda m: (0, 0)),
                pl.BlockSpec((1, 1), lambda m: (0, 0),
                             memory_space=pltpu.MemorySpace.SMEM),
            ]
        ),
        out_specs=pl.BlockSpec((TM, Cout), lambda m: (m, 0)),
        compiler_params=pltpu.CompilerParams(
            dimension_semantics=("parallel",)),
    )(*feats, w_stack, b2, alpha2)
    return out


# --------------------------------------------------------------------------
# Pallas kernel 2: stride-1 VALID conv + bias + PReLU
#   per-tap windows are loaded via ref slicing (no full-image value), matmuls
#   accumulate into an in-register f32 accumulator.
# --------------------------------------------------------------------------
def _make_conv_kernel(kh, kw, oh, ow, cin, cout):
    def kernel(x_ref, w_ref, b_ref, alpha_ref, o_ref):
        acc = None
        for ih in range(kh):
            for iw in range(kw):
                win = x_ref[0, ih:ih + oh, iw:iw + ow, :]       # (oh, ow, cin)
                a = win.reshape(oh * ow, cin)
                p = jnp.dot(a, w_ref[ih, iw, :, :],
                            preferred_element_type=jnp.float32)
                acc = p if acc is None else acc + p
        acc = acc + b_ref[...]
        alpha = alpha_ref[0, 0]
        res = jnp.where(acc >= 0, acc, alpha * acc)
        o_ref[0, :, :, :] = res.reshape(oh, ow, cout).astype(o_ref.dtype)
    return kernel


def conv2d_valid_prelu(x, w, b2, alpha2, out_dtype=jnp.bfloat16):
    """x: (N, Hp, Wp, Cin) bf16, already padded; w: (kh, kw, Cin, Cout) bf16."""
    N, Hp, Wp, Cin = x.shape
    kh, kw, _, Cout = w.shape
    oh = Hp - kh + 1
    ow = Wp - kw + 1
    return pl.pallas_call(
        _make_conv_kernel(kh, kw, oh, ow, Cin, Cout),
        out_shape=jax.ShapeDtypeStruct((N, oh, ow, Cout), out_dtype),
        grid=(N,),
        in_specs=[
            pl.BlockSpec((1, Hp, Wp, Cin), lambda n: (n, 0, 0, 0)),
            pl.BlockSpec((kh, kw, Cin, Cout), lambda n: (0, 0, 0, 0)),
            pl.BlockSpec((1, Cout), lambda n: (0, 0)),
            pl.BlockSpec((1, 1), lambda n: (0, 0),
                         memory_space=pltpu.MemorySpace.SMEM),
        ],
        out_specs=pl.BlockSpec((1, oh, ow, Cout), lambda n: (n, 0, 0, 0)),
        compiler_params=pltpu.CompilerParams(
            dimension_semantics=("parallel",)),
    )(x, w, b2, alpha2)


# --------------------------------------------------------------------------
# Phase-decomposition metadata (pure Python ints) + weight builders (numpy)
# --------------------------------------------------------------------------
def _up_phase_meta(k, s, pad):
    e = k - 1 - pad
    d_all = [(r + t - e) // s
             for r in range(s) for t in range(k) if (r + t - e) % s == 0]
    return min(d_all), max(d_all)


def _down_phase_meta(k, s, pad):
    return (-pad) // s, (k - 1 - pad) // s


def _up_phase_weight(w, s, pad):
    """ConvTranspose2d -> stride-1 conv on the LR grid emitting s^2*Cout phase
    channels.  `w` is the HWIO weight of the *equivalent forward* conv."""
    w = np.asarray(w, np.float32)
    k = w.shape[0]
    Cin, Cout = w.shape[2], w.shape[3]
    e = k - 1 - pad
    d_min, d_max = _up_phase_meta(k, s, pad)
    Dk = d_max - d_min + 1
    r_idx = np.arange(s)
    d_idx = np.arange(d_min, d_max + 1)
    kh_idx = s * d_idx[None, :] + e - r_idx[:, None]            # (s, Dk)
    valid = (kh_idx >= 0) & (kh_idx < k)
    kh_clip = np.clip(kh_idx, 0, k - 1)
    wg = w[kh_clip[:, :, None, None], kh_clip[None, None, :, :], :, :]
    mask = (valid[:, :, None, None] & valid[None, None, :, :]).astype(np.float32)
    wg = wg * mask[..., None, None]
    # (ry, dh, rx, dw, ci, co) -> (dh, dw, ci, ry, rx, co) -> fold phases
    w_ph = np.transpose(wg, (1, 3, 4, 0, 2, 5)).reshape(
        Dk, Dk, Cin, s * s * Cout)
    return w_ph


def _down_phase_weight(w, s, pad):
    """Strided Conv2d evaluated directly on the phase layout: stride-1 conv on
    the LR grid with s^2*Cin input channels (padding folded into the gather)."""
    w = np.asarray(w, np.float32)
    k = w.shape[0]
    Cin, Cout = w.shape[2], w.shape[3]
    d_min, d_max = _down_phase_meta(k, s, pad)
    Dk = d_max - d_min + 1
    d_idx = np.arange(d_min, d_max + 1)
    r_idx = np.arange(s)
    a_idx = s * d_idx[:, None] + r_idx[None, :] + pad           # (Dk, s)
    valid = (a_idx >= 0) & (a_idx < k)
    a_clip = np.clip(a_idx, 0, k - 1)
    wg = w[a_clip[:, :, None, None], a_clip[None, None, :, :], :, :]
    mask = (valid[:, :, None, None] & valid[None, None, :, :]).astype(np.float32)
    wg = wg * mask[..., None, None]
    # (dh, r, dw, t, ci, co) -> (dh, dw, r, t, ci, co) -> fold phases into Cin
    w_ph = np.transpose(wg, (0, 2, 1, 3, 4, 5)).reshape(
        Dk, Dk, s * s * Cin, Cout)
    return w_ph


# --------------------------------------------------------------------------
# One-time parameter preprocessing (hoisted out of the forward)
# --------------------------------------------------------------------------
def prepare_params(params, num_blocks, upscale, padding):
    s = upscale
    k = params["up"][0][0].shape[0]
    # Phase pipeline assumes the DIC geometry (kernel = upscale + 4, padding=2)
    assert k - 2 * padding == s, "unsupported (kernel, stride, padding) combo"
    # TODO(synk): ConvTranspose2d output_padding != 0 is not modeled (always 0 in DIC).

    def p1x1(p):
        w, b, a = p
        return (jnp.asarray(w, jnp.bfloat16),
                jnp.asarray(b, jnp.float32).reshape(1, -1),
                jnp.asarray(a, jnp.float32).reshape(1, 1))

    out = {
        "conv_first": p1x1(params["conv_first"]),
        "conv_last": p1x1(params["conv_last"]),
        "lr": [p1x1(p) for p in params["lr"]],
        "hr": [p1x1(p) for p in params["hr"]],
        "up": [], "down": [],
    }
    for idx in range(num_blocks):
        w, b, a = params["up"][idx]
        w_ph = _up_phase_weight(w, s, padding)
        b_ph = np.tile(np.asarray(b, np.float32), s * s)
        out["up"].append((jnp.asarray(w_ph, jnp.bfloat16),
                          jnp.asarray(b_ph, jnp.float32).reshape(1, -1),
                          jnp.asarray(a, jnp.float32).reshape(1, 1)))
        w, b, a = params["down"][idx]
        w_dn = _down_phase_weight(w, s, padding)
        out["down"].append((jnp.asarray(w_dn, jnp.bfloat16),
                            jnp.asarray(b, jnp.float32).reshape(1, -1),
                            jnp.asarray(a, jnp.float32).reshape(1, 1)))
    return out


# --------------------------------------------------------------------------
# FeedbackBlock forward (Pallas-backed)
# --------------------------------------------------------------------------
def feedback_block_forward(x_nchw, prepared, num_blocks, upscale, padding,
                           last_hidden_nchw=None):
    s = upscale
    k = s + 4
    x = jnp.transpose(x_nchw, (0, 2, 3, 1)).astype(jnp.bfloat16)   # NCHW->NHWC
    if last_hidden_nchw is None:                                   # need_reset
        last_hidden = x
    else:
        last_hidden = jnp.transpose(
            last_hidden_nchw, (0, 2, 3, 1)).astype(jnp.bfloat16)
    N, H, W_, C = x.shape

    # Static padding / crop metadata for the phase-decomposed convs.
    ud_min, ud_max = _up_phase_meta(k, s, padding)
    up_pad_lo, up_crop_lo = max(0, -ud_min), max(0, ud_min)
    up_pad_hi, up_crop_hi = max(0, ud_max), max(0, -ud_max)
    dd_min, dd_max = _down_phase_meta(k, s, padding)
    dn_pad_lo, dn_pad_hi = -dd_min, dd_max

    w, b, a = prepared["conv_first"]
    h2d = fused_conv1x1_prelu(
        [x.reshape(-1, C), last_hidden.reshape(-1, C)], w, b, a)
    h = h2d.reshape(N, H, W_, C)

    lr_features = [h]
    hr_features = []          # kept in phase layout (N, H, W, s*s*C)
    for idx in range(num_blocks):
        if idx > 0:
            w, b, a = prepared["lr"][idx - 1]
            lr2d = fused_conv1x1_prelu(
                [f.reshape(-1, C) for f in lr_features], w, b, a)
            lr = lr2d.reshape(N, H, W_, C)
        else:
            lr = lr_features[0]

        # --- up: ConvTranspose2d + PReLU, sub-pixel phase output -----------
        w_up, b_up, a_up = prepared["up"][idx]
        xe = lr
        if up_crop_lo or up_crop_hi:
            xe = xe[:, up_crop_lo:xe.shape[1] - up_crop_hi,
                    up_crop_lo:xe.shape[2] - up_crop_hi, :]
        if up_pad_lo or up_pad_hi:
            # TODO(synk): fold this border zero-pad into the conv kernel.
            xe = jnp.pad(xe, ((0, 0), (up_pad_lo, up_pad_hi),
                              (up_pad_lo, up_pad_hi), (0, 0)))
        hr = conv2d_valid_prelu(xe, w_up, b_up, a_up)   # (N, H, W, s*s*C)
        hr_features.append(hr)

        if idx > 0:
            w, b, a = prepared["hr"][idx - 1]
            hr2d = fused_conv1x1_prelu(
                [f.reshape(-1, C) for f in hr_features], w, b, a)
            hr = hr2d.reshape(N, H, W_, s * s * C)

        # --- down: strided Conv2d + PReLU evaluated on the phase layout ----
        w_dn, b_dn, a_dn = prepared["down"][idx]
        he = hr
        if dn_pad_lo or dn_pad_hi:
            # TODO(synk): fold this border zero-pad into the conv kernel.
            he = jnp.pad(hr, ((0, 0), (dn_pad_lo, dn_pad_hi),
                              (dn_pad_lo, dn_pad_hi), (0, 0)))
        lr = conv2d_valid_prelu(he, w_dn, b_dn, a_dn)    # (N, H, W, C)
        lr_features.append(lr)

    w, b, a = prepared["conv_last"]
    out2d = fused_conv1x1_prelu(
        [f.reshape(-1, C) for f in lr_features[1:]], w, b, a,
        out_dtype=jnp.float32)
    out = out2d.reshape(N, H, W_, C)
    return jnp.transpose(out, (0, 3, 1, 2))              # NHWC -> NCHW


# --------------------------------------------------------------------------
# Pure-JAX (lax.conv) f32 reference for validation
# --------------------------------------------------------------------------
def _prelu(x, a):
    return jnp.where(x >= 0, x, a * x)


def _conv_ref(x, w, b, a, stride, pad, lhs_dil=1):
    out = jax.lax.conv_general_dilated(
        x, w, window_strides=(stride, stride),
        padding=[(pad, pad), (pad, pad)],
        lhs_dilation=(lhs_dil, lhs_dil),
        dimension_numbers=("NHWC", "HWIO", "NHWC"),
        precision=jax.lax.Precision.HIGHEST)
    return _prelu(out + b, a)


def feedback_block_ref(x_nchw, params, num_blocks, upscale, padding,
                       last_hidden_nchw=None):
    x = jnp.transpose(x_nchw, (0, 2, 3, 1))
    last_hidden = x if last_hidden_nchw is None else jnp.transpose(
        last_hidden_nchw, (0, 2, 3, 1))
    k = upscale + 4

    def c1x1(t, p):
        w, b, a = p
        return _conv_ref(t, w[None, None], b, a, 1, 0)

    h = c1x1(jnp.concatenate([x, last_hidden], axis=-1), params["conv_first"])
    lr_features, hr_features = [h], []
    for idx in range(num_blocks):
        lr = jnp.concatenate(lr_features, axis=-1)
        if idx > 0:
            lr = c1x1(lr, params["lr"][idx - 1])
        w, b, a = params["up"][idx]
        hr = _conv_ref(lr, w, b, a, 1, k - 1 - padding, lhs_dil=upscale)
        hr_features.append(hr)
        hr = jnp.concatenate(hr_features, axis=-1)
        if idx > 0:
            hr = c1x1(hr, params["hr"][idx - 1])
        w, b, a = params["down"][idx]
        lr = _conv_ref(hr, w, b, a, upscale, padding)
        lr_features.append(lr)
    out = c1x1(jnp.concatenate(lr_features[1:], axis=-1), params["conv_last"])
    return jnp.transpose(out, (0, 3, 1, 2))


# --------------------------------------------------------------------------
# Deterministic parameter init (synthetic; mirrors module __init__ shapes)
# --------------------------------------------------------------------------
def init_params(key, mid_channels, num_blocks, upscale, prelu_init=0.2):
    C = mid_channels
    k = upscale + 4
    keys = iter(jax.random.split(key, 8 + 8 * num_blocks))

    def nrm(shape, scale=0.05):
        return scale * jax.random.normal(next(keys), shape, jnp.float32)

    a = jnp.float32(prelu_init)
    p = {
        "conv_first": (nrm((2 * C, C)), nrm((C,)), a),
        "up": [], "down": [], "lr": [], "hr": [],
    }
    for idx in range(num_blocks):
        p["up"].append((nrm((k, k, C, C)), nrm((C,)), a))
        p["down"].append((nrm((k, k, C, C)), nrm((C,)), a))
        if idx > 0:
            p["lr"].append((nrm(((idx + 1) * C, C)), nrm((C,)), a))
            p["hr"].append((nrm(((idx + 1) * C, C)), nrm((C,)), a))
    p["conv_last"] = (nrm((num_blocks * C, C)), nrm((C,)), a)
    return p


if __name__ == "__main__":
    # Small, module-consistent shapes: (n, c, h, w) with mid_channels = c.
    N, C, H, W = 2, 8, 8, 8
    num_blocks, upscale, padding = 2, 2, 2

    key = jax.random.PRNGKey(0)
    kx, kp = jax.random.split(key)
    x = jax.random.normal(kx, (N, C, H, W), jnp.float32)
    params = init_params(kp, C, num_blocks, upscale)
    prepared = prepare_params(params, num_blocks, upscale, padding)

    fwd = jax.jit(feedback_block_forward, static_argnums=(2, 3, 4))
    out = jax.block_until_ready(fwd(x, prepared, num_blocks, upscale, padding))
    assert out.shape == (N, C, H, W), out.shape

    ref = jax.block_until_ready(
        feedback_block_ref(x, params, num_blocks, upscale, padding))
    max_err = float(jnp.max(jnp.abs(out - ref)))
    scale = float(jnp.max(jnp.abs(ref))) + 1e-6
    # bf16 operands / bf16 intermediates -> relative tolerance (f32 ref).
    assert max_err <= 4e-2 * scale + 1e-3, (max_err, scale)

    print("KERNEL_OK")
</pallas_src>

<mosaic_0001>
module attributes {stable_mosaic.version = 11 : i64} {
  func.func @kernel(%arg0: i32, %arg1: memref<128x8xbf16, #tpu.memory_space<vmem>>, %arg2: memref<128x8xbf16, #tpu.memory_space<vmem>>, %arg3: memref<2x8x8xbf16, #tpu.memory_space<vmem>>, %arg4: memref<1x8xf32, #tpu.memory_space<vmem>>, %arg5: memref<1x1xf32, #tpu.memory_space<smem>>, %arg6: memref<128x8xbf16, #tpu.memory_space<vmem>>) attributes {dimension_semantics = [#tpu.dimension_semantics<parallel>], iteration_bounds = array<i64: 1>, scalar_prefetch = 0 : i64, scratch_operands = 0 : i64, tpu.core_type = #tpu.core_type<tc>, window_params = [{transform_indices = @transform_0, window_bounds = array<i64: 128, 8>}, {transform_indices = @transform_1, window_bounds = array<i64: 128, 8>}, {pipeline_mode = #tpu.pipeline_mode<synchronous>, transform_indices = @transform_2, window_bounds = array<i64: 2, 8, 8>}, {pipeline_mode = #tpu.pipeline_mode<synchronous>, transform_indices = @transform_3, window_bounds = array<i64: 1, 8>}, {transform_indices = @transform_4, window_bounds = array<i64: 1, 1>}, {transform_indices = @transform_5, window_bounds = array<i64: 128, 8>}]} {
    %c0 = arith.constant 0 : index
    %c0_0 = arith.constant 0 : index
    %0 = vector.load %arg1[%c0, %c0_0] : memref<128x8xbf16, #tpu.memory_space<vmem>>, vector<128x8xbf16>
    %c0_1 = arith.constant 0 : index
    %c0_2 = arith.constant 0 : index
    %c0_3 = arith.constant 0 : index
    %1 = vector.load %arg3[%c0_1, %c0_2, %c0_3] : memref<2x8x8xbf16, #tpu.memory_space<vmem>>, vector<1x8x8xbf16>
    %2 = vector.shape_cast %1 : vector<1x8x8xbf16> to vector<8x8xbf16>
    %cst = arith.constant dense<0.000000e+00> : vector<128x8xf32>
    %3 = tpu.matmul %0, %2, %cst {dimension_numbers = #tpu.dot_dimension_numbers<[1], [0], [0], [1], [0, 0, 1, 1], [], []>} : vector<128x8xbf16>, vector<8x8xbf16>, vector<128x8xf32> -> vector<128x8xf32>
    %c0_4 = arith.constant 0 : index
    %c0_5 = arith.constant 0 : index
    %4 = vector.load %arg2[%c0_4, %c0_5] : memref<128x8xbf16, #tpu.memory_space<vmem>>, vector<128x8xbf16>
    %c1 = arith.constant 1 : index
    %c0_6 = arith.constant 0 : index
    %c0_7 = arith.constant 0 : index
    %5 = vector.load %arg3[%c1, %c0_6, %c0_7] : memref<2x8x8xbf16, #tpu.memory_space<vmem>>, vector<1x8x8xbf16>
    %6 = vector.shape_cast %5 : vector<1x8x8xbf16> to vector<8x8xbf16>
    %cst_8 = arith.constant dense<0.000000e+00> : vector<128x8xf32>
    %7 = tpu.matmul %4, %6, %cst_8 {dimension_numbers = #tpu.dot_dimension_numbers<[1], [0], [0], [1], [0, 0, 1, 1], [], []>} : vector<128x8xbf16>, vector<8x8xbf16>, vector<128x8xf32> -> vector<128x8xf32>
    %8 = arith.addf %3, %7 : vector<128x8xf32>
    %c0_9 = arith.constant 0 : index
    %c0_10 = arith.constant 0 : index
    %9 = vector.load %arg4[%c0_9, %c0_10] : memref<1x8xf32, #tpu.memory_space<vmem>>, vector<1x8xf32>
    %10 = vector.broadcast %9 : vector<1x8xf32> to vector<128x8xf32>
    %11 = arith.addf %8, %10 : vector<128x8xf32>
    %c0_11 = arith.constant 0 : index
    %c0_12 = arith.constant 0 : index
    %12 = memref.load %arg5[%c0_11, %c0_12] : memref<1x1xf32, #tpu.memory_space<smem>>
    %cst_13 = arith.constant 0.000000e+00 : f32
    %13 = vector.broadcast %cst_13 : f32 to vector<128x8xf32>
    %14 = arith.cmpf oge, %11, %13 : vector<128x8xf32>
    %15 = vector.broadcast %12 : f32 to vector<128x8xf32>
    %16 = arith.mulf %15, %11 : vector<128x8xf32>
    %17 = arith.select %14, %11, %16 : vector<128x8xi1>, vector<128x8xf32>
    %18 = arith.truncf %17 : vector<128x8xf32> to vector<128x8xbf16>
    %c0_14 = arith.constant 0 : index
    %c0_15 = arith.constant 0 : index
    %19 = vector.load %arg6[%c0_14, %c0_15] : memref<128x8xbf16, #tpu.memory_space<vmem>>, vector<128x8xbf16>
    tpu.vector_store %arg6[%c0_14, %c0_15], %18 {strides = array<i32>} : memref<128x8xbf16, #tpu.memory_space<vmem>>, vector<128x8xbf16>,
    return
  }
  func.func @transform_0(%arg0: i32) -> (i32, i32) {
    %c0_i32 = arith.constant 0 : i32
    %c0_i32_0 = arith.constant 0 : i32
    return %arg0, %c0_i32 : i32, i32
  }
  func.func @transform_1(%arg0: i32) -> (i32, i32) {
    %c0_i32 = arith.constant 0 : i32
    %c0_i32_0 = arith.constant 0 : i32
    return %arg0, %c0_i32 : i32, i32
  }
  func.func @transform_2(%arg0: i32) -> (i32, i32, i32) {
    %c0_i32 = arith.constant 0 : i32
    %c0_i32_0 = arith.constant 0 : i32
    %c0_i32_1 = arith.constant 0 : i32
    %c0_i32_2 = arith.constant 0 : i32
    return %c0_i32, %c0_i32_0, %c0_i32_1 : i32, i32, i32
  }
  func.func @transform_3(%arg0: i32) -> (i32, i32) {
    %c0_i32 = arith.constant 0 : i32
    %c0_i32_0 = arith.constant 0 : i32
    %c0_i32_1 = arith.constant 0 : i32
    return %c0_i32, %c0_i32_0 : i32, i32
  }
  func.func @transform_4(%arg0: i32) -> (i32, i32) {
    %c0_i32 = arith.constant 0 : i32
    %c0_i32_0 = arith.constant 0 : i32
    %c0_i32_1 = arith.constant 0 : i32
    return %c0_i32, %c0_i32_0 : i32, i32
  }
  func.func @transform_5(%arg0: i32) -> (i32, i32) {
    %c0_i32 = arith.constant 0 : i32
    %c0_i32_0 = arith.constant 0 : i32
    return %arg0, %c0_i32 : i32, i32
  }
}

module attributes {stable_mosaic.version = 11 : i64} {
  func.func @kernel(%arg0: i32, %arg1: memref<1x10x10x8xbf16, #tpu.memory_space<vmem>>, %arg2: memref<3x3x8x32xbf16, #tpu.memory_space<vmem>>, %arg3: memref<1x32xf32, #tpu.memory_space<vmem>>, %arg4: memref<1x1xf32, #tpu.memory_space<smem>>, %arg5: memref<1x8x8x32xbf16, #tpu.memory_space<vmem>>) attributes {dimension_semantics = [#tpu.dimension_semantics<parallel>], iteration_bounds = array<i64: 2>, scalar_prefetch = 0 : i64, scratch_operands = 0 : i64, tpu.core_type = #tpu.core_type<tc>, window_params = [{transform_indices = @transform_0, window_bounds = array<i64: 1, 10, 10, 8>}, {pipeline_mode = #tpu.pipeline_mode<synchronous>, transform_indices = @transform_1, window_bounds = array<i64: 3, 3, 8, 32>}, {pipeline_mode = #tpu.pipeline_mode<synchronous>, transform_indices = @transform_2, window_bounds = array<i64: 1, 32>}, {transform_indices = @transform_3, window_bounds = array<i64: 1, 1>}, {transform_indices = @transform_4, window_bounds = array<i64: 1, 8, 8, 32>}]} {
    %c0 = arith.constant 0 : index
    %c0_0 = arith.constant 0 : index
    %c0_1 = arith.constant 0 : index
    %c0_2 = arith.constant 0 : index
    %0 = vector.load %arg1[%c0, %c0_0, %c0_1, %c0_2] : memref<1x10x10x8xbf16, #tpu.memory_space<vmem>>, vector<1x8x8x8xbf16>
    %1 = vector.shape_cast %0 : vector<1x8x8x8xbf16> to vector<8x8x8xbf16>
    %2 = vector.shape_cast %1 : vector<8x8x8xbf16> to vector<64x8xbf16>
    %c0_3 = arith.constant 0 : index
    %c0_4 = arith.constant 0 : index
    %c0_5 = arith.constant 0 : index
    %c0_6 = arith.constant 0 : index
    %3 = vector.load %arg2[%c0_3, %c0_4, %c0_5, %c0_6] : memref<3x3x8x32xbf16, #tpu.memory_space<vmem>>, vector<1x1x8x32xbf16>
    %4 = vector.shape_cast %3 : vector<1x1x8x32xbf16> to vector<8x32xbf16>
    %cst = arith.constant dense<0.000000e+00> : vector<64x32xf32>
    %5 = tpu.matmul %2, %4, %cst {dimension_numbers = #tpu.dot_dimension_numbers<[1], [0], [0], [1], [0, 0, 1, 1], [], []>} : vector<64x8xbf16>, vector<8x32xbf16>, vector<64x32xf32> -> vector<64x32xf32>
    %c0_7 = arith.constant 0 : index
    %c0_8 = arith.constant 0 : index
    %c1 = arith.constant 1 : index
    %c0_9 = arith.constant 0 : index
    %6 = vector.load %arg1[%c0_7, %c0_8, %c1, %c0_9] : memref<1x10x10x8xbf16, #tpu.memory_space<vmem>>, vector<1x8x8x8xbf16>
    %7 = vector.shape_cast %6 : vector<1x8x8x8xbf16> to vector<8x8x8xbf16>
    %8 = vector.shape_cast %7 : vector<8x8x8xbf16> to vector<64x8xbf16>
    %c0_10 = arith.constant 0 : index
    %c1_11 = arith.constant 1 : index
    %c0_12 = arith.constant 0 : index
    %c0_13 = arith.constant 0 : index
    %9 = vector.load %arg2[%c0_10, %c1_11, %c0_12, %c0_13] : memref<3x3x8x32xbf16, #tpu.memory_space<vmem>>, vector<1x1x8x32xbf16>
    %10 = vector.shape_cast %9 : vector<1x1x8x32xbf16> to vector<8x32xbf16>
    %cst_14 = arith.constant dense<0.000000e+00> : vector<64x32xf32>
    %11 = tpu.matmul %8, %10, %cst_14 {dimension_numbers = #tpu.dot_dimension_numbers<[1], [0], [0], [1], [0, 0, 1, 1], [], []>} : vector<64x8xbf16>, vector<8x32xbf16>, vector<64x32xf32> -> vector<64x32xf32>
    %12 = arith.addf %5, %11 : vector<64x32xf32>
    %c0_15 = arith.constant 0 : index
    %c0_16 = arith.constant 0 : index
    %c2 = arith.constant 2 : index
    %c0_17 = arith.constant 0 : index
    %13 = vector.load %arg1[%c0_15, %c0_16, %c2, %c0_17] : memref<1x10x10x8xbf16, #tpu.memory_space<vmem>>, vector<1x8x8x8xbf16>
    %14 = vector.shape_cast %13 : vector<1x8x8x8xbf16> to vector<8x8x8xbf16>
    %15 = vector.shape_cast %14 : vector<8x8x8xbf16> to vector<64x8xbf16>
    %c0_18 = arith.constant 0 : index
    %c2_19 = arith.constant 2 : index
    %c0_20 = arith.constant 0 : index
    %c0_21 = arith.constant 0 : index
    %16 = vector.load %arg2[%c0_18, %c2_19, %c0_20, %c0_21] : memref<3x3x8x32xbf16, #tpu.memory_space<vmem>>, vector<1x1x8x32xbf16>
    %17 = vector.shape_cast %16 : vector<1x1x8x32xbf16> to vector<8x32xbf16>
    %cst_22 = arith.constant dense<0.000000e+00> : vector<64x32xf32>
    %18 = tpu.matmul %15, %17, %cst_22 {dimension_numbers = #tpu.dot_dimension_numbers<[1], [0], [0], [1], [0, 0, 1, 1], [], []>} : vector<64x8xbf16>, vector<8x32xbf16>, vector<64x32xf32> -> vector<64x32xf32>
    %19 = arith.addf %12, %18 : vector<64x32xf32>
    %c0_23 = arith.constant 0 : index
    %c1_24 = arith.constant 1 : index
    %c0_25 = arith.constant 0 : index
    %c0_26 = arith.constant 0 : index
    %20 = vector.load %arg1[%c0_23, %c1_24, %c0_25, %c0_26] : memref<1x10x10x8xbf16, #tpu.memory_space<vmem>>, vector<1x8x8x8xbf16>
    %21 = vector.shape_cast %20 : vector<1x8x8x8xbf16> to vector<8x8x8xbf16>
    %22 = vector.shape_cast %21 : vector<8x8x8xbf16> to vector<64x8xbf16>
    %c1_27 = arith.constant 1 : index
    %c0_28 = arith.constant 0 : index
    %c0_29 = arith.constant 0 : index
    %c0_30 = arith.constant 0 : index
    %23 = vector.load %arg2[%c1_27, %c0_28, %c0_29, %c0_30] : memref<3x3x8x32xbf16, #tpu.memory_space<vmem>>, vector<1x1x8x32xbf16>
    %24 = vector.shape_cast %23 : vector<1x1x8x32xbf16> to vector<8x32xbf16>
    %cst_31 = arith.constant dense<0.000000e+00> : vector<64x32xf32>
    %25 = tpu.matmul %22, %24, %cst_31 {dimension_numbers = #tpu.dot_dimension_numbers<[1], [0], [0], [1], [0, 0, 1, 1], [], []>} : vector<64x8xbf16>, vector<8x32xbf16>, vector<64x32xf32> -> vector<64x32xf32>
    %26 = arith.addf %19, %25 : vector<64x32xf32>
    %c0_32 = arith.constant 0 : index
    %c1_33 = arith.constant 1 : index
    %c1_34 = arith.constant 1 : index
    %c0_35 = arith.constant 0 : index
    %27 = vector.load %arg1[%c0_32, %c1_33, %c1_34, %c0_35] : memref<1x10x10x8xbf16, #tpu.memory_space<vmem>>, vector<1x8x8x8xbf16>
    %28 = vector.shape_cast %27 : vector<1x8x8x8xbf16> to vector<8x8x8xbf16>
    %29 = vector.shape_cast %28 : vector<8x8x8xbf16> to vector<64x8xbf16>
    %c1_36 = arith.constant 1 : index
    %c1_37 = arith.constant 1 : index
    %c0_38 = arith.constant 0 : index
    %c0_39 = arith.constant 0 : index
    %30 = vector.load %arg2[%c1_36, %c1_37, %c0_38, %c0_39] : memref<3x3x8x32xbf16, #tpu.memory_space<vmem>>, vector<1x1x8x32xbf16>
    %31 = vector.shape_cast %30 : vector<1x1x8x32xbf16> to vector<8x32xbf16>
    %cst_40 = arith.constant dense<0.000000e+00> : vector<64x32xf32>
    %32 = tpu.matmul %29, %31, %cst_40 {dimension_numbers = #tpu.dot_dimension_numbers<[1], [0], [0], [1], [0, 0, 1, 1], [], []>} : vector<64x8xbf16>, vector<8x32xbf16>, vector<64x32xf32> -> vector<64x32xf32>
    %33 = arith.addf %26, %32 : vector<64x32xf32>
    %c0_41 = arith.constant 0 : index
    %c1_42 = arith.constant 1 : index
    %c2_43 = arith.constant 2 : index
    %c0_44 = arith.constant 0 : index
    %34 = vector.load %arg1[%c0_41, %c1_42, %c2_43, %c0_44] : memref<1x10x10x8xbf16, #tpu.memory_space<vmem>>, vector<1x8x8x8xbf16>
    %35 = vector.shape_cast %34 : vector<1x8x8x8xbf16> to vector<8x8x8xbf16>
    %36 = vector.shape_cast %35 : vector<8x8x8xbf16> to vector<64x8xbf16>
    %c1_45 = arith.constant 1 : index
    %c2_46 = arith.constant 2 : index
    %c0_47 = arith.constant 0 : index
    %c0_48 = arith.constant 0 : index
    %37 = vector.load %arg2[%c1_45, %c2_46, %c0_47, %c0_48] : memref<3x3x8x32xbf16, #tpu.memory_space<vmem>>, vector<1x1x8x32xbf16>
    %38 = vector.shape_cast %37 : vector<1x1x8x32xbf16> to vector<8x32xbf16>
    %cst_49 = arith.constant dense<0.000000e+00> : vector<64x32xf32>
    %39 = tpu.matmul %36, %38, %cst_49 {dimension_numbers = #tpu.dot_dimension_numbers<[1], [0], [0], [1], [0, 0, 1, 1], [], []>} : vector<64x8xbf16>, vector<8x32xbf16>, vector<64x32xf32> -> vector<64x32xf32>
    %40 = arith.addf %33, %39 : vector<64x32xf32>
    %c0_50 = arith.constant 0 : index
    %c2_51 = arith.constant 2 : index
    %c0_52 = arith.constant 0 : index
    %c0_53 = arith.constant 0 : index
    %41 = vector.load %arg1[%c0_50, %c2_51, %c0_52, %c0_53] : memref<1x10x10x8xbf16, #tpu.memory_space<vmem>>, vector<1x8x8x8xbf16>
    %42 = vector.shape_cast %41 : vector<1x8x8x8xbf16> to vector<8x8x8xbf16>
    %43 = vector.shape_cast %42 : vector<8x8x8xbf16> to vector<64x8xbf16>
    %c2_54 = arith.constant 2 : index
    %c0_55 = arith.constant 0 : index
    %c0_56 = arith.constant 0 : index
    %c0_57 = arith.constant 0 : index
    %44 = vector.load %arg2[%c2_54, %c0_55, %c0_56, %c0_57] : memref<3x3x8x32xbf16, #tpu.memory_space<vmem>>, vector<1x1x8x32xbf16>
    %45 = vector.shape_cast %44 : vector<1x1x8x32xbf16> to vector<8x32xbf16>
    %cst_58 = arith.constant dense<0.000000e+00> : vector<64x32xf32>
    %46 = tpu.matmul %43, %45, %cst_58 {dimension_numbers = #tpu.dot_dimension_numbers<[1], [0], [0], [1], [0, 0, 1, 1], [], []>} : vector<64x8xbf16>, vector<8x32xbf16>, vector<64x32xf32> -> vector<64x32xf32>
    %47 = arith.addf %40, %46 : vector<64x32xf32>
    %c0_59 = arith.constant 0 : index
    %c2_60 = arith.constant 2 : index
    %c1_61 = arith.constant 1 : index
    %c0_62 = arith.constant 0 : index
    %48 = vector.load %arg1[%c0_59, %c2_60, %c1_61, %c0_62] : memref<1x10x10x8xbf16, #tpu.memory_space<vmem>>, vector<1x8x8x8xbf16>
    %49 = vector.shape_cast %48 : vector<1x8x8x8xbf16> to vector<8x8x8xbf16>
    %50 = vector.shape_cast %49 : vector<8x8x8xbf16> to vector<64x8xbf16>
    %c2_63 = arith.constant 2 : index
    %c1_64 = arith.constant 1 : index
    %c0_65 = arith.constant 0 : index
    %c0_66 = arith.constant 0 : index
    %51 = vector.load %arg2[%c2_63, %c1_64, %c0_65, %c0_66] : memref<3x3x8x32xbf16, #tpu.memory_space<vmem>>, vector<1x1x8x32xbf16>
    %52 = vector.shape_cast %51 : vector<1x1x8x32xbf16> to vector<8x32xbf16>
    %cst_67 = arith.constant dense<0.000000e+00> : vector<64x32xf32>
    %53 = tpu.matmul %50, %52, %cst_67 {dimension_numbers = #tpu.dot_dimension_numbers<[1], [0], [0], [1], [0, 0, 1, 1], [], []>} : vector<64x8xbf16>, vector<8x32xbf16>, vector<64x32xf32> -> vector<64x32xf32>
    %54 = arith.addf %47, %53 : vector<64x32xf32>
    %c0_68 = arith.constant 0 : index
    %c2_69 = arith.constant 2 : index
    %c2_70 = arith.constant 2 : index
    %c0_71 = arith.constant 0 : index
    %55 = vector.load %arg1[%c0_68, %c2_69, %c2_70, %c0_71] : memref<1x10x10x8xbf16, #tpu.memory_space<vmem>>, vector<1x8x8x8xbf16>
    %56 = vector.shape_cast %55 : vector<1x8x8x8xbf16> to vector<8x8x8xbf16>
    %57 = vector.shape_cast %56 : vector<8x8x8xbf16> to vector<64x8xbf16>
    %c2_72 = arith.constant 2 : index
    %c2_73 = arith.constant 2 : index
    %c0_74 = arith.constant 0 : index
    %c0_75 = arith.constant 0 : index
    %58 = vector.load %arg2[%c2_72, %c2_73, %c0_74, %c0_75] : memref<3x3x8x32xbf16, #tpu.memory_space<vmem>>, vector<1x1x8x32xbf16>
    %59 = vector.shape_cast %58 : vector<1x1x8x32xbf16> to vector<8x32xbf16>
    %cst_76 = arith.constant dense<0.000000e+00> : vector<64x32xf32>
    %60 = tpu.matmul %57, %59, %cst_76 {dimension_numbers = #tpu.dot_dimension_numbers<[1], [0], [0], [1], [0, 0, 1, 1], [], []>} : vector<64x8xbf16>, vector<8x32xbf16>, vector<64x32xf32> -> vector<64x32xf32>
    %61 = arith.addf %54, %60 : vector<64x32xf32>
    %c0_77 = arith.constant 0 : index
    %c0_78 = arith.constant 0 : index
    %62 = vector.load %arg3[%c0_77, %c0_78] : memref<1x32xf32, #tpu.memory_space<vmem>>, vector<1x32xf32>
    %63 = vector.broadcast %62 : vector<1x32xf32> to vector<64x32xf32>
    %64 = arith.addf %61, %63 : vector<64x32xf32>
    %c0_79 = arith.constant 0 : index
    %c0_80 = arith.constant 0 : index
    %65 = memref.load %arg4[%c0_79, %c0_80] : memref<1x1xf32, #tpu.memory_space<smem>>
    %cst_81 = arith.constant 0.000000e+00 : f32
    %66 = vector.broadcast %cst_81 : f32 to vector<64x32xf32>
    %67 = arith.cmpf oge, %64, %66 : vector<64x32xf32>
    %68 = vector.broadcast %65 : f32 to vector<64x32xf32>
    %69 = arith.mulf %68, %64 : vector<64x32xf32>
    %70 = arith.select %67, %64, %69 : vector<64x32xi1>, vector<64x32xf32>
    %71 = vector.shape_cast %70 : vector<64x32xf32> to vector<8x8x32xf32>
    %72 = arith.truncf %71 : vector<8x8x32xf32> to vector<8x8x32xbf16>
    %c0_82 = arith.constant 0 : index
    %c0_83 = arith.constant 0 : index
    %c0_84 = arith.constant 0 : index
    %c0_85 = arith.constant 0 : index
    %73 = vector.load %arg5[%c0_82, %c0_83, %c0_84, %c0_85] : memref<1x8x8x32xbf16, #tpu.memory_space<vmem>>, vector<1x8x8x32xbf16>
    %74 = vector.shape_cast %73 : vector<1x8x8x32xbf16> to vector<8x8x32xbf16>
    %75 = vector.shape_cast %72 : vector<8x8x32xbf16> to vector<1x8x8x32xbf16>
    tpu.vector_store %arg5[%c0_82, %c0_83, %c0_84, %c0_85], %75 {strides = array<i32>} : memref<1x8x8x32xbf16, #tpu.memory_space<vmem>>, vector<1x8x8x32xbf16>,
    return
  }
  func.func @transform_0(%arg0: i32) -> (i32, i32, i32, i32) {
    %c0_i32 = arith.constant 0 : i32
    %c0_i32_0 = arith.constant 0 : i32
    %c0_i32_1 = arith.constant 0 : i32
    %c0_i32_2 = arith.constant 0 : i32
    return %arg0, %c0_i32, %c0_i32_0, %c0_i32_1 : i32, i32, i32, i32
  }
  func.func @transform_1(%arg0: i32) -> (i32, i32, i32, i32) {
    %c0_i32 = arith.constant 0 : i32
    %c0_i32_0 = arith.constant 0 : i32
    %c0_i32_1 = arith.constant 0 : i32
    %c0_i32_2 = arith.constant 0 : i32
    %c0_i32_3 = arith.constant 0 : i32
    return %c0_i32, %c0_i32_0, %c0_i32_1, %c0_i32_2 : i32, i32, i32, i32
  }
  func.func @transform_2(%arg0: i32) -> (i32, i32) {
    %c0_i32 = arith.constant 0 : i32
    %c0_i32_0 = arith.constant 0 : i32
    %c0_i32_1 = arith.constant 0 : i32
    return %c0_i32, %c0_i32_0 : i32, i32
  }
  func.func @transform_3(%arg0: i32) -> (i32, i32) {
    %c0_i32 = arith.constant 0 : i32
    %c0_i32_0 = arith.constant 0 : i32
    %c0_i32_1 = arith.constant 0 : i32
    return %c0_i32, %c0_i32_0 : i32, i32
  }
  func.func @transform_4(%arg0: i32) -> (i32, i32, i32, i32) {
    %c0_i32 = arith.constant 0 : i32
    %c0_i32_0 = arith.constant 0 : i32
    %c0_i32_1 = arith.constant 0 : i32
    %c0_i32_2 = arith.constant 0 : i32
    return %arg0, %c0_i32, %c0_i32_0, %c0_i32_1 : i32, i32, i32, i32
  }
}

module attributes {stable_mosaic.version = 11 : i64} {
  func.func @kernel(%arg0: i32, %arg1: memref<1x10x10x32xbf16, #tpu.memory_space<vmem>>, %arg2: memref<3x3x32x8xbf16, #tpu.memory_space<vmem>>, %arg3: memref<1x8xf32, #tpu.memory_space<vmem>>, %arg4: memref<1x1xf32, #tpu.memory_space<smem>>, %arg5: memref<1x8x8x8xbf16, #tpu.memory_space<vmem>>) attributes {dimension_semantics = [#tpu.dimension_semantics<parallel>], iteration_bounds = array<i64: 2>, scalar_prefetch = 0 : i64, scratch_operands = 0 : i64, tpu.core_type = #tpu.core_type<tc>, window_params = [{transform_indices = @transform_0, window_bounds = array<i64: 1, 10, 10, 32>}, {pipeline_mode = #tpu.pipeline_mode<synchronous>, transform_indices = @transform_1, window_bounds = array<i64: 3, 3, 32, 8>}, {pipeline_mode = #tpu.pipeline_mode<synchronous>, transform_indices = @transform_2, window_bounds = array<i64: 1, 8>}, {transform_indices = @transform_3, window_bounds = array<i64: 1, 1>}, {transform_indices = @transform_4, window_bounds = array<i64: 1, 8, 8, 8>}]} {
    %c0 = arith.constant 0 : index
    %c0_0 = arith.constant 0 : index
    %c0_1 = arith.constant 0 : index
    %c0_2 = arith.constant 0 : index
    %0 = vector.load %arg1[%c0, %c0_0, %c0_1, %c0_2] : memref<1x10x10x32xbf16, #tpu.memory_space<vmem>>, vector<1x8x8x32xbf16>
    %1 = vector.shape_cast %0 : vector<1x8x8x32xbf16> to vector<8x8x32xbf16>
    %2 = vector.shape_cast %1 : vector<8x8x32xbf16> to vector<64x32xbf16>
    %c0_3 = arith.constant 0 : index
    %c0_4 = arith.constant 0 : index
    %c0_5 = arith.constant 0 : index
    %c0_6 = arith.constant 0 : index
    %3 = vector.load %arg2[%c0_3, %c0_4, %c0_5, %c0_6] : memref<3x3x32x8xbf16, #tpu.memory_space<vmem>>, vector<1x1x32x8xbf16>
    %4 = vector.shape_cast %3 : vector<1x1x32x8xbf16> to vector<32x8xbf16>
    %cst = arith.constant dense<0.000000e+00> : vector<64x8xf32>
    %5 = tpu.matmul %2, %4, %cst {dimension_numbers = #tpu.dot_dimension_numbers<[1], [0], [0], [1], [0, 0, 1, 1], [], []>} : vector<64x32xbf16>, vector<32x8xbf16>, vector<64x8xf32> -> vector<64x8xf32>
    %c0_7 = arith.constant 0 : index
    %c0_8 = arith.constant 0 : index
    %c1 = arith.constant 1 : index
    %c0_9 = arith.constant 0 : index
    %6 = vector.load %arg1[%c0_7, %c0_8, %c1, %c0_9] : memref<1x10x10x32xbf16, #tpu.memory_space<vmem>>, vector<1x8x8x32xbf16>
    %7 = vector.shape_cast %6 : vector<1x8x8x32xbf16> to vector<8x8x32xbf16>
    %8 = vector.shape_cast %7 : vector<8x8x32xbf16> to vector<64x32xbf16>
    %c0_10 = arith.constant 0 : index
    %c1_11 = arith.constant 1 : index
    %c0_12 = arith.constant 0 : index
    %c0_13 = arith.constant 0 : index
    %9 = vector.load %arg2[%c0_10, %c1_11, %c0_12, %c0_13] : memref<3x3x32x8xbf16, #tpu.memory_space<vmem>>, vector<1x1x32x8xbf16>
    %10 = vector.shape_cast %9 : vector<1x1x32x8xbf16> to vector<32x8xbf16>
    %cst_14 = arith.constant dense<0.000000e+00> : vector<64x8xf32>
    %11 = tpu.matmul %8, %10, %cst_14 {dimension_numbers = #tpu.dot_dimension_numbers<[1], [0], [0], [1], [0, 0, 1, 1], [], []>} : vector<64x32xbf16>, vector<32x8xbf16>, vector<64x8xf32> -> vector<64x8xf32>
    %12 = arith.addf %5, %11 : vector<64x8xf32>
    %c0_15 = arith.constant 0 : index
    %c0_16 = arith.constant 0 : index
    %c2 = arith.constant 2 : index
    %c0_17 = arith.constant 0 : index
    %13 = vector.load %arg1[%c0_15, %c0_16, %c2, %c0_17] : memref<1x10x10x32xbf16, #tpu.memory_space<vmem>>, vector<1x8x8x32xbf16>
    %14 = vector.shape_cast %13 : vector<1x8x8x32xbf16> to vector<8x8x32xbf16>
    %15 = vector.shape_cast %14 : vector<8x8x32xbf16> to vector<64x32xbf16>
    %c0_18 = arith.constant 0 : index
    %c2_19 = arith.constant 2 : index
    %c0_20 = arith.constant 0 : index
    %c0_21 = arith.constant 0 : index
    %16 = vector.load %arg2[%c0_18, %c2_19, %c0_20, %c0_21] : memref<3x3x32x8xbf16, #tpu.memory_space<vmem>>, vector<1x1x32x8xbf16>
    %17 = vector.shape_cast %16 : vector<1x1x32x8xbf16> to vector<32x8xbf16>
    %cst_22 = arith.constant dense<0.000000e+00> : vector<64x8xf32>
    %18 = tpu.matmul %15, %17, %cst_22 {dimension_numbers = #tpu.dot_dimension_numbers<[1], [0], [0], [1], [0, 0, 1, 1], [], []>} : vector<64x32xbf16>, vector<32x8xbf16>, vector<64x8xf32> -> vector<64x8xf32>
    %19 = arith.addf %12, %18 : vector<64x8xf32>
    %c0_23 = arith.constant 0 : index
    %c1_24 = arith.constant 1 : index
    %c0_25 = arith.constant 0 : index
    %c0_26 = arith.constant 0 : index
    %20 = vector.load %arg1[%c0_23, %c1_24, %c0_25, %c0_26] : memref<1x10x10x32xbf16, #tpu.memory_space<vmem>>, vector<1x8x8x32xbf16>
    %21 = vector.shape_cast %20 : vector<1x8x8x32xbf16> to vector<8x8x32xbf16>
    %22 = vector.shape_cast %21 : vector<8x8x32xbf16> to vector<64x32xbf16>
    %c1_27 = arith.constant 1 : index
    %c0_28 = arith.constant 0 : index
    %c0_29 = arith.constant 0 : index
    %c0_30 = arith.constant 0 : index
    %23 = vector.load %arg2[%c1_27, %c0_28, %c0_29, %c0_30] : memref<3x3x32x8xbf16, #tpu.memory_space<vmem>>, vector<1x1x32x8xbf16>
    %24 = vector.shape_cast %23 : vector<1x1x32x8xbf16> to vector<32x8xbf16>
    %cst_31 = arith.constant dense<0.000000e+00> : vector<64x8xf32>
    %25 = tpu.matmul %22, %24, %cst_31 {dimension_numbers = #tpu.dot_dimension_numbers<[1], [0], [0], [1], [0, 0, 1, 1], [], []>} : vector<64x32xbf16>, vector<32x8xbf16>, vector<64x8xf32> -> vector<64x8xf32>
    %26 = arith.addf %19, %25 : vector<64x8xf32>
    %c0_32 = arith.constant 0 : index
    %c1_33 = arith.constant 1 : index
    %c1_34 = arith.constant 1 : index
    %c0_35 = arith.constant 0 : index
    %27 = vector.load %arg1[%c0_32, %c1_33, %c1_34, %c0_35] : memref<1x10x10x32xbf16, #tpu.memory_space<vmem>>, vector<1x8x8x32xbf16>
    %28 = vector.shape_cast %27 : vector<1x8x8x32xbf16> to vector<8x8x32xbf16>
    %29 = vector.shape_cast %28 : vector<8x8x32xbf16> to vector<64x32xbf16>
    %c1_36 = arith.constant 1 : index
    %c1_37 = arith.constant 1 : index
    %c0_38 = arith.constant 0 : index
    %c0_39 = arith.constant 0 : index
    %30 = vector.load %arg2[%c1_36, %c1_37, %c0_38, %c0_39] : memref<3x3x32x8xbf16, #tpu.memory_space<vmem>>, vector<1x1x32x8xbf16>
    %31 = vector.shape_cast %30 : vector<1x1x32x8xbf16> to vector<32x8xbf16>
    %cst_40 = arith.constant dense<0.000000e+00> : vector<64x8xf32>
    %32 = tpu.matmul %29, %31, %cst_40 {dimension_numbers = #tpu.dot_dimension_numbers<[1], [0], [0], [1], [0, 0, 1, 1], [], []>} : vector<64x32xbf16>, vector<32x8xbf16>, vector<64x8xf32> -> vector<64x8xf32>
    %33 = arith.addf %26, %32 : vector<64x8xf32>
    %c0_41 = arith.constant 0 : index
    %c1_42 = arith.constant 1 : index
    %c2_43 = arith.constant 2 : index
    %c0_44 = arith.constant 0 : index
    %34 = vector.load %arg1[%c0_41, %c1_42, %c2_43, %c0_44] : memref<1x10x10x32xbf16, #tpu.memory_space<vmem>>, vector<1x8x8x32xbf16>
    %35 = vector.shape_cast %34 : vector<1x8x8x32xbf16> to vector<8x8x32xbf16>
    %36 = vector.shape_cast %35 : vector<8x8x32xbf16> to vector<64x32xbf16>
    %c1_45 = arith.constant 1 : index
    %c2_46 = arith.constant 2 : index
    %c0_47 = arith.constant 0 : index
    %c0_48 = arith.constant 0 : index
    %37 = vector.load %arg2[%c1_45, %c2_46, %c0_47, %c0_48] : memref<3x3x32x8xbf16, #tpu.memory_space<vmem>>, vector<1x1x32x8xbf16>
    %38 = vector.shape_cast %37 : vector<1x1x32x8xbf16> to vector<32x8xbf16>
    %cst_49 = arith.constant dense<0.000000e+00> : vector<64x8xf32>
    %39 = tpu.matmul %36, %38, %cst_49 {dimension_numbers = #tpu.dot_dimension_numbers<[1], [0], [0], [1], [0, 0, 1, 1], [], []>} : vector<64x32xbf16>, vector<32x8xbf16>, vector<64x8xf32> -> vector<64x8xf32>
    %40 = arith.addf %33, %39 : vector<64x8xf32>
    %c0_50 = arith.constant 0 : index
    %c2_51 = arith.constant 2 : index
    %c0_52 = arith.constant 0 : index
    %c0_53 = arith.constant 0 : index
    %41 = vector.load %arg1[%c0_50, %c2_51, %c0_52, %c0_53] : memref<1x10x10x32xbf16, #tpu.memory_space<vmem>>, vector<1x8x8x32xbf16>
    %42 = vector.shape_cast %41 : vector<1x8x8x32xbf16> to vector<8x8x32xbf16>
    %43 = vector.shape_cast %42 : vector<8x8x32xbf16> to vector<64x32xbf16>
    %c2_54 = arith.constant 2 : index
    %c0_55 = arith.constant 0 : index
    %c0_56 = arith.constant 0 : index
    %c0_57 = arith.constant 0 : index
    %44 = vector.load %arg2[%c2_54, %c0_55, %c0_56, %c0_57] : memref<3x3x32x8xbf16, #tpu.memory_space<vmem>>, vector<1x1x32x8xbf16>
    %45 = vector.shape_cast %44 : vector<1x1x32x8xbf16> to vector<32x8xbf16>
    %cst_58 = arith.constant dense<0.000000e+00> : vector<64x8xf32>
    %46 = tpu.matmul %43, %45, %cst_58 {dimension_numbers = #tpu.dot_dimension_numbers<[1], [0], [0], [1], [0, 0, 1, 1], [], []>} : vector<64x32xbf16>, vector<32x8xbf16>, vector<64x8xf32> -> vector<64x8xf32>
    %47 = arith.addf %40, %46 : vector<64x8xf32>
    %c0_59 = arith.constant 0 : index
    %c2_60 = arith.constant 2 : index
    %c1_61 = arith.constant 1 : index
    %c0_62 = arith.constant 0 : index
    %48 = vector.load %arg1[%c0_59, %c2_60, %c1_61, %c0_62] : memref<1x10x10x32xbf16, #tpu.memory_space<vmem>>, vector<1x8x8x32xbf16>
    %49 = vector.shape_cast %48 : vector<1x8x8x32xbf16> to vector<8x8x32xbf16>
    %50 = vector.shape_cast %49 : vector<8x8x32xbf16> to vector<64x32xbf16>
    %c2_63 = arith.constant 2 : index
    %c1_64 = arith.constant 1 : index
    %c0_65 = arith.constant 0 : index
    %c0_66 = arith.constant 0 : index
    %51 = vector.load %arg2[%c2_63, %c1_64, %c0_65, %c0_66] : memref<3x3x32x8xbf16, #tpu.memory_space<vmem>>, vector<1x1x32x8xbf16>
    %52 = vector.shape_cast %51 : vector<1x1x32x8xbf16> to vector<32x8xbf16>
    %cst_67 = arith.constant dense<0.000000e+00> : vector<64x8xf32>
    %53 = tpu.matmul %50, %52, %cst_67 {dimension_numbers = #tpu.dot_dimension_numbers<[1], [0], [0], [1], [0, 0, 1, 1], [], []>} : vector<64x32xbf16>, vector<32x8xbf16>, vector<64x8xf32> -> vector<64x8xf32>
    %54 = arith.addf %47, %53 : vector<64x8xf32>
    %c0_68 = arith.constant 0 : index
    %c2_69 = arith.constant 2 : index
    %c2_70 = arith.constant 2 : index
    %c0_71 = arith.constant 0 : index
    %55 = vector.load %arg1[%c0_68, %c2_69, %c2_70, %c0_71] : memref<1x10x10x32xbf16, #tpu.memory_space<vmem>>, vector<1x8x8x32xbf16>
    %56 = vector.shape_cast %55 : vector<1x8x8x32xbf16> to vector<8x8x32xbf16>
    %57 = vector.shape_cast %56 : vector<8x8x32xbf16> to vector<64x32xbf16>
    %c2_72 = arith.constant 2 : index
    %c2_73 = arith.constant 2 : index
    %c0_74 = arith.constant 0 : index
    %c0_75 = arith.constant 0 : index
    %58 = vector.load %arg2[%c2_72, %c2_73, %c0_74, %c0_75] : memref<3x3x32x8xbf16, #tpu.memory_space<vmem>>, vector<1x1x32x8xbf16>
    %59 = vector.shape_cast %58 : vector<1x1x32x8xbf16> to vector<32x8xbf16>
    %cst_76 = arith.constant dense<0.000000e+00> : vector<64x8xf32>
    %60 = tpu.matmul %57, %59, %cst_76 {dimension_numbers = #tpu.dot_dimension_numbers<[1], [0], [0], [1], [0, 0, 1, 1], [], []>} : vector<64x32xbf16>, vector<32x8xbf16>, vector<64x8xf32> -> vector<64x8xf32>
    %61 = arith.addf %54, %60 : vector<64x8xf32>
    %c0_77 = arith.constant 0 : index
    %c0_78 = arith.constant 0 : index
    %62 = vector.load %arg3[%c0_77, %c0_78] : memref<1x8xf32, #tpu.memory_space<vmem>>, vector<1x8xf32>
    %63 = vector.broadcast %62 : vector<1x8xf32> to vector<64x8xf32>
    %64 = arith.addf %61, %63 : vector<64x8xf32>
    %c0_79 = arith.constant 0 : index
    %c0_80 = arith.constant 0 : index
    %65 = memref.load %arg4[%c0_79, %c0_80] : memref<1x1xf32, #tpu.memory_space<smem>>
    %cst_81 = arith.constant 0.000000e+00 : f32
    %66 = vector.broadcast %cst_81 : f32 to vector<64x8xf32>
    %67 = arith.cmpf oge, %64, %66 : vector<64x8xf32>
    %68 = vector.broadcast %65 : f32 to vector<64x8xf32>
    %69 = arith.mulf %68, %64 : vector<64x8xf32>
    %70 = arith.select %67, %64, %69 : vector<64x8xi1>, vector<64x8xf32>
    %71 = vector.shape_cast %70 : vector<64x8xf32> to vector<8x8x8xf32>
    %72 = arith.truncf %71 : vector<8x8x8xf32> to vector<8x8x8xbf16>
    %c0_82 = arith.constant 0 : index
    %c0_83 = arith.constant 0 : index
    %c0_84 = arith.constant 0 : index
    %c0_85 = arith.constant 0 : index
    %73 = vector.load %arg5[%c0_82, %c0_83, %c0_84, %c0_85] : memref<1x8x8x8xbf16, #tpu.memory_space<vmem>>, vector<1x8x8x8xbf16>
    %74 = vector.shape_cast %73 : vector<1x8x8x8xbf16> to vector<8x8x8xbf16>
    %75 = vector.shape_cast %72 : vector<8x8x8xbf16> to vector<1x8x8x8xbf16>
    tpu.vector_store %arg5[%c0_82, %c0_83, %c0_84, %c0_85], %75 {strides = array<i32>} : memref<1x8x8x8xbf16, #tpu.memory_space<vmem>>, vector<1x8x8x8xbf16>,
    return
  }
  func.func @transform_0(%arg0: i32) -> (i32, i32, i32, i32) {
    %c0_i32 = arith.constant 0 : i32
    %c0_i32_0 = arith.constant 0 : i32
    %c0_i32_1 = arith.constant 0 : i32
    %c0_i32_2 = arith.constant 0 : i32
    return %arg0, %c0_i32, %c0_i32_0, %c0_i32_1 : i32, i32, i32, i32
  }
  func.func @transform_1(%arg0: i32) -> (i32, i32, i32, i32) {
    %c0_i32 = arith.constant 0 : i32
    %c0_i32_0 = arith.constant 0 : i32
    %c0_i32_1 = arith.constant 0 : i32
    %c0_i32_2 = arith.constant 0 : i32
    %c0_i32_3 = arith.constant 0 : i32
    return %c0_i32, %c0_i32_0, %c0_i32_1, %c0_i32_2 : i32, i32, i32, i32
  }
  func.func @transform_2(%arg0: i32) -> (i32, i32) {
    %c0_i32 = arith.constant 0 : i32
    %c0_i32_0 = arith.constant 0 : i32
    %c0_i32_1 = arith.constant 0 : i32
    return %c0_i32, %c0_i32_0 : i32, i32
  }
  func.func @transform_3(%arg0: i32) -> (i32, i32) {
    %c0_i32 = arith.constant 0 : i32
    %c0_i32_0 = arith.constant 0 : i32
    %c0_i32_1 = arith.constant 0 : i32
    return %c0_i32, %c0_i32_0 : i32, i32
  }
  func.func @transform_4(%arg0: i32) -> (i32, i32, i32, i32) {
    %c0_i32 = arith.constant 0 : i32
    %c0_i32_0 = arith.constant 0 : i32
    %c0_i32_1 = arith.constant 0 : i32
    %c0_i32_2 = arith.constant 0 : i32
    return %arg0, %c0_i32, %c0_i32_0, %c0_i32_1 : i32, i32, i32, i32
  }
}

module attributes {stable_mosaic.version = 11 : i64} {
  func.func @kernel(%arg0: i32, %arg1: memref<512x8xbf16, #tpu.memory_space<vmem>>, %arg2: memref<512x8xbf16, #tpu.memory_space<vmem>>, %arg3: memref<2x8x8xbf16, #tpu.memory_space<vmem>>, %arg4: memref<1x8xf32, #tpu.memory_space<vmem>>, %arg5: memref<1x1xf32, #tpu.memory_space<smem>>, %arg6: memref<512x8xbf16, #tpu.memory_space<vmem>>) attributes {dimension_semantics = [#tpu.dimension_semantics<parallel>], iteration_bounds = array<i64: 1>, scalar_prefetch = 0 : i64, scratch_operands = 0 : i64, tpu.core_type = #tpu.core_type<tc>, window_params = [{transform_indices = @transform_0, window_bounds = array<i64: 512, 8>}, {transform_indices = @transform_1, window_bounds = array<i64: 512, 8>}, {pipeline_mode = #tpu.pipeline_mode<synchronous>, transform_indices = @transform_2, window_bounds = array<i64: 2, 8, 8>}, {pipeline_mode = #tpu.pipeline_mode<synchronous>, transform_indices = @transform_3, window_bounds = array<i64: 1, 8>}, {transform_indices = @transform_4, window_bounds = array<i64: 1, 1>}, {transform_indices = @transform_5, window_bounds = array<i64: 512, 8>}]} {
    %c0 = arith.constant 0 : index
    %c0_0 = arith.constant 0 : index
    %0 = vector.load %arg1[%c0, %c0_0] : memref<512x8xbf16, #tpu.memory_space<vmem>>, vector<512x8xbf16>
    %c0_1 = arith.constant 0 : index
    %c0_2 = arith.constant 0 : index
    %c0_3 = arith.constant 0 : index
    %1 = vector.load %arg3[%c0_1, %c0_2, %c0_3] : memref<2x8x8xbf16, #tpu.memory_space<vmem>>, vector<1x8x8xbf16>
    %2 = vector.shape_cast %1 : vector<1x8x8xbf16> to vector<8x8xbf16>
    %cst = arith.constant dense<0.000000e+00> : vector<512x8xf32>
    %3 = tpu.matmul %0, %2, %cst {dimension_numbers = #tpu.dot_dimension_numbers<[1], [0], [0], [1], [0, 0, 1, 1], [], []>} : vector<512x8xbf16>, vector<8x8xbf16>, vector<512x8xf32> -> vector<512x8xf32>
    %c0_4 = arith.constant 0 : index
    %c0_5 = arith.constant 0 : index
    %4 = vector.load %arg2[%c0_4, %c0_5] : memref<512x8xbf16, #tpu.memory_space<vmem>>, vector<512x8xbf16>
    %c1 = arith.constant 1 : index
    %c0_6 = arith.constant 0 : index
    %c0_7 = arith.constant 0 : index
    %5 = vector.load %arg3[%c1, %c0_6, %c0_7] : memref<2x8x8xbf16, #tpu.memory_space<vmem>>, vector<1x8x8xbf16>
    %6 = vector.shape_cast %5 : vector<1x8x8xbf16> to vector<8x8xbf16>
    %cst_8 = arith.constant dense<0.000000e+00> : vector<512x8xf32>
    %7 = tpu.matmul %4, %6, %cst_8 {dimension_numbers = #tpu.dot_dimension_numbers<[1], [0], [0], [1], [0, 0, 1, 1], [], []>} : vector<512x8xbf16>, vector<8x8xbf16>, vector<512x8xf32> -> vector<512x8xf32>
    %8 = arith.addf %3, %7 : vector<512x8xf32>
    %c0_9 = arith.constant 0 : index
    %c0_10 = arith.constant 0 : index
    %9 = vector.load %arg4[%c0_9, %c0_10] : memref<1x8xf32, #tpu.memory_space<vmem>>, vector<1x8xf32>
    %10 = vector.broadcast %9 : vector<1x8xf32> to vector<512x8xf32>
    %11 = arith.addf %8, %10 : vector<512x8xf32>
    %c0_11 = arith.constant 0 : index
    %c0_12 = arith.constant 0 : index
    %12 = memref.load %arg5[%c0_11, %c0_12] : memref<1x1xf32, #tpu.memory_space<smem>>
    %cst_13 = arith.constant 0.000000e+00 : f32
    %13 = vector.broadcast %cst_13 : f32 to vector<512x8xf32>
    %14 = arith.cmpf oge, %11, %13 : vector<512x8xf32>
    %15 = vector.broadcast %12 : f32 to vector<512x8xf32>
    %16 = arith.mulf %15, %11 : vector<512x8xf32>
    %17 = arith.select %14, %11, %16 : vector<512x8xi1>, vector<512x8xf32>
    %18 = arith.truncf %17 : vector<512x8xf32> to vector<512x8xbf16>
    %c0_14 = arith.constant 0 : index
    %c0_15 = arith.constant 0 : index
    %19 = vector.load %arg6[%c0_14, %c0_15] : memref<512x8xbf16, #tpu.memory_space<vmem>>, vector<512x8xbf16>
    tpu.vector_store %arg6[%c0_14, %c0_15], %18 {strides = array<i32>} : memref<512x8xbf16, #tpu.memory_space<vmem>>, vector<512x8xbf16>,
    return
  }
  func.func @transform_0(%arg0: i32) -> (i32, i32) {
    %c0_i32 = arith.constant 0 : i32
    %c0_i32_0 = arith.constant 0 : i32
    return %arg0, %c0_i32 : i32, i32
  }
  func.func @transform_1(%arg0: i32) -> (i32, i32) {
    %c0_i32 = arith.constant 0 : i32
    %c0_i32_0 = arith.constant 0 : i32
    return %arg0, %c0_i32 : i32, i32
  }
  func.func @transform_2(%arg0: i32) -> (i32, i32, i32) {
    %c0_i32 = arith.constant 0 : i32
    %c0_i32_0 = arith.constant 0 : i32
    %c0_i32_1 = arith.constant 0 : i32
    %c0_i32_2 = arith.constant 0 : i32
    return %c0_i32, %c0_i32_0, %c0_i32_1 : i32, i32, i32
  }
  func.func @transform_3(%arg0: i32) -> (i32, i32) {
    %c0_i32 = arith.constant 0 : i32
    %c0_i32_0 = arith.constant 0 : i32
    %c0_i32_1 = arith.constant 0 : i32
    return %c0_i32, %c0_i32_0 : i32, i32
  }
  func.func @transform_4(%arg0: i32) -> (i32, i32) {
    %c0_i32 = arith.constant 0 : i32
    %c0_i32_0 = arith.constant 0 : i32
    %c0_i32_1 = arith.constant 0 : i32
    return %c0_i32, %c0_i32_0 : i32, i32
  }
  func.func @transform_5(%arg0: i32) -> (i32, i32) {
    %c0_i32 = arith.constant 0 : i32
    %c0_i32_0 = arith.constant 0 : i32
    return %arg0, %c0_i32 : i32, i32
  }
}

module attributes {stable_mosaic.version = 11 : i64} {
  func.func @kernel(%arg0: i32, %arg1: memref<128x8xbf16, #tpu.memory_space<vmem>>, %arg2: memref<128x8xbf16, #tpu.memory_space<vmem>>, %arg3: memref<2x8x8xbf16, #tpu.memory_space<vmem>>, %arg4: memref<1x8xf32, #tpu.memory_space<vmem>>, %arg5: memref<1x1xf32, #tpu.memory_space<smem>>, %arg6: memref<128x8xf32, #tpu.memory_space<vmem>>) attributes {dimension_semantics = [#tpu.dimension_semantics<parallel>], iteration_bounds = array<i64: 1>, scalar_prefetch = 0 : i64, scratch_operands = 0 : i64, tpu.core_type = #tpu.core_type<tc>, window_params = [{transform_indices = @transform_0, window_bounds = array<i64: 128, 8>}, {transform_indices = @transform_1, window_bounds = array<i64: 128, 8>}, {pipeline_mode = #tpu.pipeline_mode<synchronous>, transform_indices = @transform_2, window_bounds = array<i64: 2, 8, 8>}, {pipeline_mode = #tpu.pipeline_mode<synchronous>, transform_indices = @transform_3, window_bounds = array<i64: 1, 8>}, {transform_indices = @transform_4, window_bounds = array<i64: 1, 1>}, {transform_indices = @transform_5, window_bounds = array<i64: 128, 8>}]} {
    %c0 = arith.constant 0 : index
    %c0_0 = arith.constant 0 : index
    %0 = vector.load %arg1[%c0, %c0_0] : memref<128x8xbf16, #tpu.memory_space<vmem>>, vector<128x8xbf16>
    %c0_1 = arith.constant 0 : index
    %c0_2 = arith.constant 0 : index
    %c0_3 = arith.constant 0 : index
    %1 = vector.load %arg3[%c0_1, %c0_2, %c0_3] : memref<2x8x8xbf16, #tpu.memory_space<vmem>>, vector<1x8x8xbf16>
    %2 = vector.shape_cast %1 : vector<1x8x8xbf16> to vector<8x8xbf16>
    %cst = arith.constant dense<0.000000e+00> : vector<128x8xf32>
    %3 = tpu.matmul %0, %2, %cst {dimension_numbers = #tpu.dot_dimension_numbers<[1], [0], [0], [1], [0, 0, 1, 1], [], []>} : vector<128x8xbf16>, vector<8x8xbf16>, vector<128x8xf32> -> vector<128x8xf32>
    %c0_4 = arith.constant 0 : index
    %c0_5 = arith.constant 0 : index
    %4 = vector.load %arg2[%c0_4, %c0_5] : memref<128x8xbf16, #tpu.memory_space<vmem>>, vector<128x8xbf16>
    %c1 = arith.constant 1 : index
    %c0_6 = arith.constant 0 : index
    %c0_7 = arith.constant 0 : index
    %5 = vector.load %arg3[%c1, %c0_6, %c0_7] : memref<2x8x8xbf16, #tpu.memory_space<vmem>>, vector<1x8x8xbf16>
    %6 = vector.shape_cast %5 : vector<1x8x8xbf16> to vector<8x8xbf16>
    %cst_8 = arith.constant dense<0.000000e+00> : vector<128x8xf32>
    %7 = tpu.matmul %4, %6, %cst_8 {dimension_numbers = #tpu.dot_dimension_numbers<[1], [0], [0], [1], [0, 0, 1, 1], [], []>} : vector<128x8xbf16>, vector<8x8xbf16>, vector<128x8xf32> -> vector<128x8xf32>
    %8 = arith.addf %3, %7 : vector<128x8xf32>
    %c0_9 = arith.constant 0 : index
    %c0_10 = arith.constant 0 : index
    %9 = vector.load %arg4[%c0_9, %c0_10] : memref<1x8xf32, #tpu.memory_space<vmem>>, vector<1x8xf32>
    %10 = vector.broadcast %9 : vector<1x8xf32> to vector<128x8xf32>
    %11 = arith.addf %8, %10 : vector<128x8xf32>
    %c0_11 = arith.constant 0 : index
    %c0_12 = arith.constant 0 : index
    %12 = memref.load %arg5[%c0_11, %c0_12] : memref<1x1xf32, #tpu.memory_space<smem>>
    %cst_13 = arith.constant 0.000000e+00 : f32
    %13 = vector.broadcast %cst_13 : f32 to vector<128x8xf32>
    %14 = arith.cmpf oge, %11, %13 : vector<128x8xf32>
    %15 = vector.broadcast %12 : f32 to vector<128x8xf32>
    %16 = arith.mulf %15, %11 : vector<128x8xf32>
    %17 = arith.select %14, %11, %16 : vector<128x8xi1>, vector<128x8xf32>
    %c0_14 = arith.constant 0 : index
    %c0_15 = arith.constant 0 : index
    %18 = vector.load %arg6[%c0_14, %c0_15] : memref<128x8xf32, #tpu.memory_space<vmem>>, vector<128x8xf32>
    tpu.vector_store %arg6[%c0_14, %c0_15], %17 {strides = array<i32>} : memref<128x8xf32, #tpu.memory_space<vmem>>, vector<128x8xf32>,
    return
  }
  func.func @transform_0(%arg0: i32) -> (i32, i32) {
    %c0_i32 = arith.constant 0 : i32
    %c0_i32_0 = arith.constant 0 : i32
    return %arg0, %c0_i32 : i32, i32
  }
  func.func @transform_1(%arg0: i32) -> (i32, i32) {
    %c0_i32 = arith.constant 0 : i32
    %c0_i32_0 = arith.constant 0 : i32
    return %arg0, %c0_i32 : i32, i32
  }
  func.func @transform_2(%arg0: i32) -> (i32, i32, i32) {
    %c0_i32 = arith.constant 0 : i32
    %c0_i32_0 = arith.constant 0 : i32
    %c0_i32_1 = arith.constant 0 : i32
    %c0_i32_2 = arith.constant 0 : i32
    return %c0_i32, %c0_i32_0, %c0_i32_1 : i32, i32, i32
  }
  func.func @transform_3(%arg0: i32) -> (i32, i32) {
    %c0_i32 = arith.constant 0 : i32
    %c0_i32_0 = arith.constant 0 : i32
    %c0_i32_1 = arith.constant 0 : i32
    return %c0_i32, %c0_i32_0 : i32, i32
  }
  func.func @transform_4(%arg0: i32) -> (i32, i32) {
    %c0_i32 = arith.constant 0 : i32
    %c0_i32_0 = arith.constant 0 : i32
    %c0_i32_1 = arith.constant 0 : i32
    return %c0_i32, %c0_i32_0 : i32, i32
  }
  func.func @transform_5(%arg0: i32) -> (i32, i32) {
    %c0_i32 = arith.constant 0 : i32
    %c0_i32_0 = arith.constant 0 : i32
    return %arg0, %c0_i32 : i32, i32
  }
}

</mosaic_0001>

<bundles_post_ra>
// kernel: feedback_block_forward.8
= control target key start
LH: loop header
LB: loop body
LE: loop exit
PB: predicated region body
PF: predicated region fallthrough
CT: control target
= control target key end

     0   :  { %vm122_vm0 = vcmask 1043456   ;;  %vm97_vm1 = vcmask 64512   ;;  %vm524_vm3 = vcmask 60416   ;;  %s889_s2 = inlined_call_operand.vmem [shape: bf16[2,8,8], index: 2, kind: input, shape index: {}]   ;;  %s890_s1 = inlined_call_operand.vmem [shape: bf16[128,8], index: 1, kind: input, shape index: {}, may-alias: {0,1}]   ;;  %s891_s0 = inlined_call_operand.vmem [shape: bf16[128,8], index: 0, kind: input, shape index: {}, may-alias: {0,1}]   ;;  %s892_s3 = inlined_call_operand.vmem [shape: f32[1,8], index: 3, kind: input, shape index: {}]   ;;  %s893_s4 = inlined_call_operand.<no memory space> [shape: f32[1,1], index: 4, kind: input, shape index: {}]   ;;  %s894_s5 = inlined_call_operand.vmem [shape: bf16[128,8], index: 5, kind: output, shape index: {}]  }
   0x1   :  { %v545_v0 = vld [vmem:[%s889_s2 + $0x4] sm:$0xf]  ;;  %v38_v1 = vld [vmem:[%s889_s2] sm:$0xf]  ;;  %v669_v6 = vld [vmem:[%s890_s1 + $0x8] sm:$0xff]   ;;  %v791_v25 = vstv %s893_s4 }
   0x2   :  { %665 = vmatprep.subr.msk.bf16.mxu0 %vm122_vm0, %v545_v0  ;;  %666 = vmatprep.subr.msk.bf16.mxu1 %vm122_vm0, %v38_v1  ;;  %v124_v2 = vsel %vm122_vm0, %v545_v0, 0  ;;  %v288_v3 = vsel %vm122_vm0, %v38_v1, 0  ;;  %v667_v4 = vld [vmem:[%s890_s1] sm:$0xff]   ;;  %v670_v7 = vld [vmem:[%s891_s0 + $0x8] sm:$0xff]   ;;  %v671_v8 = vld [vmem:[%s890_s1 + $0x10] sm:$0xff]  }
   0x3   :  { %v668_v5 = vld [vmem:[%s891_s0] sm:$0xff]   ;;  %630 = vmatpush3.bf16.msra.mxu0 %v124_v2  ;;  %648 = vmatpush3.bf16.msra.mxu1 %v288_v3  ;;  %v672_v9 = vld [vmem:[%s891_s0 + $0x10] sm:$0xff]   ;;  %v673_v10 = vld [vmem:[%s890_s1 + $0x18] sm:$0xff]  }
   0x4   :  { %631 = vmatprep.mubr.msk.bf16.mxu0 %vm97_vm1, %v667_v4  ;;  %649 = vmatprep.mubr.msk.bf16.mxu1 %vm97_vm1, %v668_v5  ;;  %v674_v11 = vld [vmem:[%s891_s0 + $0x18] sm:$0xff]   ;;  %v675_v12 = vld [vmem:[%s890_s1 + $0x20] sm:$0xff]   ;;  %v677_v14 = vld [vmem:[%s890_s1 + $0x28] sm:$0xff]  }
   0x5   :  { %v676_v13 = vld [vmem:[%s891_s0 + $0x20] sm:$0xff]   ;;  %v678_v15 = vld [vmem:[%s891_s0 + $0x28] sm:$0xff]   ;;  %v679_v16 = vld [vmem:[%s890_s1 + $0x30] sm:$0xff]  }
   0x6   :  { %632 = vmatmul.mubr.msk.bf16.vlgmr.msra.gmra.mxu0 %vm97_vm1, %v669_v6  ;;  %650 = vmatmul.mubr.msk.bf16.vlgmr.msra.gmra.mxu1 %vm97_vm1, %v670_v7  ;;  %v680_v17 = vld [vmem:[%s891_s0 + $0x30] sm:$0xff]   ;;  %v681_v18 = vld [vmem:[%s890_s1 + $0x38] sm:$0xff]   ;;  %v786_v22 = vld [vmem:[%s892_s3] ss:$0 sm:$0xff] }
   0x7   :  { %635 = vmatprep.mubr.msk.bf16.mxu0 %vm97_vm1, %v671_v8  ;;  %653 = vmatprep.mubr.msk.bf16.mxu1 %vm97_vm1, %v672_v9  ;;  %v682_v19 = vld [vmem:[%s891_s0 + $0x38] sm:$0xff]  }
   0xe   :  { %636 = vmatmul.mubr.msk.bf16.gmra.mxu0 %vm97_vm1, %v673_v10  ;;  %654 = vmatmul.mubr.msk.bf16.gmra.mxu1 %vm97_vm1, %v674_v11 }
   0xf   :  { %639 = vmatprep.mubr.msk.bf16.mxu0 %vm97_vm1, %v675_v12  ;;  %657 = vmatprep.mubr.msk.bf16.mxu1 %vm97_vm1, %v676_v13 }
  0x16   :  { %640 = vmatmul.mubr.msk.bf16.gmra.mxu0 %vm97_vm1, %v677_v14  ;;  %658 = vmatmul.mubr.msk.bf16.gmra.mxu1 %vm97_vm1, %v678_v15 }
  0x17   :  { %643 = vmatprep.mubr.msk.bf16.mxu0 %vm97_vm1, %v679_v16  ;;  %661 = vmatprep.mubr.msk.bf16.mxu1 %vm97_vm1, %v680_v17 }
  0x1e   :  { %644 = vmatmul.mubr.msk.bf16.gmra.mxu0 %vm97_vm1, %v681_v18  ;;  %662 = vmatmul.mubr.msk.bf16.gmra.mxu1 %vm97_vm1, %v682_v19 }
  0xc6   :  { %v633_v20 = vpop.f32.mrf.mxu0  ;;  %v651_v21 = vpop.f32.mrf.mxu1 }
  0xc7   :  { %v333_v23 = vadd.f32 %v651_v21, %v633_v20 }
  0xc8   :  { %v160_v24 = vpop.f32.mrf.mxu0  ;;  %v324_v26 = vpop.f32.mrf.mxu1 }
  0xc9   :  { %v396_v27 = vadd.f32 %v786_v22, %v333_v23  ;;  %v325_v28 = vadd.f32 %v324_v26, %v160_v24 }
  0xca   :  { %v634_v29 = vpop.f32.mrf.mxu0  ;;  %v652_v30 = vpop.f32.mrf.mxu1 }
  0xcb   :  { %vm413_vm2 = vcmp.ge.f32.partialorder %v396_v27, 0.0  ;;  %v430_v31 = vmul.f32 %v791_v25, %v396_v27  ;;  %v394_v32 = vadd.f32 %v786_v22, %v325_v28  ;;  %v336_v33 = vadd.f32 %v652_v30, %v634_v29 }
  0xcc   :  { %v163_v34 = vpop.f32.mrf.mxu0  ;;  %v327_v35 = vpop.f32.mrf.mxu1 }
  0xcd   :  { %v446_v36 = vsel %vm413_vm2, %v396_v27, %v430_v31  ;;  %vm411_vm4 = vcmp.ge.f32.partialorder %v394_v32, 0.0  ;;  %v428_v37 = vmul.f32 %v791_v25, %v394_v32  ;;  %v397_v38 = vadd.f32 %v786_v22, %v336_v33 }
  0xce   :  { %v637_v39 = vpop.f32.mrf.mxu0  ;;  %v597_v40 = vpack.c.bf16 %v446_v36, %v446_v36  ;;  %v328_v41 = vadd.f32 %v327_v35, %v163_v34  ;;  %v655_v42 = vpop.f32.mrf.mxu1 }
  0xcf   :  { %v444_v43 = vsel %vm411_vm4, %v394_v32, %v428_v37  ;;  %vm414_vm5 = vcmp.ge.f32.partialorder %v397_v38, 0.0  ;;  %v431_v44 = vmul.f32 %v791_v25, %v397_v38  ;;  %v349_v45 = vadd.f32 %v655_v42, %v637_v39 }
  0xd0   :  { %v176_v46 = vpop.f32.mrf.mxu0  ;;  %527 = vst.msk [vmem:[%s894_s5 + $0x8] sm:$0xf] %vm524_vm3, %v597_v40  ;;  %v595_v47 = vpack.c.bf16 %v444_v43, %v444_v43  ;;  %v395_v48 = vadd.f32 %v786_v22, %v328_v41  ;;  %v340_v49 = vpop.f32.mrf.mxu1 }
  0xd1   :  { %v447_v50 = vsel %vm414_vm5, %v397_v38, %v431_v44  ;;  %v400_v51 = vadd.f32 %v786_v22, %v349_v45  ;;  %v341_v52 = vadd.f32 %v340_v49, %v176_v46 }
  0xd2   :  { %v638_v53 = vpop.f32.mrf.mxu0  ;;  %525 = vst.msk [vmem:[%s894_s5] sm:$0xf] %vm524_vm3, %v595_v47  ;;  %v598_v54 = vpack.c.bf16 %v447_v50, %v447_v50  ;;  %vm412_vm6 = vcmp.ge.f32.partialorder %v395_v48, 0.0  ;;  %v429_v55 = vmul.f32 %v791_v25, %v395_v48  ;;  %v656_v56 = vpop.f32.mrf.mxu1 }
  0xd3   :  { %vm417_vm7 = vcmp.ge.f32.partialorder %v400_v51, 0.0  ;;  %v434_v57 = vmul.f32 %v791_v25, %v400_v51  ;;  %v398_v58 = vadd.f32 %v786_v22, %v341_v52  ;;  %v352_v59 = vadd.f32 %v656_v56, %v638_v53 }
  0xd4   :  { %v179_v60 = vpop.f32.mrf.mxu0  ;;  %528 = vst.msk [vmem:[%s894_s5 + $0xc] sm:$0xf] %vm524_vm3, %v598_v54  ;;  %v445_v61 = vsel %vm412_vm6, %v395_v48, %v429_v55  ;;  %v343_v62 = vpop.f32.mrf.mxu1 }
  0xd5   :  { %v596_v63 = vpack.c.bf16 %v445_v61, %v445_v61  ;;  %v450_v0 = vsel %vm417_vm7, %v400_v51, %v434_v57  ;;  %vm415_vm8 = vcmp.ge.f32.partialorder %v398_v58, 0.0  ;;  %v432_v1 = vmul.f32 %v791_v25, %v398_v58 }
  0xd6   :  { %v641_v2 = vpop.f32.mrf.mxu0  ;;  %v601_v3 = vpack.c.bf16 %v450_v0, %v450_v0  ;;  %v401_v4 = vadd.f32 %v786_v22, %v352_v59  ;;  %v344_v5 = vadd.f32 %v343_v62, %v179_v60  ;;  %v659_v6 = vpop.f32.mrf.mxu1 }
  0xd7   :  { %526 = vst.msk [vmem:[%s894_s5 + $0x4] sm:$0xf] %vm524_vm3, %v596_v63  ;;  %v448_v7 = vsel %vm415_vm8, %v398_v58, %v432_v1  ;;  %v365_v8 = vadd.f32 %v659_v6, %v641_v2 }
  0xd8   :  { %v192_v9 = vpop.f32.mrf.mxu0  ;;  %531 = vst.msk [vmem:[%s894_s5 + $0x18] sm:$0xf] %vm524_vm3, %v601_v3  ;;  %v599_v10 = vpack.c.bf16 %v448_v7, %v448_v7  ;;  %vm418_vm9 = vcmp.ge.f32.partialorder %v401_v4, 0.0  ;;  %v435_v11 = vmul.f32 %v791_v25, %v401_v4  ;;  %v399_v12 = vadd.f32 %v786_v22, %v344_v5  ;;  %v356_v13 = vpop.f32.mrf.mxu1 }
  0xd9   :  { %v404_v14 = vadd.f32 %v786_v22, %v365_v8  ;;  %v357_v15 = vadd.f32 %v356_v13, %v192_v9 }
  0xda   :  { %v642_v16 = vpop.f32.mrf.mxu0  ;;  %529 = vst.msk [vmem:[%s894_s5 + $0x10] sm:$0xf] %vm524_vm3, %v599_v10  ;;  %v451_v17 = vsel %vm418_vm9, %v401_v4, %v435_v11  ;;  %vm416_vm10 = vcmp.ge.f32.partialorder %v399_v12, 0.0  ;;  %v433_v18 = vmul.f32 %v791_v25, %v399_v12  ;;  %v660_v19 = vpop.f32.mrf.mxu1 }
  0xdb   :  { %v602_v20 = vpack.c.bf16 %v451_v17, %v451_v17  ;;  %vm421_vm11 = vcmp.ge.f32.partialorder %v404_v14, 0.0  ;;  %v438_v21 = vmul.f32 %v791_v25, %v404_v14  ;;  %v402_v23 = vadd.f32 %v786_v22, %v357_v15 }
  0xdc   :  { %v195_v24 = vpop.f32.mrf.mxu0  ;;  %v449_v26 = vsel %vm416_vm10, %v399_v12, %v433_v18  ;;  %v368_v27 = vadd.f32 %v660_v19, %v642_v16  ;;  %v359_v28 = vpop.f32.mrf.mxu1 }
  0xdd   :  { %532 = vst.msk [vmem:[%s894_s5 + $0x1c] sm:$0xf] %vm524_vm3, %v602_v20  ;;  %v600_v29 = vpack.c.bf16 %v449_v26, %v449_v26  ;;  %v454_v30 = vsel %vm421_vm11, %v404_v14, %v438_v21  ;;  %vm419_vm12 = vcmp.ge.f32.partialorder %v402_v23, 0.0  ;;  %v436_v31 = vmul.f32 %v791_v25, %v402_v23 }
  0xde   :  { %v645_v32 = vpop.f32.mrf.mxu0  ;;  %v605_v33 = vpack.c.bf16 %v454_v30, %v454_v30  ;;  %v405_v34 = vadd.f32 %v786_v22, %v368_v27  ;;  %v360_v35 = vadd.f32 %v359_v28, %v195_v24  ;;  %v663_v36 = vpop.f32.mrf.mxu1 }
  0xdf   :  { %530 = vst.msk [vmem:[%s894_s5 + $0x14] sm:$0xf] %vm524_vm3, %v600_v29  ;;  %v452_v37 = vsel %vm419_vm12, %v402_v23, %v436_v31  ;;  %v381_v38 = vadd.f32 %v663_v36, %v645_v32 }
  0xe0   :  { %v208_v39 = vpop.f32.mrf.mxu0  ;;  %535 = vst.msk [vmem:[%s894_s5 + $0x28] sm:$0xf] %vm524_vm3, %v605_v33  ;;  %v603_v40 = vpack.c.bf16 %v452_v37, %v452_v37  ;;  %vm422_vm13 = vcmp.ge.f32.partialorder %v405_v34, 0.0  ;;  %v439_v41 = vmul.f32 %v791_v25, %v405_v34  ;;  %v403_v42 = vadd.f32 %v786_v22, %v360_v35  ;;  %v372_v43 = vpop.f32.mrf.mxu1 }
  0xe1   :  { %v408_v44 = vadd.f32 %v786_v22, %v381_v38  ;;  %v373_v45 = vadd.f32 %v372_v43, %v208_v39 }
  0xe2   :  { %v646_v46 = vpop.f32.mrf.mxu0  ;;  %533 = vst.msk [vmem:[%s894_s5 + $0x20] sm:$0xf] %vm524_vm3, %v603_v40  ;;  %v455_v47 = vsel %vm422_vm13, %v405_v34, %v439_v41  ;;  %vm420_vm14 = vcmp.ge.f32.partialorder %v403_v42, 0.0  ;;  %v437_v48 = vmul.f32 %v791_v25, %v403_v42  ;;  %v664_v49 = vpop.f32.mrf.mxu1 }
  0xe3   :  { %v606_v50 = vpack.c.bf16 %v455_v47, %v455_v47  ;;  %vm425_vm15 = vcmp.ge.f32.partialorder %v408_v44, 0.0  ;;  %v442_v51 = vmul.f32 %v791_v25, %v408_v44  ;;  %v406_v52 = vadd.f32 %v786_v22, %v373_v45 }
  0xe4   :  { %v211_v53 = vpop.f32.mrf.mxu0  ;;  %v453_v54 = vsel %vm420_vm14, %v403_v42, %v437_v48  ;;  %v384_v55 = vadd.f32 %v664_v49, %v646_v46  ;;  %v375_v56 = vpop.f32.mrf.mxu1 }
  0xe5   :  { %536 = vst.msk [vmem:[%s894_s5 + $0x2c] sm:$0xf] %vm524_vm3, %v606_v50  ;;  %v604_v57 = vpack.c.bf16 %v453_v54, %v453_v54  ;;  %v458_v58 = vsel %vm425_vm15, %v408_v44, %v442_v51  ;;  %vm423_vm0 = vcmp.ge.f32.partialorder %v406_v52, 0.0  ;;  %v440_v59 = vmul.f32 %v791_v25, %v406_v52 }
  0xe6   :  { %v609_v60 = vpack.c.bf16 %v458_v58, %v458_v58  ;;  %v409_v61 = vadd.f32 %v786_v22, %v384_v55  ;;  %v376_v62 = vadd.f32 %v375_v56, %v211_v53 }
  0xe7   :  { %534 = vst.msk [vmem:[%s894_s5 + $0x24] sm:$0xf] %vm524_vm3, %v604_v57  ;;  %v456_v63 = vsel %vm423_vm0, %v406_v52, %v440_v59 }
  0xe8   :  { %539 = vst.msk [vmem:[%s894_s5 + $0x38] sm:$0xf] %vm524_vm3, %v609_v60  ;;  %v607_v0 = vpack.c.bf16 %v456_v63, %v456_v63  ;;  %vm426_vm1 = vcmp.ge.f32.partialorder %v409_v61, 0.0  ;;  %v443_v1 = vmul.f32 %v791_v25, %v409_v61  ;;  %v407_v2 = vadd.f32 %v786_v22, %v376_v62 }
  0xea   :  { %537 = vst.msk [vmem:[%s894_s5 + $0x30] sm:$0xf] %vm524_vm3, %v607_v0  ;;  %v459_v3 = vsel %vm426_vm1, %v409_v61, %v443_v1  ;;  %vm424_vm2 = vcmp.ge.f32.partialorder %v407_v2, 0.0  ;;  %v441_v4 = vmul.f32 %v791_v25, %v407_v2 }
  0xeb   :  { %v610_v5 = vpack.c.bf16 %v459_v3, %v459_v3 }
  0xec   :  { %v457_v6 = vsel %vm424_vm2, %v407_v2, %v441_v4 }
  0xed   :  { %540 = vst.msk [vmem:[%s894_s5 + $0x3c] sm:$0xf] %vm524_vm3, %v610_v5  ;;  %v608_v7 = vpack.c.bf16 %v457_v6, %v457_v6 }
  0xef   :  { %538 = vst.msk [vmem:[%s894_s5 + $0x34] sm:$0xf] %vm524_vm3, %v608_v7 }

// kernel: feedback_block_forward.9
= control target key start
LH: loop header
LB: loop body
LE: loop exit
PB: predicated region body
PF: predicated region fallthrough
CT: control target
= control target key end

     0   :  { %s2200_s17 = smov 0   ;;  %s2767_s0 = inlined_call_operand.vmem [shape: bf16[2,10,10,8], index: 0, kind: input, shape index: {}]   ;;  %s2768_s1 = inlined_call_operand.vmem [shape: bf16[3,3,8,32], index: 1, kind: input, shape index: {}]   ;;  %s2769_s2 = inlined_call_operand.vmem [shape: f32[1,32], index: 2, kind: input, shape index: {}]   ;;  %s2770_s3 = inlined_call_operand.<no memory space> [shape: f32[1,1], index: 3, kind: input, shape index: {}]   ;;  %s2771_s4 = inlined_call_operand.vmem [shape: bf16[2,8,8,32], index: 4, kind: output, shape index: {}]  }
   0x1   :  { %9 = sst [smem:[#allocation2]] %s2770_s3 }
   0x2 LB: > { %s1816_s18 = sadd.s32 4294967295, %s2170_s17   ;;  %p1820_p0 = scmp.ge.s32.totalorder %s2170_s17, 1  ;;  %s2170_s17 = sphi %s2200_s17, %s15_s17  }
   0x3   : > { %p163_p1 = scmp.lt.s32.totalorder %s2170_s17, 3 }
   0x5   : > { %p164_p2 = pnand %p1820_p0, %p163_p1 }
   0x6   : > { %p189_p3 = scmp.lt.s32.totalorder (!%p164_p2), %s1816_s18, 1  ;;  %s1718_s14 = sld [smem:[#allocation2]] (!%p164_p2) }
   0x7   : > { %167 = sbr.rel (%p164_p2) target bundleno = 322 (0x142), region = 36 }
   0xc   : > { %v1824_v0 = vld [vmem:[%s2768_s1 + $0x4] sm:$0xf]  ;;  %vm359_vm0 = vcmask 1043456   ;;  %v208_v2 = vld [vmem:[%s2768_s1] sm:$0xf]  ;;  %s2777_s18 = smov (!%p189_p3, %s1816_s18), 1 }
   0xd   : > { %2134 = vmatprep.subr.msk.bf16.mxu1 %vm359_vm0, %v1824_v0  ;;  %2133 = vmatprep.subr.msk.bf16.mxu0 %vm359_vm0, %v1824_v0  ;;  %v361_v1 = vsel %vm359_vm0, %v1824_v0, 0  ;;  %v1849_v3 = vld [vmem:[%s2768_s1 + $0x8] sm:$0xf]  ;;  %v2227_v4 = vld [vmem:[%s2768_s1 + $0xc] sm:$0xf]  ;;  %s2143_s28 = smul.u32 80, %s2777_s18 }
   0xe   : > { %2132 = vmatpush3.bf16.msra.mxu1 %v361_v1  ;;  %2042 = vmatpush3.bf16.msra.mxu0 %v361_v1  ;;  %v2232_v5 = vld [vmem:[%s2768_s1 + $0x10] sm:$0xf]  ;;  %vm217_vm1 = vsmask.f32 3328  ;;  %v2238_v6 = vld [vmem:[%s2768_s1 + $0x14] sm:$0xf] }
   0xf   : > { %2135 = vmatprep.subr.msk.bf16.mxu1 %vm359_vm0, %v208_v2  ;;  %2136 = vmatprep.subr.msk.bf16.mxu0 %vm359_vm0, %v1849_v3  ;;  %vm218_vm2 = vsmask.f32 7440  ;;  %v2241_v7 = vsel %vm359_vm0, %v208_v2, 0  ;;  %v2244_v8 = vsel %vm359_vm0, %v1849_v3, 0  ;;  %v2249_v9 = vld [vmem:[%s2768_s1 + $0x18] sm:$0xf]  ;;  %s2254_s9 = scalar_lea.vmem %s2767_s0, %s2143_s28 }
  0x10   : > { %v2258_v10 = vsel %vm359_vm0, %v2227_v4, 0  ;;  %v2262_v11 = vsel %vm359_vm0, %v2232_v5, 0  ;;  %v2266_v12 = vsel %vm359_vm0, %v2238_v6, 0  ;;  %v2270_v13 = vsel %vm359_vm0, %v2249_v9, 0  ;;  %v2273_v14 = vld [vmem:[%s2254_s9] sm:$0xf]  ;;  %vm2311_vm4 = vmor %vm217_vm1, %vm218_vm2 }
  0x11   : > { %v2276_v15 = vld [vmem:[%s2254_s9 + $0x8] sm:$0xf]  ;;  %v2279_v16 = vld [vmem:[%s2254_s9 + $0x4] sm:$0x1]  ;;  %v2282_v17 = vld [vmem:[%s2254_s9 + $0xc] sm:$0x1] }
  0x12   : > { %v221_v18 = vshrl.u32 %v2273_v14, 16  ;;  %v224_v19 = vshll.u32 %v2273_v14, 16  ;;  %v230_v20 = vshll.u32 %v2279_v16, 16  ;;  %v235_v21 = vshrl.u32 %v2276_v15, 16  ;;  %v2293_v26 = vld [vmem:[%s2254_s9 + $0x20] sm:$0xf] }
  0x13   : > { %v238_v22 = vshll.u32 %v2276_v15, 16  ;;  %v244_v23 = vshll.u32 %v2282_v17, 16  ;;  %vm346_vm3 = vcmask 64512   ;;  %v557_v24 = vrot.slane %v2279_v16, 5  ;;  %v2296_v31 = vld [vmem:[%s2254_s9 + $0x28] sm:$0xf] }
  0x14   : > { %v561_v25 = vrot.slane %v2282_v17, 5  ;;  %v223_v27 = vrot.slane %v221_v18, 4  ;;  %v226_v28 = vrot.slane %v224_v19, 5  ;;  %v232_v29 = vrot.slane %v230_v20, 5  ;;  %v2299_v34 = vld [vmem:[%s2254_s9 + $0x24] sm:$0x1] }
  0x15   : > { %v237_v30 = vrot.slane %v235_v21, 4  ;;  %v240_v32 = vrot.slane %v238_v22, 5  ;;  %v246_v33 = vrot.slane %v244_v23, 5  ;;  %v2302_v35 = vld [vmem:[%s2254_s9 + $0x2c] sm:$0x1]  ;;  %v1833_v36 = vcombine.low %v2273_v14, %v2276_v15  ;;  %s1995_s19 = sshll.u32 %s2777_s18, 5 }
  0x16   : > { %v227_v37 = vor.u32 %v226_v28, %v223_v27  ;;  %v277_v38 = vshrl.u32 %v2293_v26, 16  ;;  %v280_v39 = vshll.u32 %v2293_v26, 16  ;;  %v286_v40 = vshll.u32 %v2299_v34, 16  ;;  %v2319_v46 = vld [vmem:[%s2254_s9 + $0x10] sm:$0xf]  ;;  %s2731_s21 = scalar_lea.vmem %s2771_s4, %s1995_s19 }
  0x17   : > { %v241_v42 = vor.u32 %v240_v32, %v237_v30  ;;  %v291_v43 = vshrl.u32 %v2296_v31, 16  ;;  %v294_v44 = vshll.u32 %v2296_v31, 16  ;;  %v300_v45 = vshll.u32 %v2302_v35, 16  ;;  %v2322_v51 = vld [vmem:[%s2254_s9 + $0x18] sm:$0xf] }
  0x18   : > { %v228_v47 = vrot.slane %v227_v37, 4  ;;  %v279_v48 = vrot.slane %v277_v38, 4  ;;  %v282_v49 = vrot.slane %v280_v39, 5  ;;  %v288_v50 = vrot.slane %v286_v40, 5  ;;  %v2325_v56 = vld [vmem:[%s2254_s9 + $0x14] sm:$0x1] }
  0x19   : > { %vm552_vm5 = vcmask 1042432   ;;  %vm553_vm6 = vcmask 1046532   ;;  %v242_v52 = vrot.slane %v241_v42, 4  ;;  %v293_v53 = vrot.slane %v291_v43, 4  ;;  %v2334_v63 = vld [vmem:[%s2254_s9 + $0x1c] sm:$0x1] }
  0x1a   : > { %v296_v54 = vrot.slane %v294_v44, 5  ;;  %v302_v55 = vrot.slane %v300_v45, 5  ;;  %v233_v57 = vsel %vm2311_vm4, %v228_v47, %v232_v29  ;;  %v283_v58 = vor.u32 %v282_v49, %v279_v48  ;;  %v2342_v27 = vld [vmem:[%s2254_s9 + $0x30] sm:$0xf]  ;;  %v2349_v32 = vld [vmem:[%s2254_s9 + $0x38] sm:$0xf]  ;;  %vm2379_vm7 = vmor %vm552_vm5, %vm553_vm6 }
  0x1b   : > { %v573_v59 = vrot.slane %v2299_v34, 5  ;;  %v577_v60 = vrot.slane %v2302_v35, 5  ;;  %v247_v61 = vsel %vm2311_vm4, %v242_v52, %v246_v33  ;;  %v249_v0 = vshrl.u32 %v2319_v46, 16  ;;  %v2352_v33 = vld [vmem:[%s2254_s9 + $0x34] sm:$0x1] }
  0x1c   : > { %v297_v62 = vor.u32 %v296_v54, %v293_v53  ;;  %v252_v1 = vshll.u32 %v2319_v46, 16  ;;  %v1825_v2 = vcombine.low %v233_v57, %v247_v61  ;;  %v284_v3 = vrot.slane %v283_v58, 4  ;;  %v2359_v43 = vld [vmem:[%s2254_s9 + $0x3c] sm:$0x1]  ;;  %v528_v44 = vld [vmem:[%s2254_s9] sm:$0xe] }
  0x1d   : > { %v258_v18 = vshll.u32 %v2325_v56, 16  ;;  %v263_v19 = vshrl.u32 %v2322_v51, 16  ;;  %v251_v21 = vrot.slane %v249_v0, 4  ;;  %v266_v23 = vshll.u32 %v2322_v51, 16  ;;  %v530_v57 = vld [vmem:[%s2254_s9 + $0x10] sm:$0xe] }
  0x1e   : > { %v298_v20 = vrot.slane %v297_v62, 4  ;;  %v254_v22 = vrot.slane %v252_v1, 5  ;;  %2043 = vmatprep.mubr.msk.bf16.mxu0 %vm346_vm3, %v1825_v2  ;;  %v289_v28 = vsel %vm2311_vm4, %v284_v3, %v288_v50  ;;  %v272_v30 = vshll.u32 %v2334_v63, 16  ;;  %v529_v50 = vld [vmem:[%s2254_s9 + $0x8] sm:$0xe] }
  0x1f   : > { %v265_v29 = vrot.slane %v263_v19, 4  ;;  %v1835_v37 = vcombine.low %v2293_v26, %v2296_v31  ;;  %v260_v40 = vrot.slane %v258_v18, 5  ;;  %v268_v42 = vrot.slane %v266_v23, 5  ;;  %v532_v1 = vld [vmem:[%s2254_s9 + $0x20] sm:$0xe] }
  0x20   : > { %v303_v38 = vsel %vm2311_vm4, %v298_v20, %v302_v55  ;;  %v255_v39 = vor.u32 %v254_v22, %v251_v21  ;;  %v274_v47 = vrot.slane %v272_v30, 5  ;;  %v565_v48 = vrot.slane %v2325_v56, 5  ;;  %v531_v56 = vld [vmem:[%s2254_s9 + $0x18] sm:$0xe]  ;;  %v1883_v15 = vld [vmem:[%s2254_s9 + $0x28] sm:$0xf] }
  0x21   : > { %v1827_v45 = vcombine.low %v289_v28, %v303_v38  ;;  %v305_v49 = vshrl.u32 %v2342_v27, 16  ;;  %v269_v53 = vor.u32 %v268_v42, %v265_v29  ;;  %v308_v54 = vshll.u32 %v2342_v27, 16 }
  0x22   : > { %v256_v52 = vrot.slane %v255_v39, 4  ;;  %v314_v55 = vshll.u32 %v2352_v33, 16  ;;  %v319_v61 = vshrl.u32 %v2349_v32, 16  ;;  %v322_v62 = vshll.u32 %v2349_v32, 16 }
  0x23   : > { %2047 = vmatprep.mubr.msk.bf16.mxu1 %vm346_vm3, %v1827_v45  ;;  %v307_v58 = vrot.slane %v305_v49, 4  ;;  %v328_v0 = vshll.u32 %v2359_v43, 16  ;;  %v270_v3 = vrot.slane %v269_v53, 4  ;;  %v569_v18 = vrot.slane %v2334_v63, 5  ;;  %v533_v63 = vld [vmem:[%s2254_s9 + $0x28] sm:$0xe] }
  0x24   : > { %v261_v2 = vsel %vm2311_vm4, %v256_v52, %v260_v40  ;;  %v310_v19 = vrot.slane %v308_v54, 5  ;;  %v316_v21 = vrot.slane %v314_v55, 5  ;;  %v321_v22 = vrot.slane %v319_v61, 4  ;;  %v534_v52 = vld [vmem:[%s2254_s9 + $0x30] sm:$0xe] }
  0x25   : > { %v324_v23 = vrot.slane %v322_v62, 5  ;;  %v1841_v28 = vrot.slane %v528_v44, 9  ;;  %v275_v29 = vsel %vm2311_vm4, %v270_v3, %v274_v47  ;;  %v330_v38 = vrot.slane %v328_v0, 5  ;;  %v535_v54 = vld [vmem:[%s2254_s9 + $0x38] sm:$0xe] }
  0x26   : > { %v311_v30 = vor.u32 %v310_v19, %v307_v58  ;;  %v1842_v39 = vrot.slane %v529_v50, 9  ;;  %v1826_v40 = vcombine.low %v261_v2, %v275_v29  ;;  %v1843_v49 = vrot.slane %v530_v57, 9  ;;  %v2412_v62 = vld [vmem:[%s2254_s9 + $0xc] sm:$0x1] }
  0x27   : > { %v325_v42 = vor.u32 %v324_v23, %v321_v22  ;;  %v558_v45 = vsel %vm2379_vm7, %v1841_v28, %v557_v24  ;;  %v1844_v47 = vrot.slane %v531_v56, 9  ;;  %v1845_v50 = vrot.slane %v532_v1, 9  ;;  %v2425_v1 = vld [vmem:[%s2254_s9 + $0x14] sm:$0x1]  ;;  %v2432_v28 = vld [vmem:[%s2254_s9 + $0x1c] sm:$0x1] }
  0x28   : > { %v312_v53 = vrot.slane %v311_v30, 4  ;;  %v562_v44 = vsel %vm2379_vm7, %v1842_v39, %v561_v25  ;;  %2044 = vmatmul.mubr.msk.bf16.vlgmr.msra.gmra.mxu0 %vm346_vm3, %v1826_v40  ;;  %v566_v24 = vsel %vm2379_vm7, %v1843_v49, %v565_v48  ;;  %v1846_v57 = vrot.slane %v533_v63, 9  ;;  %v1875_v48 = vld [vmem:[%s2254_s9 + $0x8] sm:$0xf] }
  0x29   : > { %v326_v55 = vrot.slane %v325_v42, 4  ;;  %v1850_v16 = vcombine.low %v558_v45, %v562_v44  ;;  %2062 = vmatpush3.bf16.msra.mxu0 %v2244_v8  ;;  %v1834_v25 = vcombine.low %v2319_v46, %v2322_v51  ;;  %v570_v58 = vsel %vm2379_vm7, %v1844_v47, %v569_v18  ;;  %v2449_v42 = vld [vmem:[%s2254_s9 + $0x24] sm:$0x1]  ;;  %v2458_v47 = vld [vmem:[%s2254_s9 + $0x2c] sm:$0x1] }
  0x2a   : > { %v317_v17 = vsel %vm2311_vm4, %v312_v53, %v316_v21  ;;  %v574_v61 = vsel %vm2379_vm7, %v1845_v50, %v573_v59  ;;  %v1851_v8 = vcombine.low %v566_v24, %v570_v58  ;;  %2138 = vmatprep.subr.msk.bf16.mxu0 %vm359_vm0, %v2232_v5  ;;  %v578_v34 = vsel %vm2379_vm7, %v1846_v57, %v577_v60  ;;  %v1877_v59 = vld [vmem:[%s2254_s9 + $0x10] sm:$0xf]  ;;  %v1879_v21 = vld [vmem:[%s2254_s9 + $0x18] sm:$0xf] }
  0x2b   : > { %v331_v0 = vsel %vm2311_vm4, %v326_v55, %v330_v38  ;;  %2063 = vmatprep.mubr.msk.bf16.mxu0 %vm346_vm3, %v1850_v16  ;;  %v1847_v56 = vrot.slane %v534_v52, 9  ;;  %v1852_v3 = vcombine.low %v574_v61, %v578_v34  ;;  %v581_v18 = vrot.slane %v2352_v33, 5  ;;  %v1881_v38 = vld [vmem:[%s2254_s9 + $0x20] sm:$0xf]  ;;  %v1885_v50 = vld [vmem:[%s2254_s9 + $0x30] sm:$0xf] }
  0x2c   : > { %v1828_v2 = vcombine.low %v317_v17, %v331_v0  ;;  %v1848_v19 = vrot.slane %v535_v54, 9  ;;  %v585_v22 = vrot.slane %v2359_v43, 5  ;;  %v825_v23 = vshrl.u32 %v1875_v48, 16 }
  0x2d   : > { %v828_v5 = vshll.u32 %v1875_v48, 16  ;;  %v834_v35 = vshll.u32 %v2412_v62, 16  ;;  %v2437_v60 = vsel %vm2379_vm7, %v1847_v56, %v581_v18  ;;  %v839_v29 = vshrl.u32 %v1877_v59, 16 }
  0x2e   : > { %2048 = vmatmul.mubr.msk.bf16.vlgmr.msra.gmra.mxu1 %vm346_vm3, %v1828_v2  ;;  %v842_v33 = vshll.u32 %v1877_v59, 16  ;;  %v848_v30 = vshll.u32 %v2425_v1, 16  ;;  %v586_v43 = vsel %vm2379_vm7, %v1848_v19, %v585_v22  ;;  %v827_v39 = vrot.slane %v825_v23, 4  ;;  %v2485_v23 = vld [vmem:[%s2254_s9 + $0x3c] sm:$0x1] }
  0x2f   : > { %2052 = vmatpush3.bf16.msra.mxu1 %v2241_v7  ;;  %2053 = vmatprep.mubr.msk.bf16.mxu1 %vm346_vm3, %v1833_v36  ;;  %v830_v63 = vrot.slane %v828_v5, 5  ;;  %v836_v40 = vrot.slane %v834_v35, 5  ;;  %v1853_v7 = vcombine.low %v2437_v60, %v586_v43  ;;  %v841_v45 = vrot.slane %v839_v29, 4  ;;  %v1889_v29 = vld [vmem:[%s2254_s9 + $0x40] sm:$0xf] }
  0x30   : > { %2137 = vmatprep.subr.msk.bf16.mxu1 %vm359_vm0, %v2227_v4  ;;  %v844_v49 = vrot.slane %v842_v33, 5  ;;  %v850_v14 = vrot.slane %v848_v30, 5  ;;  %2064 = vmatmul.mubr.msk.bf16.vlgmr.msra.gmra.mxu0 %vm346_vm3, %v1851_v8  ;;  %v853_v52 = vshrl.u32 %v1879_v21, 16  ;;  %v856_v53 = vshll.u32 %v1879_v21, 16  ;;  %v1887_v21 = vld [vmem:[%s2254_s9 + $0x38] sm:$0xf] }
  0x31   : > { %v831_v36 = vor.u32 %v830_v63, %v827_v39  ;;  %v862_v44 = vshll.u32 %v2432_v28, 16  ;;  %2082 = vmatpush3.bf16.msra.mxu0 %v2262_v11  ;;  %2067 = vmatprep.mubr.msk.bf16.mxu0 %vm346_vm3, %v1852_v3  ;;  %v867_v54 = vshrl.u32 %v1881_v38, 16  ;;  %v870_v55 = vshll.u32 %v1881_v38, 16  ;;  %v2475_v3 = vld [vmem:[%s2254_s9 + $0x34] sm:$0x1] }
  0x32   : > { %v845_v4 = vor.u32 %v844_v49, %v841_v45  ;;  %v876_v16 = vshll.u32 %v2449_v42, 16  ;;  %v855_v57 = vrot.slane %v853_v52, 4  ;;  %v858_v17 = vrot.slane %v856_v53, 5  ;;  %2140 = vmatprep.subr.msk.bf16.mxu0 %vm359_vm0, %v2249_v9  ;;  %v2500_v43 = vld [vmem:[%s2254_s9 + $0x44] sm:$0x1] }
  0x33   : > { %v832_v24 = vrot.slane %v831_v36, 4  ;;  %v864_v58 = vrot.slane %v862_v44, 5  ;;  %v869_v48 = vrot.slane %v867_v54, 4  ;;  %v872_v0 = vrot.slane %v870_v55, 5  ;;  %v1900_v63 = vld [vmem:[%s2254_s9 + $0x8] sm:$0xe] }
  0x34   : > { %v846_v61 = vrot.slane %v845_v4, 4  ;;  %v878_v11 = vrot.slane %v876_v16, 5  ;;  %v859_v34 = vor.u32 %v858_v17, %v855_v57  ;;  %v881_v56 = vshrl.u32 %v1883_v15, 16  ;;  %v1901_v52 = vld [vmem:[%s2254_s9 + $0x10] sm:$0xe] }
  0x35   : > { %v837_v8 = vsel %vm2311_vm4, %v832_v24, %v836_v40  ;;  %v884_v59 = vshll.u32 %v1883_v15, 16  ;;  %v873_v9 = vor.u32 %v872_v0, %v869_v48  ;;  %v890_v18 = vshll.u32 %v2458_v47, 16  ;;  %v2156_v40 = vld [vmem:[%s2254_s9 + $0x8] ss:$8 sps:$4 sm:$0xff]   ;;  %v1958_v54 = vld [vmem:[%s2768_s1 + $0x1c] sm:$0xf] }
  0x36   : > { %2054 = vmatmul.mubr.msk.bf16.vlgmr.msra.gmra.mxu1 %vm346_vm3, %v1834_v25  ;;  %v851_v2 = vsel %vm2311_vm4, %v846_v61, %v850_v14  ;;  %v895_v19 = vshrl.u32 %v1885_v50, 16  ;;  %v860_v51 = vrot.slane %v859_v34, 4  ;;  %v883_v25 = vrot.slane %v881_v56, 4  ;;  %v1983_v17 = vld [vmem:[%s2768_s1 + $0x20] sm:$0xf] }
  0x37   : > { %2072 = vmatpush3.bf16.msra.mxu1 %v2258_v10  ;;  %2057 = vmatprep.mubr.msk.bf16.mxu1 %vm346_vm3, %v1835_v37  ;;  %v1892_v46 = vcombine.low %v837_v8, %v851_v2  ;;  %v886_v22 = vrot.slane %v884_v59, 5  ;;  %v874_v5 = vrot.slane %v873_v9, 4  ;;  %v892_v35 = vrot.slane %v890_v18, 5  ;;  %v2157_v8 = vld [vmem:[%s2254_s9 + $0x18] ss:$8 sps:$4 sm:$0xff]  }
  0x38   : > { %2139 = vmatprep.subr.msk.bf16.mxu1 %vm359_vm0, %v2238_v6  ;;  %v897_v10 = vrot.slane %v895_v19, 4  ;;  %v898_v60 = vshll.u32 %v1885_v50, 16  ;;  %2068 = vmatmul.mubr.msk.bf16.gmra.mxu0 %vm346_vm3, %v1853_v7  ;;  %v865_v26 = vsel %vm2311_vm4, %v860_v51, %v864_v58  ;;  %v904_v37 = vshll.u32 %v2475_v3, 16  ;;  %v1903_v59 = vld [vmem:[%s2254_s9 + $0x20] sm:$0xe] }
  0x39   : > { %v887_v31 = vor.u32 %v886_v22, %v883_v25  ;;  %v909_v33 = vshrl.u32 %v1887_v21, 16  ;;  %v1836_v30 = vcombine.low %v2342_v27, %v2349_v32  ;;  %2083 = vmatprep.mubr.msk.bf16.mxu0 %vm346_vm3, %v1892_v46  ;;  %v879_v6 = vsel %vm2311_vm4, %v874_v5, %v878_v11  ;;  %v1902_v11 = vld [vmem:[%s2254_s9 + $0x18] sm:$0xe]  ;;  %v2158_v2 = vld [vmem:[%s2254_s9 + $0x28] ss:$8 sps:$4 sm:$0xff]  }
  0x3a   : > { %v900_v38 = vrot.slane %v898_v60, 5  ;;  %v912_v39 = vshll.u32 %v1887_v21, 16  ;;  %v1893_v7 = vcombine.low %v865_v26, %v879_v6  ;;  %v918_v14 = vshll.u32 %v2485_v23, 16  ;;  %v1904_v19 = vld [vmem:[%s2254_s9 + $0x28] sm:$0xe] }
  0x3b   : > { %v888_v45 = vrot.slane %v887_v31, 4  ;;  %v911_v49 = vrot.slane %v909_v33, 4  ;;  %v906_v36 = vrot.slane %v904_v37, 5  ;;  %v923_v32 = vshrl.u32 %v1889_v29, 16  ;;  %v1905_v25 = vld [vmem:[%s2254_s9 + $0x30] sm:$0xe] }
  0x3c   : > { %v901_v15 = vor.u32 %v900_v38, %v897_v10  ;;  %v914_v27 = vrot.slane %v912_v39, 5  ;;  %v926_v44 = vshll.u32 %v1889_v29, 16  ;;  %v932_v50 = vshll.u32 %v2500_v43, 16  ;;  %v1906_v22 = vld [vmem:[%s2254_s9 + $0x38] sm:$0xe] }
  0x3d   : > { %v893_v53 = vsel %vm2311_vm4, %v888_v45, %v892_v35  ;;  %v1908_v4 = vrot.slane %v1900_v63, 9  ;;  %v925_v24 = vrot.slane %v923_v32, 4  ;;  %v1064_v57 = vrot.slane %v2412_v62, 5  ;;  %v1907_v60 = vld [vmem:[%s2254_s9 + $0x40] sm:$0xe] }
  0x3e   : > { %2058 = vmatmul.mubr.msk.bf16.gmra.mxu1 %vm346_vm3, %v1836_v30  ;;  %v902_v55 = vrot.slane %v901_v15, 4  ;;  %v915_v16 = vor.u32 %v914_v27, %v911_v49  ;;  %v920_v58 = vrot.slane %v918_v14, 5  ;;  %v928_v61 = vrot.slane %v926_v44, 5  ;;  %v2160_v29 = vld [vmem:[%s2254_s9 + $0x10] ss:$8 sps:$4 sm:$0xff]  }
  0x3f   : > { %2073 = vmatprep.mubr.msk.bf16.mxu1 %vm346_vm3, %v2156_v40  ;;  %v1909_v48 = vrot.slane %v1901_v52, 9  ;;  %v1068_v0 = vrot.slane %v2425_v1, 5  ;;  %v934_v56 = vrot.slane %v932_v50, 5  ;;  %v2530_v1 = vsel %vm2379_vm7, %v1908_v4, %v1064_v57  ;;  %v1942_v40 = vld [vmem:[%s2254_s9 + $0x10] sm:$0xf] }
  0x40   : > { %v907_v34 = vsel %vm2311_vm4, %v902_v55, %v906_v36  ;;  %v916_v62 = vrot.slane %v915_v16, 4  ;;  %2084 = vmatmul.mubr.msk.bf16.vlgmr.msra.gmra.mxu0 %vm346_vm3, %v1893_v7  ;;  %v929_v18 = vor.u32 %v928_v61, %v925_v24  ;;  %v1910_v46 = vrot.slane %v1902_v11, 9  ;;  %v1943_v7 = vld [vmem:[%s2254_s9 + $0x14] sm:$0x1]  ;;  %v1945_v49 = vld [vmem:[%s2254_s9 + $0x1c] sm:$0x1] }
  0x41   : > { %v1894_v9 = vcombine.low %v893_v53, %v907_v34  ;;  %2102 = vmatpush3.bf16.msra.mxu0 %v2270_v13  ;;  %v2534_v21 = vsel %vm2379_vm7, %v1909_v48, %v1068_v0  ;;  %v2537_v51 = vsel %vm359_vm0, %v1958_v54, 0  ;;  %v1072_v35 = vrot.slane %v2432_v28, 5  ;;  %v1967_v32 = vld [vmem:[%s2254_s9 + $0x10] sm:$0xe]  ;;  %v1968_v50 = vld [vmem:[%s2254_s9 + $0x18] sm:$0xe] }
  0x42   : > { %v921_v5 = vsel %vm2311_vm4, %v916_v62, %v920_v58  ;;  %v930_v13 = vrot.slane %v929_v18, 4  ;;  %v1911_v10 = vrot.slane %v1903_v59, 9  ;;  %2142 = vmatprep.subr.msk.bf16.mxu0 %vm359_vm0, %v1983_v17  ;;  %v1076_v26 = vrot.slane %v2449_v42, 5  ;;  %v2159_v4 = vld [vmem:[%s2254_s9 + $0x38] ss:$8 sps:$4 sm:$0xff]  }
  0x43   : > { %2087 = vmatprep.mubr.msk.bf16.mxu0 %vm346_vm3, %v1894_v9  ;;  %v2550_v31 = vsel %vm359_vm0, %v1983_v17, 0  ;;  %v1912_v37 = vrot.slane %v1904_v19, 9  ;;  %v1080_v33 = vrot.slane %v2458_v47, 5  ;;  %v1913_v28 = vrot.slane %v1905_v25, 9  ;;  %v1946_v57 = vld [vmem:[%s2254_s9 + $0x20] sm:$0xf] }
  0x44   : > { %v935_v30 = vsel %vm2311_vm4, %v930_v13, %v934_v56  ;;  %v1084_v6 = vrot.slane %v2475_v3, 5  ;;  %v1914_v38 = vrot.slane %v1906_v22, 9  ;;  %v1088_v42 = vrot.slane %v2485_v23, 5  ;;  %v1944_v23 = vld [vmem:[%s2254_s9 + $0x18] sm:$0xf] }
  0x45   : > { %v1895_v39 = vcombine.low %v921_v5, %v935_v30  ;;  %v1915_v63 = vrot.slane %v1907_v60, 9  ;;  %v1917_v47 = vcombine.low %v2530_v1, %v2534_v21  ;;  %v2566_v3 = vsel %vm2379_vm7, %v1910_v46, %v1072_v35  ;;  %v1947_v0 = vld [vmem:[%s2254_s9 + $0x24] sm:$0x1]  ;;  %v1948_v62 = vld [vmem:[%s2254_s9 + $0x28] sm:$0xf] }
  0x46   : > { %2074 = vmatmul.mubr.msk.bf16.vlgmr.msra.gmra.mxu1 %vm346_vm3, %v2157_v8  ;;  %v1092_v45 = vrot.slane %v2500_v43, 5  ;;  %v1332_v14 = vshrl.u32 %v1942_v40, 16  ;;  %v1335_v15 = vshll.u32 %v1942_v40, 16  ;;  %v1346_v36 = vshrl.u32 %v1944_v23, 16  ;;  %v2161_v59 = vld [vmem:[%s2254_s9 + $0x20] ss:$8 sps:$4 sm:$0xff]  }
  0x47   : > { %2092 = vmatpush3.bf16.msra.mxu1 %v2266_v12  ;;  %2077 = vmatprep.mubr.msk.bf16.mxu1 %vm346_vm3, %v2158_v2  ;;  %v2574_v12 = vsel %vm2379_vm7, %v1911_v10, %v1076_v26  ;;  %v1349_v27 = vshll.u32 %v1944_v23, 16  ;;  %v2580_v43 = vsel %vm2379_vm7, %v1912_v37, %v1080_v33  ;;  %v1341_v53 = vshll.u32 %v1943_v7, 16  ;;  %v2162_v1 = vld [vmem:[%s2254_s9 + $0x30] ss:$8 sps:$4 sm:$0xff]   ;;  %v1969_v60 = vld [vmem:[%s2254_s9 + $0x20] sm:$0xe] }
  0x48   : > { %2141 = vmatprep.subr.msk.bf16.mxu1 %vm359_vm0, %v1958_v54  ;;  %2088 = vmatmul.mubr.msk.bf16.gmra.mxu0 %vm346_vm3, %v1895_v39  ;;  %v1334_v52 = vrot.slane %v1332_v14, 4  ;;  %v1355_v44 = vshll.u32 %v1945_v49, 16  ;;  %v2587_v54 = vsel %vm2379_vm7, %v1913_v28, %v1084_v6  ;;  %v2591_v55 = vsel %vm2379_vm7, %v1914_v38, %v1088_v42  ;;  %v1949_v30 = vld [vmem:[%s2254_s9 + $0x2c] sm:$0x1]  ;;  %v1950_v6 = vld [vmem:[%s2254_s9 + $0x30] sm:$0xf] }
  0x49   : > { %2103 = vmatprep.mubr.msk.bf16.mxu0 %vm346_vm3, %v2160_v29  ;;  %v1337_v16 = vrot.slane %v1335_v15, 5  ;;  %v1348_v24 = vrot.slane %v1346_v36, 4  ;;  %v2596_v17 = vsel %vm2379_vm7, %v1915_v63, %v1092_v45  ;;  %v1351_v58 = vrot.slane %v1349_v27, 5  ;;  %v1970_v29 = vld [vmem:[%s2254_s9 + $0x28] sm:$0xe] }
  0x4a   : > { %v1975_v61 = vrot.slane %v1967_v32, 9  ;;  %v1571_v48 = vrot.slane %v1943_v7, 5  ;;  %v1976_v8 = vrot.slane %v1968_v50, 9  ;;  %v1575_v34 = vrot.slane %v1945_v49, 5  ;;  %v1952_v40 = vld [vmem:[%s2254_s9 + $0x38] sm:$0xf] }
  0x4b   : > { %v1338_v11 = vor.u32 %v1337_v16, %v1334_v52  ;;  %v1360_v56 = vshrl.u32 %v1946_v57, 16  ;;  %v1343_v2 = vrot.slane %v1341_v53, 5  ;;  %v1352_v9 = vor.u32 %v1351_v58, %v1348_v24  ;;  %v2163_v23 = vld [vmem:[%s2254_s9 + $0x40] ss:$8 sps:$4 sm:$0xff]   ;;  %v1951_v15 = vld [vmem:[%s2254_s9 + $0x34] sm:$0x1] }
  0x4c   : > { %v1357_v18 = vrot.slane %v1355_v44, 5  ;;  %v1363_v19 = vshll.u32 %v1946_v57, 16  ;;  %v1369_v25 = vshll.u32 %v1947_v0, 16  ;;  %v1374_v22 = vshrl.u32 %v1948_v62, 16  ;;  %v1971_v53 = vld [vmem:[%s2254_s9 + $0x30] sm:$0xe] }
  0x4d   : > { %v1339_v21 = vrot.slane %v1338_v11, 4  ;;  %v1362_v46 = vrot.slane %v1360_v56, 4  ;;  %v1918_v5 = vcombine.low %v2566_v3, %v2574_v12  ;;  %v1919_v13 = vcombine.low %v2580_v43, %v2587_v54  ;;  %v1953_v43 = vld [vmem:[%s2254_s9 + $0x3c] sm:$0x1]  ;;  %v1972_v16 = vld [vmem:[%s2254_s9 + $0x38] sm:$0xe] }
  0x4e   : > { %2078 = vmatmul.mubr.msk.bf16.gmra.mxu1 %vm346_vm3, %v2159_v4  ;;  %v1353_v35 = vrot.slane %v1352_v9, 4  ;;  %v1365_v10 = vrot.slane %v1363_v19, 5  ;;  %v1920_v26 = vcombine.low %v2591_v55, %v2596_v17  ;;  %v1572_v37 = vsel %vm2379_vm7, %v1975_v61, %v1571_v48  ;;  %v1956_v9 = vld [vmem:[%s2254_s9 + $0x48] sm:$0xf] }
  0x4f   : > { %2093 = vmatprep.mubr.msk.bf16.mxu1 %vm346_vm3, %v1917_v47  ;;  %v1576_v33 = vsel %vm2379_vm7, %v1976_v8, %v1575_v34  ;;  %v1377_v28 = vshll.u32 %v1948_v62, 16  ;;  %v1344_v38 = vsel %vm2311_vm4, %v1339_v21, %v1343_v2  ;;  %v1376_v63 = vrot.slane %v1374_v22, 4  ;;  %v1954_v34 = vld [vmem:[%s2254_s9 + $0x40] sm:$0xf] }
  0x50   : > { %2104 = vmatmul.mubr.msk.bf16.vlgmr.msra.gmra.mxu0 %vm346_vm3, %v2161_v59  ;;  %v1358_v39 = vsel %vm2311_vm4, %v1353_v35, %v1357_v18  ;;  %v1366_v42 = vor.u32 %v1365_v10, %v1362_v46  ;;  %v1977_v47 = vrot.slane %v1969_v60, 9  ;;  %v1579_v3 = vrot.slane %v1947_v0, 5  ;;  %v1957_v60 = vld [vmem:[%s2254_s9 + $0x4c] sm:$0x1] }
  0x51   : > { %2122 = vmatpush3.bf16.msra.mxu0 %v2550_v31  ;;  %2107 = vmatprep.mubr.msk.bf16.mxu0 %vm346_vm3, %v2162_v1  ;;  %v1379_v7 = vrot.slane %v1377_v28, 5  ;;  %v1978_v45 = vrot.slane %v1970_v29, 9  ;;  %v2627_v49 = vrot.slane %v1369_v25, 5  ;;  %v1383_v14 = vshll.u32 %v1949_v30, 16  ;;  %v1955_v25 = vld [vmem:[%s2254_s9 + $0x44] sm:$0x1] }
  0x52   : > { %v1583_v12 = vrot.slane %v1949_v30, 5  ;;  %v1388_v36 = vshrl.u32 %v1950_v6, 16  ;;  %v1959_v27 = vcombine.low %v1344_v38, %v1358_v39  ;;  %v1984_v32 = vcombine.low %v1572_v37, %v1576_v33  ;;  %v1973_v37 = vld [vmem:[%s2254_s9 + $0x40] sm:$0xe]  ;;  %v1974_v38 = vld [vmem:[%s2254_s9 + $0x48] sm:$0xe] }
  0x53   : > { %v1391_v52 = vshll.u32 %v1950_v6, 16  ;;  %v1402_v31 = vshrl.u32 %v1952_v40, 16  ;;  %v2632_v44 = vrot.slane %v1366_v42, 4  ;;  %v1380_v50 = vor.u32 %v1379_v7, %v1376_v63 }
  0x54   : > { %v1390_v4 = vrot.slane %v1388_v36, 4  ;;  %v1405_v54 = vshll.u32 %v1952_v40, 16  ;;  %v1580_v24 = vsel %vm2379_vm7, %v1977_v47, %v1579_v3  ;;  %v1584_v57 = vsel %vm2379_vm7, %v1978_v45, %v1583_v12 }
  0x55   : > { %v1393_v58 = vrot.slane %v1391_v52, 5  ;;  %v1397_v61 = vshll.u32 %v1951_v15, 16  ;;  %v1404_v48 = vrot.slane %v1402_v31, 4  ;;  %v1411_v11 = vshll.u32 %v1953_v43, 16 }
  0x56   : > { %2094 = vmatmul.mubr.msk.bf16.vlgmr.msra.gmra.mxu1 %vm346_vm3, %v1918_v5  ;;  %v1407_v0 = vrot.slane %v1405_v54, 5  ;;  %v1979_v8 = vrot.slane %v1971_v53, 9  ;;  %v1385_v62 = vrot.slane %v1383_v14, 5  ;;  %v1587_v59 = vrot.slane %v1951_v15, 5 }
  0x57   : > { %2112 = vmatpush3.bf16.msra.mxu1 %v2537_v51  ;;  %2097 = vmatprep.mubr.msk.bf16.mxu1 %vm346_vm3, %v1919_v13  ;;  %v1394_v56 = vor.u32 %v1393_v58, %v1390_v4  ;;  %v1980_v2 = vrot.slane %v1972_v16, 9  ;;  %v1372_v51 = vsel %vm2311_vm4, %v2632_v44, %v2627_v49  ;;  %v1381_v18 = vrot.slane %v1380_v50, 4 }
  0x58   : > { %2108 = vmatmul.mubr.msk.bf16.gmra.mxu0 %vm346_vm3, %v2163_v23  ;;  %v1408_v19 = vor.u32 %v1407_v0, %v1404_v48  ;;  %v1591_v1 = vrot.slane %v1953_v43, 5  ;;  %v1985_v21 = vcombine.low %v1580_v24, %v1584_v57  ;;  %v1399_v46 = vrot.slane %v1397_v61, 5 }
  0x59   : > { %2123 = vmatprep.mubr.msk.bf16.mxu0 %vm346_vm3, %v1984_v32  ;;  %v1416_v22 = vshrl.u32 %v1954_v34, 16  ;;  %v1419_v5 = vshll.u32 %v1954_v34, 16  ;;  %v1413_v13 = vrot.slane %v1411_v11, 5  ;;  %v1588_v35 = vsel %vm2379_vm7, %v1979_v8, %v1587_v59 }
  0x5a   : > { %v1592_v10 = vsel %vm2379_vm7, %v1980_v2, %v1591_v1  ;;  %v1430_v29 = vshrl.u32 %v1956_v9, 16  ;;  %v1395_v33 = vrot.slane %v1394_v56, 4  ;;  %v1409_v30 = vrot.slane %v1408_v19, 4 }
  0x5b   : > { %v1418_v28 = vrot.slane %v1416_v22, 4  ;;  %v1421_v6 = vrot.slane %v1419_v5, 5  ;;  %v1386_v39 = vsel %vm2311_vm4, %v1381_v18, %v1385_v62  ;;  %v1425_v42 = vshll.u32 %v1955_v25, 16 }
  0x5c   : > { %v1432_v63 = vrot.slane %v1430_v29, 4  ;;  %v1433_v40 = vshll.u32 %v1956_v9, 16  ;;  %v1986_v7 = vcombine.low %v1588_v35, %v1592_v10  ;;  %v1439_v3 = vshll.u32 %v1957_v60, 16 }
  0x5d   : > { %v1422_v47 = vor.u32 %v1421_v6, %v1418_v28  ;;  %v1981_v45 = vrot.slane %v1973_v37, 9  ;;  %v1595_v49 = vrot.slane %v1955_v25, 5  ;;  %v1982_v14 = vrot.slane %v1974_v38, 9 }
  0x5e   : > { %2098 = vmatmul.mubr.msk.bf16.gmra.mxu1 %vm346_vm3, %v1920_v26  ;;  %v1435_v23 = vrot.slane %v1433_v40, 5  ;;  %v1599_v12 = vrot.slane %v1957_v60, 5  ;;  %v1400_v15 = vsel %vm2311_vm4, %v1395_v33, %v1399_v46  ;;  %v1414_v36 = vsel %vm2311_vm4, %v1409_v30, %v1413_v13 }
  0x5f   : > { %2113 = vmatprep.mubr.msk.bf16.mxu1 %vm346_vm3, %v1959_v27  ;;  %v1960_v17 = vcombine.low %v1372_v51, %v1386_v39  ;;  %v1427_v26 = vrot.slane %v1425_v42, 5  ;;  %v1596_v27 = vsel %vm2379_vm7, %v1981_v45, %v1595_v49  ;;  %v1961_v43 = vcombine.low %v1400_v15, %v1414_v36 }
  0x60   : > { %2124 = vmatmul.mubr.msk.bf16.vlgmr.msra.gmra.mxu0 %vm346_vm3, %v1985_v21  ;;  %v1436_v55 = vor.u32 %v1435_v23, %v1432_v63  ;;  %v1600_v32 = vsel %vm2379_vm7, %v1982_v14, %v1599_v12  ;;  %v1423_v52 = vrot.slane %v1422_v47, 4  ;;  %v1441_v53 = vrot.slane %v1439_v3, 5 }
  0x61   : > { %2127 = vmatprep.mubr.msk.bf16.mxu0 %vm346_vm3, %v1986_v7  ;;  %v1987_v44 = vcombine.low %v1596_v27, %v1600_v32  ;;  %vm1752_vm8 = vcmask 257024  }
  0x62   : > { %v1437_v31 = vrot.slane %v1436_v55, 4  ;;  %v1428_v50 = vsel %vm2311_vm4, %v1423_v52, %v1427_v26 }
  0x64   : > { %v1442_v4 = vsel %vm2311_vm4, %v1437_v31, %v1441_v53 }
  0x65   : > { %v1962_v54 = vcombine.low %v1428_v50, %v1442_v4 }
  0x66   : > { %2114 = vmatmul.mubr.msk.bf16.vlgmr.msra.gmra.mxu1 %vm346_vm3, %v1960_v17 }
  0x67   : > { %2117 = vmatprep.mubr.msk.bf16.mxu1 %vm346_vm3, %v1961_v43 }
  0x68   : > { %2128 = vmatmul.mubr.msk.bf16.gmra.mxu0 %vm346_vm3, %v1987_v44 }
  0x6e   : > { %2118 = vmatmul.mubr.msk.bf16.gmra.mxu1 %vm346_vm3, %v1962_v54 }
  0xe8   : > { %v2045_v20 = vpop.f32.mrf.mxu0 }
  0xea   : > { %v397_v16 = vpop.f32.mrf.mxu0 }
  0xec   : > { %v2046_v24 = vpop.f32.mrf.mxu0 }
  0xee   : > { %v2049_v57 = vpop.f32.mrf.mxu1  ;;  %v400_v58 = vpop.f32.mrf.mxu0 }
  0xf0   : > { %v413_v61 = vpop.f32.mrf.mxu1  ;;  %v2065_v48 = vpop.f32.mrf.mxu0 }
  0xf2   : > { %v2050_v0 = vpop.f32.mrf.mxu1  ;;  %v650_v11 = vpop.f32.mrf.mxu0 }
  0xf4   : > { %v2683_v8 = vpop.f32.mrf.mxu1  ;;  %v2066_v34 = vpop.f32.mrf.mxu0 }
  0xf6   : > { %v2055_v62 = vpop.f32.mrf.mxu1  ;;  %v653_v41 = vpop.f32.mrf.mxu0 }
  0xf7   : > { %v506_v47 = vadd.f32 %v2055_v62, %v2045_v20 }
  0xf8   : > { %v497_v56 = vpop.f32.mrf.mxu1  ;;  %v2069_v59 = vpop.f32.mrf.mxu0 }
  0xf9   : > { %v498_v23 = vadd.f32 %v497_v56, %v397_v16  ;;  %v683_v12 = vadd.f32 %v2065_v48, %v506_v47 }
  0xfa   : > { %v2056_v2 = vpop.f32.mrf.mxu1  ;;  %v666_v9 = vpop.f32.mrf.mxu0 }
  0xfb   : > { %v509_v15 = vadd.f32 %v2056_v2, %v2046_v24  ;;  %v681_v17 = vadd.f32 %v650_v11, %v498_v23 }
  0xfc   : > { %v500_v51 = vpop.f32.mrf.mxu1  ;;  %v2685_v18 = vpop.f32.mrf.mxu0 }
  0xfd   : > { %v501_v32 = vadd.f32 %v500_v51, %v400_v58  ;;  %v684_v52 = vadd.f32 %v2066_v34, %v509_v15  ;;  %v2718_v15 = vstv %s1718_s14 }
  0xfe   : > { %v2059_v19 = vpop.f32.mrf.mxu1  ;;  %v2687_v1 = vpop.f32.mrf.mxu0 }
  0xff   : > { %v522_v44 = vadd.f32 %v2059_v19, %v2049_v57  ;;  %v682_v24 = vadd.f32 %v653_v41, %v501_v32 }
 0x100   : > { %v513_v21 = vpop.f32.mrf.mxu1  ;;  %v2085_v46 = vpop.f32.mrf.mxu0 }
 0x101   : > { %v514_v50 = vadd.f32 %v513_v21, %v413_v61 }
 0x102   : > { %v2060_v25 = vpop.f32.mrf.mxu1  ;;  %v999_v22 = vpop.f32.mrf.mxu0 }
 0x103   : > { %v525_v48 = vadd.f32 %v2060_v25, %v2050_v0  ;;  %v685_v58 = vadd.f32 %v666_v9, %v514_v50 }
 0x104   : > { %v516_v5 = vpop.f32.mrf.mxu1  ;;  %v2086_v13 = vpop.f32.mrf.mxu0 }
 0x105   : > { %v517_v34 = vadd.f32 %v516_v5, %v2683_v8  ;;  %v688_v21 = vadd.f32 %v2685_v18, %v525_v48 }
 0x106   : > { %v2075_v35 = vpop.f32.mrf.mxu1  ;;  %v1002_v10 = vpop.f32.mrf.mxu0 }
 0x107   : > { %v802_v26 = vadd.f32 %v2075_v35, %v683_v12  ;;  %v687_v35 = vadd.f32 %v2069_v59, %v522_v44  ;;  %v686_v47 = vadd.f32 %v2687_v1, %v517_v34 }
 0x108   : > { %v769_v60 = vpop.f32.mrf.mxu1  ;;  %v2689_v29 = vpop.f32.mrf.mxu0 }
 0x109   : > { %v800_v31 = vadd.f32 %v769_v60, %v681_v17  ;;  %v1032_v54 = vadd.f32 %v2085_v46, %v802_v26 }
 0x10a   : > { %v2076_v37 = vpop.f32.mrf.mxu1  ;;  %v2691_v33 = vpop.f32.mrf.mxu0 }
 0x10b   : > { %v803_v20 = vadd.f32 %v2076_v37, %v684_v52  ;;  %v1030_v11 = vadd.f32 %v999_v22, %v800_v31 }
 0x10c   : > { %v772_v30 = vpop.f32.mrf.mxu1  ;;  %v2693_v28 = vpop.f32.mrf.mxu0 }
 0x10d   : > { %v801_v51 = vadd.f32 %v772_v30, %v682_v24  ;;  %v1033_v57 = vadd.f32 %v2086_v13, %v803_v20 }
 0x10e   : > { %v2079_v6 = vpop.f32.mrf.mxu1  ;;  %v2695_v38 = vpop.f32.mrf.mxu0 }
 0x10f   : > { %v806_v46 = vadd.f32 %v2079_v6, %v687_v35  ;;  %v1031_v59 = vadd.f32 %v1002_v10, %v801_v51  ;;  %v2715_v6 = vld [vmem:[%s2769_s2] ss:$0 sm:$0xff] }
 0x110   : > { %v785_v39 = vpop.f32.mrf.mxu1  ;;  %v2105_v42 = vpop.f32.mrf.mxu0 }
 0x111   : > { %v804_v37 = vadd.f32 %v785_v39, %v685_v58  ;;  %v1036_v13 = vadd.f32 %v2689_v29, %v806_v46 }
 0x112   : > { %v2080_v63 = vpop.f32.mrf.mxu1  ;;  %v1276_v40 = vpop.f32.mrf.mxu0 }
 0x113   : > { %v807_v9 = vadd.f32 %v2080_v63, %v688_v21  ;;  %v1034_v23 = vadd.f32 %v2691_v33, %v804_v37 }
 0x114   : > { %v788_v7 = vpop.f32.mrf.mxu1  ;;  %v2106_v3 = vpop.f32.mrf.mxu0 }
 0x115   : > { %v1037_v63 = vadd.f32 %v2693_v28, %v807_v9 }
 0x116   : > { %v2095_v45 = vpop.f32.mrf.mxu1  ;;  %v2697_v49 = vpop.f32.mrf.mxu0 }
 0x117   : > { %v1190_v56 = vadd.f32 %v2095_v45, %v1032_v54 }
 0x118   : > { %v1157_v14 = vpop.f32.mrf.mxu1  ;;  %v2699_v36 = vpop.f32.mrf.mxu0 }
 0x119   : > { %v1188_v61 = vadd.f32 %v1157_v14, %v1030_v11  ;;  %v1309_v0 = vadd.f32 %v2105_v42, %v1190_v56  ;;  %v805_v14 = vadd.f32 %v788_v7, %v686_v47 }
 0x11a   : > { %v2096_v55 = vpop.f32.mrf.mxu1  ;;  %v2701_v27 = vpop.f32.mrf.mxu0 }
 0x11b   : > { %v1191_v25 = vadd.f32 %v2096_v55, %v1033_v57  ;;  %v1307_v8 = vadd.f32 %v1276_v40, %v1188_v61  ;;  %v1035_v26 = vadd.f32 %v2695_v38, %v805_v14 }
 0x11c   : > { %v1160_v43 = vpop.f32.mrf.mxu1  ;;  %v2703_v53 = vpop.f32.mrf.mxu0 }
 0x11d   : > { %v1189_v18 = vadd.f32 %v1160_v43, %v1031_v59  ;;  %v1310_v1 = vadd.f32 %v2106_v3, %v1191_v25 }
 0x11e   : > { %v2099_v4 = vpop.f32.mrf.mxu1  ;;  %v2705_v16 = vpop.f32.mrf.mxu0 }
 0x11f   : > { %v1194_v40 = vadd.f32 %v2099_v4, %v1036_v13  ;;  %v1308_v32 = vadd.f32 %v2697_v49, %v1189_v18 }
 0x120   : > { %v1173_v62 = vpop.f32.mrf.mxu1  ;;  %v2125_v2 = vpop.f32.mrf.mxu0 }
 0x121   : > { %v1192_v12 = vadd.f32 %v1173_v62, %v1034_v23  ;;  %v1313_v44 = vadd.f32 %v2699_v36, %v1194_v40 }
 0x122   : > { %v2100_v60 = vpop.f32.mrf.mxu1  ;;  %v1664_v19 = vpop.f32.mrf.mxu0 }
 0x123   : > { %v1195_v43 = vadd.f32 %v2100_v60, %v1037_v63  ;;  %v1311_v50 = vadd.f32 %v2701_v27, %v1192_v12 }
 0x124   : > { %v1176_v41 = vpop.f32.mrf.mxu1  ;;  %v2126_v22 = vpop.f32.mrf.mxu0 }
 0x125   : > { %v1193_v4 = vadd.f32 %v1176_v41, %v1035_v26  ;;  %v1314_v36 = vadd.f32 %v2703_v53, %v1195_v43 }
 0x126   : > { %v2115_v45 = vpop.f32.mrf.mxu1  ;;  %v1667_v30 = vpop.f32.mrf.mxu0 }
 0x127   : > { %v1539_v5 = vadd.f32 %v2115_v45, %v1309_v0  ;;  %v1312_v53 = vadd.f32 %v2705_v16, %v1193_v4 }
 0x128   : > { %v1506_v39 = vpop.f32.mrf.mxu1  ;;  %v2129_v17 = vpop.f32.mrf.mxu0 }
 0x129   : > { %v1697_v10 = vadd.f32 %v2125_v2, %v1539_v5  ;;  %v1537_v42 = vadd.f32 %v1506_v39, %v1307_v8 }
 0x12a   : > { %v2116_v29 = vpop.f32.mrf.mxu1  ;;  %v1680_v48 = vpop.f32.mrf.mxu0 }
 0x12b   : > { %v1712_v33 = vadd.f32 %v2715_v6, %v1697_v10  ;;  %v1695_v7 = vadd.f32 %v1664_v19, %v1537_v42  ;;  %v1540_v55 = vadd.f32 %v2116_v29, %v1310_v1 }
 0x12c   : > { %v1509_v3 = vpop.f32.mrf.mxu1  ;;  %v2130_v46 = vpop.f32.mrf.mxu0 }
 0x12d   : > { %vm1721_vm9 = vcmp.ge.f32.partialorder %v1712_v33, 0.0  ;;  %v1730_v28 = vmul.f32 %v2718_v15, %v1712_v33  ;;  %v1710_v52 = vadd.f32 %v2715_v6, %v1695_v7  ;;  %v1698_v31 = vadd.f32 %v2126_v22, %v1540_v55 }
 0x12e   : > { %v1538_v54 = vadd.f32 %v1509_v3, %v1308_v32  ;;  %v2119_v20 = vpop.f32.mrf.mxu1 }
 0x12f   : > { %v1738_v38 = vsel %vm1721_vm9, %v1712_v33, %v1730_v28  ;;  %vm1719_vm10 = vcmp.ge.f32.partialorder %v1710_v52, 0.0  ;;  %v1728_v49 = vmul.f32 %v2718_v15, %v1710_v52  ;;  %v1713_v24 = vadd.f32 %v2715_v6, %v1698_v31 }
 0x130   : > { %v1746_v62 = vpack.c.bf16 %v1738_v38, %v1738_v38  ;;  %v1696_v27 = vadd.f32 %v1667_v30, %v1538_v54  ;;  %v1543_v11 = vadd.f32 %v2119_v20, %v1313_v44  ;;  %v1522_v56 = vpop.f32.mrf.mxu1  ;;  %v1683_v30 = vpop.f32.mrf.mxu0 }
 0x131   : > { %v1736_v2 = vsel %vm1719_vm10, %v1710_v52, %v1728_v49  ;;  %vm1722_vm11 = vcmp.ge.f32.partialorder %v1713_v24, 0.0  ;;  %v1731_v35 = vmul.f32 %v2718_v15, %v1713_v24  ;;  %v1541_v58 = vadd.f32 %v1522_v56, %v1311_v50 }
 0x132   : > { %1755 = vst.msk [vmem:[%s2731_s21 + $0x8] sm:$0xf] %vm1752_vm8, %v1746_v62  ;;  %v1744_v34 = vpack.c.bf16 %v1736_v2, %v1736_v2  ;;  %v1711_v51 = vadd.f32 %v2715_v6, %v1696_v27  ;;  %v1701_v60 = vadd.f32 %v2129_v17, %v1543_v11  ;;  %v2120_v57 = vpop.f32.mrf.mxu1 }
 0x133   : > { %v1739_v61 = vsel %vm1722_vm11, %v1713_v24, %v1731_v35  ;;  %v1699_v19 = vadd.f32 %v1680_v48, %v1541_v58  ;;  %v1544_v21 = vadd.f32 %v2120_v57, %v1314_v36 }
 0x134   : > { %1753 = vst.msk [vmem:[%s2731_s21] sm:$0xf] %vm1752_vm8, %v1744_v34  ;;  %v1747_v37 = vpack.c.bf16 %v1739_v61, %v1739_v61  ;;  %vm1720_vm12 = vcmp.ge.f32.partialorder %v1711_v51, 0.0  ;;  %v1729_v41 = vmul.f32 %v2718_v15, %v1711_v51  ;;  %v1716_v0 = vadd.f32 %v2715_v6, %v1701_v60  ;;  %v1525_v25 = vpop.f32.mrf.mxu1 }
 0x135   : > { %v1714_v22 = vadd.f32 %v2715_v6, %v1699_v19  ;;  %v1702_v47 = vadd.f32 %v2130_v46, %v1544_v21  ;;  %v1542_v59 = vadd.f32 %v1525_v25, %v1312_v53 }
 0x136   : > { %1756 = vst.msk [vmem:[%s2731_s21 + $0xc] sm:$0xf] %vm1752_vm8, %v1747_v37  ;;  %v1737_v16 = vsel %vm1720_vm12, %v1711_v51, %v1729_v41  ;;  %vm1725_vm13 = vcmp.ge.f32.partialorder %v1716_v0, 0.0  ;;  %v1734_v9 = vmul.f32 %v2718_v15, %v1716_v0 }
 0x137   : > { %v1745_v45 = vpack.c.bf16 %v1737_v16, %v1737_v16  ;;  %vm1723_vm14 = vcmp.ge.f32.partialorder %v1714_v22, 0.0  ;;  %v1732_v8 = vmul.f32 %v2718_v15, %v1714_v22  ;;  %v1717_v5 = vadd.f32 %v2715_v6, %v1702_v47 }
 0x138   : > { %v1742_v13 = vsel %vm1725_vm13, %v1716_v0, %v1734_v9  ;;  %v1700_v23 = vadd.f32 %v1683_v30, %v1542_v59 }
 0x139   : > { %1754 = vst.msk [vmem:[%s2731_s21 + $0x4] sm:$0xf] %vm1752_vm8, %v1745_v45  ;;  %v1750_v14 = vpack.c.bf16 %v1742_v13, %v1742_v13  ;;  %v1740_v18 = vsel %vm1723_vm14, %v1714_v22, %v1732_v8  ;;  %vm1726_vm15 = vcmp.ge.f32.partialorder %v1717_v5, 0.0  ;;  %v1735_v39 = vmul.f32 %v2718_v15, %v1717_v5 }
 0x13a   : > { %v1748_v1 = vpack.c.bf16 %v1740_v18, %v1740_v18  ;;  %v1715_v10 = vadd.f32 %v2715_v6, %v1700_v23 }
 0x13b   : > { %1759 = vst.msk [vmem:[%s2731_s21 + $0x18] sm:$0xf] %vm1752_vm8, %v1750_v14  ;;  %v1743_v42 = vsel %vm1726_vm15, %v1717_v5, %v1735_v39 }
 0x13c   : > { %1757 = vst.msk [vmem:[%s2731_s21 + $0x10] sm:$0xf] %vm1752_vm8, %v1748_v1  ;;  %v1751_v63 = vpack.c.bf16 %v1743_v42, %v1743_v42  ;;  %vm1724_vm0 = vcmp.ge.f32.partialorder %v1715_v10, 0.0  ;;  %v1733_v40 = vmul.f32 %v2718_v15, %v1715_v10 }
 0x13e   : > { %1760 = vst.msk [vmem:[%s2731_s21 + $0x1c] sm:$0xf] %vm1752_vm8, %v1751_v63  ;;  %v1741_v12 = vsel %vm1724_vm0, %v1715_v10, %v1733_v40 }
 0x13f   : > { %v1749_v29 = vpack.c.bf16 %v1741_v12, %v1741_v12 }
 0x141   : > { %1758 = vst.msk [vmem:[%s2731_s21 + $0x14] sm:$0xf] %vm1752_vm8, %v1749_v29 }
 0x142 PF: > { %s15_s17 = sadd.s32 1, %s2170_s17  }
 0x143   : > { %p12_p4 = scmp.ge.s32.totalorder %s15_s17, 4  }
 0x145   :  { %14 = sbr.rel (!%p12_p4) target bundleno = 2 (0x2), region = 76 }

// kernel: feedback_block_forward.10
= control target key start
LH: loop header
LB: loop body
LE: loop exit
PB: predicated region body
PF: predicated region fallthrough
CT: control target
= control target key end

     0   :  { %s2386_s17 = smov 0   ;;  %s2927_s0 = inlined_call_operand.vmem [shape: bf16[2,10,10,32], index: 0, kind: input, shape index: {}]   ;;  %s2928_s1 = inlined_call_operand.vmem [shape: bf16[3,3,32,8], index: 1, kind: input, shape index: {}]   ;;  %s2929_s2 = inlined_call_operand.vmem [shape: f32[1,8], index: 2, kind: input, shape index: {}]   ;;  %s2930_s3 = inlined_call_operand.<no memory space> [shape: f32[1,1], index: 3, kind: input, shape index: {}]   ;;  %s2931_s4 = inlined_call_operand.vmem [shape: bf16[2,8,8,8], index: 4, kind: output, shape index: {}]  }
   0x1   :  { %9 = sst [smem:[#allocation2]] %s2930_s3 }
   0x2 LB: > { %s1923_s18 = sadd.s32 4294967295, %s2356_s17   ;;  %p1927_p0 = scmp.ge.s32.totalorder %s2356_s17, 1  ;;  %s2356_s17 = sphi %s2386_s17, %s15_s17  }
   0x3   : > { %p163_p1 = scmp.lt.s32.totalorder %s2356_s17, 3 }
   0x5   : > { %p164_p2 = pnand %p1927_p0, %p163_p1 }
   0x6   : > { %p189_p3 = scmp.lt.s32.totalorder (!%p164_p2), %s1923_s18, 1 }
   0x7   : > { %167 = sbr.rel (%p164_p2) target bundleno = 319 (0x13f), region = 36 }
   0xc   : > { %v2320_v0 = vld [vmem:[%s2928_s1 + $0x18] sm:$0xff]   ;;  %v2321_v1 = vld [vmem:[%s2928_s1 + $0x10] sm:$0xff]   ;;  %s2937_s18 = smov (!%p189_p3, %s1923_s18), 1  ;;  %v2405_v2 = vld [vmem:[%s2928_s1 + $0x8] sm:$0xff]   ;;  %vm220_vm0 = vsmask.f32 3328 }
   0xd   : > { %2307 = vmatprep.subr.bf16.mxu1 %v2320_v0  ;;  %2199 = vmatprep.subr.bf16.mxu0 %v2320_v0  ;;  %s2311_s24 = smul.u32 80, %s2937_s18  ;;  %v2411_v3 = vld [vmem:[%s2928_s1 + $0x28] sm:$0xff]   ;;  %vm221_vm1 = vsmask.f32 7440  ;;  %vm364_vm2 = vcmask 261120   ;;  %vm575_vm4 = vcmask 1042432  }
   0xe   : > { %2309 = vmatpush3.bf16.msra.mxu1 %v2320_v0  ;;  %2200 = vmatpush3.bf16.msra.mxu0 %v2320_v0  ;;  %vm2457_vm3 = vmor %vm220_vm0, %vm221_vm1  ;;  %vm576_vm5 = vcmask 1046532   ;;  %vm1859_vm7 = vcmask 60416   ;;  %s2144_s10 = sshll.u32 %s2937_s18, 5 }
   0xf   : > { %2308 = vmatprep.subr.bf16.mxu1 %v2321_v1  ;;  %2201 = vmatprep.subr.bf16.mxu0 %v2321_v1  ;;  %s2416_s29 = scalar_lea.vmem %s2927_s0, %s2311_s24  ;;  %vm2521_vm6 = vmor %vm575_vm4, %vm576_vm5  ;;  %s2890_s13 = scalar_lea.vmem %s2931_s4, %s2144_s10 }
  0x10   : > { %v2419_v4 = vld [vmem:[%s2416_s29] sm:$0xf]  ;;  %v2422_v5 = vld [vmem:[%s2416_s29 + $0x8] sm:$0xf]  ;;  %v2425_v6 = vld [vmem:[%s2416_s29 + $0x4] sm:$0x1] }
  0x11   : > { %v2428_v7 = vld [vmem:[%s2416_s29 + $0xc] sm:$0x1]  ;;  %v224_v8 = vshrl.u32 %v2419_v4, 16  ;;  %v227_v9 = vshll.u32 %v2419_v4, 16  ;;  %v233_v10 = vshll.u32 %v2425_v6, 16  ;;  %v238_v11 = vshrl.u32 %v2422_v5, 16 }
  0x12   : > { %2310 = vmatpush3.bf16.msra.mxu1 %v2321_v1  ;;  %2202 = vmatpush3.bf16.msra.mxu0 %v2321_v1  ;;  %v241_v12 = vshll.u32 %v2422_v5, 16  ;;  %v247_v13 = vshll.u32 %v2428_v7, 16  ;;  %v580_v14 = vrot.slane %v2425_v6, 5  ;;  %v584_v15 = vrot.slane %v2428_v7, 5  ;;  %v2441_v16 = vld [vmem:[%s2416_s29 + $0x20] sm:$0xf] }
  0x13   : > { %2211 = vmatprep.subr.bf16.mxu1 %v2405_v2  ;;  %2223 = vmatprep.subr.bf16.mxu0 %v2411_v3  ;;  %v226_v17 = vrot.slane %v224_v8, 4  ;;  %v229_v18 = vrot.slane %v227_v9, 5  ;;  %v235_v19 = vrot.slane %v233_v10, 5  ;;  %v240_v20 = vrot.slane %v238_v11, 4  ;;  %v2444_v21 = vld [vmem:[%s2416_s29 + $0x28] sm:$0xf] }
  0x14   : > { %v243_v22 = vrot.slane %v241_v12, 5  ;;  %v249_v23 = vrot.slane %v247_v13, 5  ;;  %v2447_v24 = vld [vmem:[%s2416_s29 + $0x24] sm:$0x1]  ;;  %v2450_v25 = vld [vmem:[%s2416_s29 + $0x2c] sm:$0x1] }
  0x15   : > { %v230_v26 = vor.u32 %v229_v18, %v226_v17  ;;  %v280_v27 = vshrl.u32 %v2441_v16, 16  ;;  %v283_v28 = vshll.u32 %v2441_v16, 16  ;;  %v289_v29 = vshll.u32 %v2447_v24, 16  ;;  %v2465_v35 = vld [vmem:[%s2416_s29 + $0x10] sm:$0xf]  ;;  %v2324_v7 = vld [vmem:[%s2928_s1] sm:$0xff]  }
  0x16   : > { %v244_v31 = vor.u32 %v243_v22, %v240_v20  ;;  %v294_v32 = vshrl.u32 %v2444_v21, 16  ;;  %v297_v33 = vshll.u32 %v2444_v21, 16  ;;  %v303_v34 = vshll.u32 %v2450_v25, 16  ;;  %v2468_v40 = vld [vmem:[%s2416_s29 + $0x18] sm:$0xf] }
  0x17   : > { %v231_v36 = vrot.slane %v230_v26, 4  ;;  %v282_v37 = vrot.slane %v280_v27, 4  ;;  %v285_v38 = vrot.slane %v283_v28, 5  ;;  %v291_v39 = vrot.slane %v289_v29, 5  ;;  %v2471_v45 = vld [vmem:[%s2416_s29 + $0x14] sm:$0x1] }
  0x18   : > { %v245_v41 = vrot.slane %v244_v31, 4  ;;  %v296_v42 = vrot.slane %v294_v32, 4  ;;  %v299_v43 = vrot.slane %v297_v33, 5  ;;  %v305_v44 = vrot.slane %v303_v34, 5  ;;  %v2480_v52 = vld [vmem:[%s2416_s29 + $0x1c] sm:$0x1] }
  0x19   : > { %v236_v46 = vsel %vm2457_vm3, %v231_v36, %v235_v19  ;;  %v286_v47 = vor.u32 %v285_v38, %v282_v37  ;;  %v596_v48 = vrot.slane %v2447_v24, 5  ;;  %v600_v49 = vrot.slane %v2450_v25, 5  ;;  %v2485_v55 = vld [vmem:[%s2416_s29 + $0x30] sm:$0xf]  ;;  %v2490_v60 = vld [vmem:[%s2416_s29 + $0x34] sm:$0x1] }
  0x1a   : > { %v250_v50 = vsel %vm2457_vm3, %v245_v41, %v249_v23  ;;  %v300_v51 = vor.u32 %v299_v43, %v296_v42  ;;  %v252_v53 = vshrl.u32 %v2465_v35, 16  ;;  %v255_v54 = vshll.u32 %v2465_v35, 16  ;;  %v2494_v1 = vld [vmem:[%s2416_s29 + $0x38] sm:$0xf]  ;;  %v2497_v8 = vld [vmem:[%s2416_s29 + $0x3c] sm:$0x1] }
  0x1b   : > { %v1935_v56 = vcombine.low %v236_v46, %v250_v50  ;;  %v287_v57 = vrot.slane %v286_v47, 4  ;;  %v261_v58 = vshll.u32 %v2471_v45, 16  ;;  %v266_v59 = vshrl.u32 %v2468_v40, 16  ;;  %v551_v20 = vld [vmem:[%s2416_s29] sm:$0xe] }
  0x1c   : > { %v301_v61 = vrot.slane %v300_v51, 4  ;;  %v254_v62 = vrot.slane %v252_v53, 4  ;;  %v257_v63 = vrot.slane %v255_v54, 5  ;;  %v269_v0 = vshll.u32 %v2468_v40, 16  ;;  %v552_v28 = vld [vmem:[%s2416_s29 + $0x8] sm:$0xe] }
  0x1d   : > { %2203 = vmatprep.mubr.msk.bf16.mxu0 %vm364_vm2, %v1935_v56  ;;  %v292_v9 = vsel %vm2457_vm3, %v287_v57, %v291_v39  ;;  %v263_v10 = vrot.slane %v261_v58, 5  ;;  %v268_v11 = vrot.slane %v266_v59, 4  ;;  %v275_v12 = vshll.u32 %v2480_v52, 16  ;;  %v553_v34 = vld [vmem:[%s2416_s29 + $0x10] sm:$0xe] }
  0x1e   : > { %v306_v13 = vsel %vm2457_vm3, %v301_v61, %v305_v44  ;;  %v258_v17 = vor.u32 %v257_v63, %v254_v62  ;;  %v271_v18 = vrot.slane %v269_v0, 5  ;;  %v588_v19 = vrot.slane %v2471_v45, 5  ;;  %v554_v45 = vld [vmem:[%s2416_s29 + $0x18] sm:$0xe]  ;;  %v555_v46 = vld [vmem:[%s2416_s29 + $0x20] sm:$0xe] }
  0x1f   : > { %v1937_v22 = vcombine.low %v292_v9, %v306_v13  ;;  %v277_v23 = vrot.slane %v275_v12, 5  ;;  %v592_v26 = vrot.slane %v2480_v52, 5  ;;  %v308_v27 = vshrl.u32 %v2485_v55, 16  ;;  %v556_v53 = vld [vmem:[%s2416_s29 + $0x28] sm:$0xe]  ;;  %v2325_v62 = vld [vmem:[%s2928_s1 + $0x20] sm:$0xff]  }
  0x20   : > { %v259_v29 = vrot.slane %v258_v17, 4  ;;  %v272_v31 = vor.u32 %v271_v18, %v268_v11  ;;  %v311_v32 = vshll.u32 %v2485_v55, 16  ;;  %v317_v33 = vshll.u32 %v2490_v60, 16  ;;  %v557_v9 = vld [vmem:[%s2416_s29 + $0x30] sm:$0xe] }
  0x21   : > { %2207 = vmatprep.mubr.msk.bf16.mxu1 %vm364_vm2, %v1937_v22  ;;  %v310_v36 = vrot.slane %v308_v27, 4  ;;  %v322_v37 = vshrl.u32 %v2494_v1, 16  ;;  %v325_v38 = vshll.u32 %v2494_v1, 16  ;;  %v331_v39 = vshll.u32 %v2497_v8, 16  ;;  %v1999_v27 = vld [vmem:[%s2416_s29 + $0x8] sm:$0xf] }
  0x22   : > { %v264_v41 = vsel %vm2457_vm3, %v259_v29, %v263_v10  ;;  %v273_v42 = vrot.slane %v272_v31, 4  ;;  %v313_v43 = vrot.slane %v311_v32, 5  ;;  %v319_v47 = vrot.slane %v317_v33, 5  ;;  %v558_v10 = vld [vmem:[%s2416_s29 + $0x38] sm:$0xe] }
  0x23   : > { %v324_v50 = vrot.slane %v322_v37, 4  ;;  %v327_v51 = vrot.slane %v325_v38, 5  ;;  %v1955_v52 = vrot.slane %v551_v20, 9  ;;  %v333_v57 = vrot.slane %v331_v39, 5  ;;  %v2001_v29 = vld [vmem:[%s2416_s29 + $0x10] sm:$0xf] }
  0x24   : > { %v278_v54 = vsel %vm2457_vm3, %v273_v42, %v277_v23  ;;  %v314_v56 = vor.u32 %v313_v43, %v310_v36  ;;  %v1956_v58 = vrot.slane %v552_v28, 9  ;;  %v1957_v0 = vrot.slane %v553_v34, 9  ;;  %v2572_v28 = vld [vmem:[%s2416_s29 + $0xc] sm:$0x1]  ;;  %v2577_v36 = vld [vmem:[%s2416_s29 + $0x14] sm:$0x1] }
  0x25   : > { %v1936_v59 = vcombine.low %v264_v41, %v278_v54  ;;  %v328_v61 = vor.u32 %v327_v51, %v324_v50  ;;  %v581_v63 = vsel %vm2521_vm6, %v1955_v52, %v580_v14  ;;  %v1958_v13 = vrot.slane %v554_v45, 9  ;;  %v2327_v45 = vld [vmem:[%s2928_s1 + $0x38] sm:$0xff]  }
  0x26   : > { %v315_v11 = vrot.slane %v314_v56, 4  ;;  %v585_v12 = vsel %vm2521_vm6, %v1956_v58, %v584_v15  ;;  %v1959_v17 = vrot.slane %v555_v46, 9  ;;  %v589_v6 = vsel %vm2521_vm6, %v1957_v0, %v588_v19  ;;  %v2602_v54 = vld [vmem:[%s2416_s29 + $0x1c] sm:$0x1]  ;;  %v2005_v56 = vld [vmem:[%s2416_s29 + $0x20] sm:$0xf] }
  0x27   : > { %2204 = vmatmul.mubr.msk.bf16.vlgmr.msra.gmra.mxu0 %vm364_vm2, %v1936_v59  ;;  %v329_v18 = vrot.slane %v328_v61, 4  ;;  %v1967_v20 = vcombine.low %v581_v63, %v585_v12  ;;  %v1960_v14 = vrot.slane %v556_v53, 9  ;;  %v1945_v15 = vcombine.low %v2419_v4, %v2422_v5  ;;  %v2003_v53 = vld [vmem:[%s2416_s29 + $0x18] sm:$0xf] }
  0x28   : > { %v320_v22 = vsel %vm2457_vm3, %v315_v11, %v319_v47  ;;  %2224 = vmatpush3.bf16.msra.mxu0 %v2411_v3  ;;  %v593_v23 = vsel %vm2521_vm6, %v1958_v13, %v592_v26  ;;  %v2329_v3 = vld [vmem:[%s2928_s1 + $0x48] sm:$0xff]   ;;  %v597_v4 = vsel %vm2521_vm6, %v1959_v17, %v596_v48  ;;  %v1961_v26 = vrot.slane %v557_v9, 9 }
  0x29   : > { %v334_v19 = vsel %vm2457_vm3, %v329_v18, %v333_v57  ;;  %2225 = vmatprep.subr.bf16.mxu0 %v2325_v62  ;;  %2227 = vmatprep.mubr.msk.bf16.mxu0 %vm364_vm2, %v1967_v20  ;;  %v601_v5 = vsel %vm2521_vm6, %v1960_v14, %v600_v49  ;;  %v1968_v32 = vcombine.low %v589_v6, %v593_v23  ;;  %v604_v33 = vrot.slane %v2490_v60, 5  ;;  %v2610_v57 = vld [vmem:[%s2416_s29 + $0x24] sm:$0x1]  ;;  %v2617_v13 = vld [vmem:[%s2928_s1 + $0x68] sm:$0xff]  }
  0x2a   : > { %v1938_v31 = vcombine.low %v320_v22, %v334_v19  ;;  %v1962_v34 = vrot.slane %v558_v10, 9  ;;  %v608_v24 = vrot.slane %v2497_v8, 5  ;;  %v872_v37 = vshrl.u32 %v1999_v27, 16  ;;  %v2333_v8 = vld [vmem:[%s2928_s1 + $0x40] sm:$0xff]   ;;  %v2627_v22 = vld [vmem:[%s2928_s1 + $0x58] sm:$0xff]  }
  0x2b   : > { %v875_v48 = vshll.u32 %v1999_v27, 16  ;;  %v881_v25 = vshll.u32 %v2572_v28, 16  ;;  %v1969_v49 = vcombine.low %v597_v4, %v601_v5  ;;  %v886_v38 = vshrl.u32 %v2001_v29, 16  ;;  %v2007_v27 = vld [vmem:[%s2416_s29 + $0x28] sm:$0xf] }
  0x2c   : > { %2208 = vmatmul.mubr.msk.bf16.vlgmr.msra.gmra.mxu1 %vm364_vm2, %v1938_v31  ;;  %2226 = vmatpush3.bf16.msra.mxu0 %v2325_v62  ;;  %v889_v39 = vshll.u32 %v2001_v29, 16  ;;  %v895_v41 = vshll.u32 %v2577_v36, 16  ;;  %v1947_v60 = vcombine.low %v2441_v16, %v2444_v21  ;;  %v874_v42 = vrot.slane %v872_v37, 4  ;;  %v2632_v4 = vld [vmem:[%s2416_s29 + $0x2c] sm:$0x1] }
  0x2d   : > { %2212 = vmatpush3.bf16.msra.mxu1 %v2405_v2  ;;  %2215 = vmatprep.mubr.msk.bf16.mxu1 %vm364_vm2, %v1945_v15  ;;  %v877_v43 = vrot.slane %v875_v48, 5  ;;  %v883_v2 = vrot.slane %v881_v25, 5  ;;  %v888_v46 = vrot.slane %v886_v38, 4  ;;  %v1946_v21 = vcombine.low %v2465_v35, %v2468_v40  ;;  %v2331_v35 = vld [vmem:[%s2928_s1 + $0x30] sm:$0xff]  }
  0x2e   : > { %2213 = vmatprep.subr.bf16.mxu1 %v2324_v7  ;;  %2247 = vmatprep.subr.bf16.mxu0 %v2329_v3  ;;  %v891_v47 = vrot.slane %v889_v39, 5  ;;  %v897_v16 = vrot.slane %v895_v41, 5  ;;  %v605_v50 = vsel %vm2521_vm6, %v1961_v26, %v604_v33  ;;  %v609_v51 = vsel %vm2521_vm6, %v1962_v34, %v608_v24  ;;  %v2009_v5 = vld [vmem:[%s2416_s29 + $0x30] sm:$0xf]  ;;  %v2636_v26 = vld [vmem:[%s2416_s29 + $0x34] sm:$0x1] }
  0x2f   : > { %2228 = vmatmul.mubr.msk.bf16.vlgmr.msra.gmra.mxu0 %vm364_vm2, %v1968_v32  ;;  %v878_v52 = vor.u32 %v877_v43, %v874_v42  ;;  %v900_v58 = vshrl.u32 %v2003_v53, 16  ;;  %v903_v59 = vshll.u32 %v2003_v53, 16  ;;  %v909_v61 = vshll.u32 %v2602_v54, 16  ;;  %v2334_v41 = vld [vmem:[%s2416_s29 + $0x8] ss:$8 sps:$4 sm:$0xff]  }
  0x30   : > { %2248 = vmatpush3.bf16.msra.mxu0 %v2329_v3  ;;  %2231 = vmatprep.mubr.msk.bf16.mxu0 %vm364_vm2, %v1969_v49  ;;  %v892_v40 = vor.u32 %v891_v47, %v888_v46  ;;  %v914_v63 = vshrl.u32 %v2005_v56, 16  ;;  %v917_v0 = vshll.u32 %v2005_v56, 16  ;;  %v923_v9 = vshll.u32 %v2610_v57, 16 }
  0x31   : > { %2214 = vmatpush3.bf16.msra.mxu1 %v2324_v7  ;;  %2249 = vmatprep.subr.bf16.mxu0 %v2333_v8  ;;  %v879_v62 = vrot.slane %v878_v52, 4  ;;  %v902_v11 = vrot.slane %v900_v58, 4  ;;  %v905_v12 = vrot.slane %v903_v59, 5  ;;  %v1970_v17 = vcombine.low %v605_v50, %v609_v51  ;;  %v2341_v52 = vld [vmem:[%s2928_s1 + $0x60] sm:$0xff]  }
  0x32   : > { %2235 = vmatprep.subr.bf16.mxu1 %v2327_v45  ;;  %v893_v10 = vrot.slane %v892_v40, 4  ;;  %v916_v20 = vrot.slane %v914_v63, 4  ;;  %v919_v6 = vrot.slane %v917_v0, 5  ;;  %v911_v15 = vrot.slane %v909_v61, 5  ;;  %v2336_v63 = vld [vmem:[%s2416_s29 + $0x18] ss:$8 sps:$4 sm:$0xff]  }
  0x33   : > { %v884_v18 = vsel %vm2457_vm3, %v879_v62, %v883_v2  ;;  %v906_v7 = vor.u32 %v905_v12, %v902_v11  ;;  %v925_v23 = vrot.slane %v923_v9, 5  ;;  %v928_v31 = vshrl.u32 %v2007_v27, 16  ;;  %v2653_v2 = vld [vmem:[%s2416_s29 + $0x3c] sm:$0x1]  ;;  %v2029_v12 = vld [vmem:[%s2416_s29 + $0x8] sm:$0xe] }
  0x34   : > { %2216 = vmatmul.mubr.msk.bf16.vlgmr.msra.gmra.mxu1 %vm364_vm2, %v1946_v21  ;;  %2250 = vmatpush3.bf16.msra.mxu0 %v2333_v8  ;;  %v898_v14 = vsel %vm2457_vm3, %v893_v10, %v897_v16  ;;  %v920_v3 = vor.u32 %v919_v6, %v916_v20  ;;  %v931_v32 = vshll.u32 %v2007_v27, 16  ;;  %v937_v33 = vshll.u32 %v2632_v4, 16  ;;  %v2013_v16 = vld [vmem:[%s2416_s29 + $0x40] sm:$0xf]  ;;  %v2657_v21 = vld [vmem:[%s2416_s29 + $0x44] sm:$0x1] }
  0x35   : > { %2236 = vmatpush3.bf16.msra.mxu1 %v2327_v45  ;;  %2219 = vmatprep.mubr.msk.bf16.mxu1 %vm364_vm2, %v1947_v60  ;;  %v2019_v19 = vcombine.low %v884_v18, %v898_v14  ;;  %v907_v29 = vrot.slane %v906_v7, 4  ;;  %v942_v24 = vshrl.u32 %v2009_v5, 16  ;;  %v945_v37 = vshll.u32 %v2009_v5, 16  ;;  %v2011_v45 = vld [vmem:[%s2416_s29 + $0x38] sm:$0xf] }
  0x36   : > { %2237 = vmatprep.subr.bf16.mxu1 %v2331_v35  ;;  %2271 = vmatprep.subr.bf16.mxu0 %v2617_v13  ;;  %v921_v34 = vrot.slane %v920_v3, 4  ;;  %v951_v48 = vshll.u32 %v2636_v26, 16  ;;  %v1948_v25 = vcombine.low %v2485_v55, %v2494_v1  ;;  %v930_v38 = vrot.slane %v928_v31, 4  ;;  %v2030_v6 = vld [vmem:[%s2416_s29 + $0x10] sm:$0xe] }
  0x37   : > { %2232 = vmatmul.mubr.msk.bf16.gmra.mxu0 %vm364_vm2, %v1970_v17  ;;  %v912_v49 = vsel %vm2457_vm3, %v907_v29, %v911_v15  ;;  %v933_v39 = vrot.slane %v931_v32, 5  ;;  %v944_v8 = vrot.slane %v942_v24, 4  ;;  %v947_v42 = vrot.slane %v945_v37, 5  ;;  %v2338_v7 = vld [vmem:[%s2416_s29 + $0x28] ss:$8 sps:$4 sm:$0xff]  }
  0x38   : > { %2251 = vmatprep.mubr.msk.bf16.mxu0 %vm364_vm2, %v2019_v19  ;;  %v926_v60 = vsel %vm2457_vm3, %v921_v34, %v925_v23  ;;  %v939_v55 = vrot.slane %v937_v33, 5  ;;  %v953_v1 = vrot.slane %v951_v48, 5  ;;  %v956_v50 = vshrl.u32 %v2011_v45, 16  ;;  %v2339_v23 = vld [vmem:[%s2928_s1 + $0x50] sm:$0xff]   ;;  %v2031_v33 = vld [vmem:[%s2416_s29 + $0x18] sm:$0xe] }
  0x39   : > { %2238 = vmatpush3.bf16.msra.mxu1 %v2331_v35  ;;  %v934_v43 = vor.u32 %v933_v39, %v930_v38  ;;  %v2020_v46 = vcombine.low %v912_v49, %v926_v60  ;;  %v948_v47 = vor.u32 %v947_v42, %v944_v8  ;;  %v959_v51 = vshll.u32 %v2011_v45, 16  ;;  %v2342_v32 = vld [vmem:[%s2416_s29 + $0x10] ss:$8 sps:$4 sm:$0xff]   ;;  %v2688_v34 = vld [vmem:[%s2928_s1 + $0x88] sm:$0xff]  }
  0x3a   : > { %2259 = vmatprep.subr.bf16.mxu1 %v2627_v22  ;;  %v965_v56 = vshll.u32 %v2653_v2, 16  ;;  %v970_v35 = vshrl.u32 %v2013_v16, 16  ;;  %v973_v40 = vshll.u32 %v2013_v16, 16  ;;  %v958_v59 = vrot.slane %v956_v50, 4  ;;  %v2034_v60 = vld [vmem:[%s2416_s29 + $0x30] sm:$0xe] }
  0x3b   : > { %v935_v53 = vrot.slane %v934_v43, 4  ;;  %v949_v58 = vrot.slane %v948_v47, 4  ;;  %v961_v61 = vrot.slane %v959_v51, 5  ;;  %v979_v62 = vshll.u32 %v2657_v21, 16  ;;  %v2340_v42 = vld [vmem:[%s2416_s29 + $0x38] ss:$8 sps:$4 sm:$0xff]  }
  0x3c   : > { %2220 = vmatmul.mubr.msk.bf16.gmra.mxu1 %vm364_vm2, %v1948_v25  ;;  %v967_v9 = vrot.slane %v965_v56, 5  ;;  %v972_v10 = vrot.slane %v970_v35, 4  ;;  %v975_v11 = vrot.slane %v973_v40, 5  ;;  %v2037_v14 = vrot.slane %v2029_v12, 9  ;;  %v2344_v47 = vld [vmem:[%s2416_s29 + $0x20] ss:$8 sps:$4 sm:$0xff]  }
  0x3d   : > { %2239 = vmatprep.mubr.msk.bf16.mxu1 %vm364_vm2, %v2334_v41  ;;  %v940_v0 = vsel %vm2457_vm3, %v935_v53, %v939_v55  ;;  %v954_v17 = vsel %vm2457_vm3, %v949_v58, %v953_v1  ;;  %v962_v18 = vor.u32 %v961_v61, %v958_v59  ;;  %v981_v20 = vrot.slane %v979_v62, 5  ;;  %v2033_v41 = vld [vmem:[%s2416_s29 + $0x28] sm:$0xe]  ;;  %v2346_v53 = vld [vmem:[%s2416_s29 + $0x30] ss:$8 sps:$4 sm:$0xff]  }
  0x3e   : > { %v2021_v15 = vcombine.low %v940_v0, %v954_v17  ;;  %v976_v27 = vor.u32 %v975_v11, %v972_v10  ;;  %v1123_v19 = vrot.slane %v2572_v28, 5  ;;  %v2038_v3 = vrot.slane %v2030_v6, 9  ;;  %v2081_v40 = vld [vmem:[%s2416_s29 + $0x10] sm:$0xf]  ;;  %v2083_v61 = vld [vmem:[%s2416_s29 + $0x18] sm:$0xf] }
  0x3f   : > { %2252 = vmatmul.mubr.msk.bf16.vlgmr.msra.gmra.mxu0 %vm364_vm2, %v2020_v46  ;;  %v963_v5 = vrot.slane %v962_v18, 4  ;;  %v1127_v29 = vrot.slane %v2577_v36, 5  ;;  %v2039_v24 = vrot.slane %v2031_v33, 9  ;;  %v1131_v37 = vrot.slane %v2602_v54, 5  ;;  %v2036_v46 = vld [vmem:[%s2416_s29 + $0x40] sm:$0xe] }
  0x40   : > { %2272 = vmatpush3.bf16.msra.mxu0 %v2617_v13  ;;  %2255 = vmatprep.mubr.msk.bf16.mxu0 %vm364_vm2, %v2021_v15  ;;  %v977_v31 = vrot.slane %v976_v27, 4  ;;  %v2032_v13 = vld [vmem:[%s2416_s29 + $0x20] sm:$0xe]  ;;  %v1135_v25 = vrot.slane %v2610_v57, 5  ;;  %v1139_v49 = vrot.slane %v2632_v4, 5  ;;  %v1124_v54 = vsel %vm2521_vm6, %v2037_v14, %v1123_v19  ;;  %v2709_v57 = vld [vmem:[%s2928_s1 + $0x78] sm:$0xff]  }
  0x41   : > { %2273 = vmatprep.subr.bf16.mxu0 %v2341_v52  ;;  %v968_v28 = vsel %vm2457_vm3, %v963_v5, %v967_v9  ;;  %v2040_v48 = vrot.slane %v2032_v13, 9  ;;  %v1128_v39 = vsel %vm2521_vm6, %v2038_v3, %v1127_v29  ;;  %v2042_v4 = vrot.slane %v2034_v60, 9  ;;  %v2084_v62 = vld [vmem:[%s2416_s29 + $0x1c] sm:$0x1]  ;;  %v2349_v0 = vld [vmem:[%s2928_s1 + $0x80] sm:$0xff]  }
  0x42   : > { %v982_v36 = vsel %vm2457_vm3, %v977_v31, %v981_v20  ;;  %v1143_v8 = vrot.slane %v2636_v26, 5  ;;  %v2049_v43 = vcombine.low %v1124_v54, %v1128_v39  ;;  %v2718_v55 = vsel %vm2521_vm6, %v2039_v24, %v1131_v37  ;;  %v2035_v26 = vld [vmem:[%s2416_s29 + $0x38] sm:$0xe]  ;;  %v2111_v12 = vld [vmem:[%s2416_s29 + $0x10] sm:$0xe] }
  0x43   : > { %v2022_v38 = vcombine.low %v968_v28, %v982_v36  ;;  %v2722_v1 = vsel %vm2521_vm6, %v2040_v48, %v1135_v25  ;;  %v2043_v50 = vrot.slane %v2035_v26, 9  ;;  %v1147_v51 = vrot.slane %v2653_v2, 5  ;;  %v2112_v6 = vld [vmem:[%s2416_s29 + $0x18] sm:$0xe]  ;;  %v2085_v19 = vld [vmem:[%s2416_s29 + $0x20] sm:$0xf] }
  0x44   : > { %2240 = vmatmul.mubr.msk.bf16.vlgmr.msra.gmra.mxu1 %vm364_vm2, %v2336_v63  ;;  %2274 = vmatpush3.bf16.msra.mxu0 %v2341_v52  ;;  %v2733_v16 = vsel %vm2521_vm6, %v2042_v4, %v1143_v8  ;;  %v2044_v52 = vrot.slane %v2036_v46, 9  ;;  %v1151_v56 = vrot.slane %v2657_v21, 5  ;;  %v2050_v58 = vcombine.low %v2718_v55, %v2722_v1  ;;  %v2082_v21 = vld [vmem:[%s2416_s29 + $0x14] sm:$0x1]  ;;  %v2348_v33 = vld [vmem:[%s2416_s29 + $0x40] ss:$8 sps:$4 sm:$0xff]  }
  0x45   : > { %2260 = vmatpush3.bf16.msra.mxu1 %v2627_v22  ;;  %2243 = vmatprep.mubr.msk.bf16.mxu1 %vm364_vm2, %v2338_v7  ;;  %v2041_v22 = vrot.slane %v2033_v41, 9  ;;  %v2741_v35 = vsel %vm2521_vm6, %v2043_v50, %v1147_v51  ;;  %v1415_v9 = vshrl.u32 %v2081_v40, 16  ;;  %v1418_v10 = vshll.u32 %v2081_v40, 16  ;;  %v2087_v37 = vld [vmem:[%s2416_s29 + $0x28] sm:$0xf] }
  0x46   : > { %2261 = vmatprep.subr.bf16.mxu1 %v2339_v23  ;;  %2295 = vmatprep.subr.bf16.mxu0 %v2688_v34  ;;  %v2751_v59 = vsel %vm2521_vm6, %v2044_v52, %v1151_v56  ;;  %v1424_v11 = vshll.u32 %v2082_v21, 16  ;;  %v1429_v17 = vshrl.u32 %v2083_v61, 16  ;;  %v1432_v18 = vshll.u32 %v2083_v61, 16  ;;  %v2088_v25 = vld [vmem:[%s2416_s29 + $0x2c] sm:$0x1] }
  0x47   : > { %2256 = vmatmul.mubr.msk.bf16.gmra.mxu0 %vm364_vm2, %v2022_v38  ;;  %v2726_v45 = vsel %vm2521_vm6, %v2041_v22, %v1139_v49  ;;  %v2052_v63 = vcombine.low %v2741_v35, %v2751_v59  ;;  %v1438_v20 = vshll.u32 %v2084_v62, 16  ;;  %v2119_v14 = vrot.slane %v2111_v12, 9  ;;  %v2113_v4 = vld [vmem:[%s2416_s29 + $0x20] sm:$0xe]  ;;  %v2114_v1 = vld [vmem:[%s2416_s29 + $0x28] sm:$0xe] }
  0x48   : > { %2275 = vmatprep.mubr.msk.bf16.mxu0 %vm364_vm2, %v2342_v32  ;;  %v2051_v2 = vcombine.low %v2726_v45, %v2733_v16  ;;  %v1417_v7 = vrot.slane %v1415_v9, 4  ;;  %v1420_v15 = vrot.slane %v1418_v10, 5  ;;  %v1666_v27 = vrot.slane %v2082_v21, 5  ;;  %v2086_v32 = vld [vmem:[%s2416_s29 + $0x24] sm:$0x1] }
  0x49   : > { %2262 = vmatpush3.bf16.msra.mxu1 %v2339_v23  ;;  %v1426_v23 = vrot.slane %v1424_v11, 5  ;;  %v1431_v3 = vrot.slane %v1429_v17, 4  ;;  %v1434_v5 = vrot.slane %v1432_v18, 5  ;;  %v1440_v29 = vrot.slane %v1438_v20, 5  ;;  %v2089_v16 = vld [vmem:[%s2416_s29 + $0x30] sm:$0xf] }
  0x4a   : > { %2283 = vmatprep.subr.bf16.mxu1 %v2709_v57  ;;  %v2120_v31 = vrot.slane %v2112_v6, 9  ;;  %v1421_v13 = vor.u32 %v1420_v15, %v1417_v7  ;;  %v1667_v28 = vsel %vm2521_vm6, %v2119_v14, %v1666_v27  ;;  %v1670_v24 = vrot.slane %v2084_v62, 5  ;;  %v2090_v56 = vld [vmem:[%s2416_s29 + $0x34] sm:$0x1]  ;;  %v2091_v40 = vld [vmem:[%s2416_s29 + $0x38] sm:$0xf] }
  0x4b   : > { %v1443_v36 = vshrl.u32 %v2085_v19, 16  ;;  %v1435_v48 = vor.u32 %v1434_v5, %v1431_v3  ;;  %v1446_v49 = vshll.u32 %v2085_v19, 16  ;;  %v1452_v38 = vshll.u32 %v2086_v32, 16  ;;  %v2092_v11 = vld [vmem:[%s2416_s29 + $0x3c] sm:$0x1] }
  0x4c   : > { %2244 = vmatmul.mubr.msk.bf16.gmra.mxu1 %vm364_vm2, %v2340_v42  ;;  %v1457_v54 = vshrl.u32 %v2087_v37, 16  ;;  %v1422_v39 = vrot.slane %v1421_v13, 4  ;;  %v1671_v41 = vsel %vm2521_vm6, %v2120_v31, %v1670_v24  ;;  %v1460_v22 = vshll.u32 %v2087_v37, 16  ;;  %v2115_v15 = vld [vmem:[%s2416_s29 + $0x30] sm:$0xe] }
  0x4d   : > { %2263 = vmatprep.mubr.msk.bf16.mxu1 %vm364_vm2, %v2049_v43  ;;  %v1445_v60 = vrot.slane %v1443_v36, 4  ;;  %v1436_v8 = vrot.slane %v1435_v48, 4  ;;  %v2131_v42 = vcombine.low %v1667_v28, %v1671_v41  ;;  %v1448_v43 = vrot.slane %v1446_v49, 5  ;;  %v2094_v28 = vld [vmem:[%s2416_s29 + $0x44] sm:$0x1] }
  0x4e   : > { %v1454_v55 = vrot.slane %v1452_v38, 5  ;;  %v1427_v45 = vsel %vm2457_vm3, %v1422_v39, %v1426_v23  ;;  %v1459_v26 = vrot.slane %v1457_v54, 4  ;;  %v1462_v46 = vrot.slane %v1460_v22, 5  ;;  %v2116_v23 = vld [vmem:[%s2416_s29 + $0x38] sm:$0xe] }
  0x4f   : > { %2276 = vmatmul.mubr.msk.bf16.vlgmr.msra.gmra.mxu0 %vm364_vm2, %v2344_v47  ;;  %v1466_v47 = vshll.u32 %v2088_v25, 16  ;;  %v1441_v50 = vsel %vm2457_vm3, %v1436_v8, %v1440_v29  ;;  %v1449_v51 = vor.u32 %v1448_v43, %v1445_v60  ;;  %v2121_v52 = vrot.slane %v2113_v4, 9  ;;  %v2093_v29 = vld [vmem:[%s2416_s29 + $0x40] sm:$0xf]  ;;  %v2095_v48 = vld [vmem:[%s2416_s29 + $0x48] sm:$0xf] }
  0x50   : > { %2296 = vmatpush3.bf16.msra.mxu0 %v2688_v34  ;;  %2279 = vmatprep.mubr.msk.bf16.mxu0 %vm364_vm2, %v2346_v53  ;;  %v2347_v34 = vld [vmem:[%s2928_s1 + $0x70] sm:$0xff]   ;;  %v1674_v53 = vrot.slane %v2086_v32, 5  ;;  %v2122_v21 = vrot.slane %v2114_v1, 9  ;;  %v1471_v9 = vshrl.u32 %v2089_v16, 16  ;;  %v1474_v12 = vshll.u32 %v2089_v16, 16 }
  0x51   : > { %2297 = vmatprep.subr.bf16.mxu0 %v2349_v0  ;;  %v1450_v61 = vrot.slane %v1449_v51, 4  ;;  %v1480_v17 = vshll.u32 %v2090_v56, 16  ;;  %v1485_v18 = vshrl.u32 %v2091_v40, 16  ;;  %v1488_v7 = vshll.u32 %v2091_v40, 16  ;;  %v2096_v54 = vld [vmem:[%s2416_s29 + $0x4c] sm:$0x1] }
  0x52   : > { %v1675_v62 = vsel %vm2521_vm6, %v2121_v52, %v1674_v53  ;;  %v1473_v14 = vrot.slane %v1471_v9, 4  ;;  %v1476_v3 = vrot.slane %v1474_v12, 5  ;;  %v1494_v13 = vshll.u32 %v2092_v11, 16 }
  0x53   : > { %v1455_v20 = vsel %vm2457_vm3, %v1450_v61, %v1454_v55  ;;  %v1482_v5 = vrot.slane %v1480_v17, 5  ;;  %v1487_v32 = vrot.slane %v1485_v18, 4  ;;  %v2123_v37 = vrot.slane %v2115_v15, 9 }
  0x54   : > { %2264 = vmatmul.mubr.msk.bf16.vlgmr.msra.gmra.mxu1 %vm364_vm2, %v2050_v58  ;;  %2298 = vmatpush3.bf16.msra.mxu0 %v2349_v0  ;;  %v1463_v58 = vor.u32 %v1462_v46, %v1459_v26  ;;  %v1678_v0 = vrot.slane %v2088_v25, 5  ;;  %v1477_v24 = vor.u32 %v1476_v3, %v1473_v14  ;;  %v1682_v36 = vrot.slane %v2090_v56, 5 }
  0x55   : > { %2284 = vmatpush3.bf16.msra.mxu1 %v2709_v57  ;;  %2267 = vmatprep.mubr.msk.bf16.mxu1 %vm364_vm2, %v2051_v2  ;;  %v2101_v57 = vcombine.low %v1427_v45, %v1441_v50  ;;  %v1468_v2 = vrot.slane %v1466_v47, 5  ;;  %v1496_v49 = vrot.slane %v1494_v13, 5  ;;  %v1686_v38 = vrot.slane %v2092_v11, 5  ;;  %v2118_v45 = vld [vmem:[%s2416_s29 + $0x48] sm:$0xe] }
  0x56   : > { %2285 = vmatprep.subr.bf16.mxu1 %v2347_v34  ;;  %v1464_v10 = vrot.slane %v1463_v58, 4  ;;  %v1679_v6 = vsel %vm2521_vm6, %v2122_v21, %v1678_v0  ;;  %v1499_v35 = vshrl.u32 %v2093_v29, 16  ;;  %v1478_v59 = vrot.slane %v1477_v24, 4 }
  0x57   : > { %2280 = vmatmul.mubr.msk.bf16.gmra.mxu0 %vm364_vm2, %v2348_v33  ;;  %v2132_v19 = vcombine.low %v1675_v62, %v1679_v6  ;;  %v1490_v33 = vrot.slane %v1488_v7, 5  ;;  %v1502_v39 = vshll.u32 %v2093_v29, 16  ;;  %v1508_v41 = vshll.u32 %v2094_v28, 16 }
  0x58   : > { %2299 = vmatprep.mubr.msk.bf16.mxu0 %vm364_vm2, %v2131_v42  ;;  %v1469_v27 = vsel %vm2457_vm3, %v1464_v10, %v1468_v2  ;;  %v1501_v4 = vrot.slane %v1499_v35, 4  ;;  %v1513_v8 = vshrl.u32 %v2095_v48, 16  ;;  %v2117_v42 = vld [vmem:[%s2416_s29 + $0x40] sm:$0xe]  ;;  %v1483_v43 = vsel %vm2457_vm3, %v1478_v59, %v1482_v5  ;;  %s1825_s29 = sld [smem:[#allocation2]] }
  0x59   : > { %2286 = vmatpush3.bf16.msra.mxu1 %v2347_v34  ;;  %v2102_v31 = vcombine.low %v1455_v20, %v1469_v27  ;;  %v2124_v34 = vrot.slane %v2116_v23, 9  ;;  %v1491_v25 = vor.u32 %v1490_v33, %v1487_v32  ;;  %v1504_v1 = vrot.slane %v1502_v39, 5 }
  0x5a   : > { %v1515_v46 = vrot.slane %v1513_v8, 4  ;;  %v1516_v47 = vshll.u32 %v2095_v48, 16  ;;  %v1522_v16 = vshll.u32 %v2096_v54, 16  ;;  %v2125_v52 = vrot.slane %v2117_v42, 9 }
  0x5b   : > { %v1492_v60 = vrot.slane %v1491_v25, 4  ;;  %v1687_v22 = vsel %vm2521_vm6, %v2124_v34, %v1686_v38  ;;  %v1505_v51 = vor.u32 %v1504_v1, %v1501_v4  ;;  %v1690_v53 = vrot.slane %v2094_v28, 5 }
  0x5c   : > { %2268 = vmatmul.mubr.msk.bf16.gmra.mxu1 %vm364_vm2, %v2052_v63  ;;  %v1683_v63 = vsel %vm2521_vm6, %v2123_v37, %v1682_v36  ;;  %v1510_v56 = vrot.slane %v1508_v41, 5  ;;  %v1518_v40 = vrot.slane %v1516_v47, 5  ;;  %v1694_v58 = vrot.slane %v2096_v54, 5 }
  0x5d   : > { %2287 = vmatprep.mubr.msk.bf16.mxu1 %vm364_vm2, %v2101_v57  ;;  %v2133_v55 = vcombine.low %v1683_v63, %v1687_v22  ;;  %v1497_v26 = vsel %vm2457_vm3, %v1492_v60, %v1496_v49  ;;  %v2126_v57 = vrot.slane %v2118_v45, 9  ;;  %v1506_v2 = vrot.slane %v1505_v51, 4 }
  0x5e   : > { %v2103_v50 = vcombine.low %v1483_v43, %v1497_v26  ;;  %v1691_v21 = vsel %vm2521_vm6, %v2125_v52, %v1690_v53  ;;  %v1519_v61 = vor.u32 %v1518_v40, %v1515_v46  ;;  %v1524_v62 = vrot.slane %v1522_v16, 5 }
  0x5f   : > { %2300 = vmatmul.mubr.msk.bf16.vlgmr.msra.gmra.mxu0 %vm364_vm2, %v2132_v19  ;;  %v1695_v0 = vsel %vm2521_vm6, %v2126_v57, %v1694_v58  ;;  %v1511_v10 = vsel %vm2457_vm3, %v1506_v2, %v1510_v56 }
  0x60   : > { %2303 = vmatprep.mubr.msk.bf16.mxu0 %vm364_vm2, %v2133_v55  ;;  %v2134_v9 = vcombine.low %v1691_v21, %v1695_v0  ;;  %v1520_v11 = vrot.slane %v1519_v61, 4 }
  0x62   : > { %v1525_v12 = vsel %vm2457_vm3, %v1520_v11, %v1524_v62 }
  0x63   : > { %v2104_v17 = vcombine.low %v1511_v10, %v1525_v12 }
  0x64   : > { %2288 = vmatmul.mubr.msk.bf16.vlgmr.msra.gmra.mxu1 %vm364_vm2, %v2102_v31 }
  0x65   : > { %2291 = vmatprep.mubr.msk.bf16.mxu1 %vm364_vm2, %v2103_v50 }
  0x67   : > { %2304 = vmatmul.mubr.msk.bf16.gmra.mxu0 %vm364_vm2, %v2134_v9 }
  0x6c   : > { %2292 = vmatmul.mubr.msk.bf16.gmra.mxu1 %vm364_vm2, %v2104_v17 }
  0xe7   : > { %v2205_v18 = vpop.f32.mrf.mxu0 }
  0xe9   : > { %v411_v20 = vpop.f32.mrf.mxu0 }
  0xeb   : > { %v2206_v6 = vpop.f32.mrf.mxu0 }
  0xec   : > { %v2209_v14 = vpop.f32.mrf.mxu1 }
  0xed   : > { %v414_v7 = vpop.f32.mrf.mxu0 }
  0xee   : > { %v427_v44 = vpop.f32.mrf.mxu1 }
  0xef   : > { %v2229_v15 = vpop.f32.mrf.mxu0 }
  0xf0   : > { %v2837_v23 = vpop.f32.mrf.mxu1 }
  0xf1   : > { %v685_v27 = vpop.f32.mrf.mxu0 }
  0xf2   : > { %v2839_v19 = vpop.f32.mrf.mxu1 }
  0xf3   : > { %v2230_v3 = vpop.f32.mrf.mxu0 }
  0xf4   : > { %v2217_v5 = vpop.f32.mrf.mxu1 }
  0xf5   : > { %v688_v29 = vpop.f32.mrf.mxu0  ;;  %v529_v26 = vadd.f32 %v2217_v5, %v2205_v18 }
  0xf6   : > { %v520_v30 = vpop.f32.mrf.mxu1 }
  0xf7   : > { %v2233_v31 = vpop.f32.mrf.mxu0  ;;  %v521_v16 = vadd.f32 %v520_v30, %v411_v20  ;;  %v718_v52 = vadd.f32 %v2229_v15, %v529_v26 }
  0xf8   : > { %v2218_v32 = vpop.f32.mrf.mxu1 }
  0xf9   : > { %v2841_v33 = vpop.f32.mrf.mxu0  ;;  %v532_v53 = vadd.f32 %v2218_v32, %v2206_v6  ;;  %v716_v57 = vadd.f32 %v685_v27, %v521_v16 }
  0xfa   : > { %v523_v13 = vpop.f32.mrf.mxu1 }
  0xfb   : > { %v2843_v28 = vpop.f32.mrf.mxu0  ;;  %v524_v21 = vadd.f32 %v523_v13, %v414_v7  ;;  %v719_v62 = vadd.f32 %v2230_v3, %v532_v53 }
  0xfc   : > { %v2221_v24 = vpop.f32.mrf.mxu1 }
  0xfd   : > { %v2845_v37 = vpop.f32.mrf.mxu0  ;;  %v545_v10 = vadd.f32 %v2221_v24, %v2209_v14  ;;  %v717_v20 = vadd.f32 %v688_v29, %v524_v21 }
  0xfe   : > { %v536_v36 = vpop.f32.mrf.mxu1 }
  0xff   : > { %v2253_v34 = vpop.f32.mrf.mxu0  ;;  %v537_v6 = vadd.f32 %v536_v36, %v427_v44  ;;  %v722_v32 = vadd.f32 %v2233_v31, %v545_v10 }
 0x100   : > { %v2222_v48 = vpop.f32.mrf.mxu1 }
 0x101   : > { %v1058_v25 = vpop.f32.mrf.mxu0  ;;  %v548_v7 = vadd.f32 %v2222_v48, %v2837_v23 }
 0x102   : > { %v539_v49 = vpop.f32.mrf.mxu1 }
 0x103   : > { %v2254_v38 = vpop.f32.mrf.mxu0  ;;  %v540_v3 = vadd.f32 %v539_v49, %v2839_v19  ;;  %v723_v26 = vadd.f32 %v2843_v28, %v548_v7 }
 0x104   : > { %v2241_v35 = vpop.f32.mrf.mxu1 }
 0x105   : > { %v1061_v59 = vpop.f32.mrf.mxu0  ;;  %v849_v58 = vadd.f32 %v2241_v35, %v718_v52  ;;  %v721_v31 = vadd.f32 %v2845_v37, %v540_v3  ;;  %v2877_v52 = vstv %s1825_s29 }
 0x106   : > { %v816_v63 = vpop.f32.mrf.mxu1 }
 0x107   : > { %v2847_v54 = vpop.f32.mrf.mxu0  ;;  %v847_v0 = vadd.f32 %v816_v63, %v716_v57  ;;  %v1091_v12 = vadd.f32 %v2253_v34, %v849_v58  ;;  %v720_v63 = vadd.f32 %v2841_v33, %v537_v6 }
 0x108   : > { %v2242_v39 = vpop.f32.mrf.mxu1 }
 0x109   : > { %v2849_v41 = vpop.f32.mrf.mxu0  ;;  %v850_v17 = vadd.f32 %v2242_v39, %v719_v62  ;;  %v1089_v5 = vadd.f32 %v1058_v25, %v847_v0 }
 0x10a   : > { %v819_v60 = vpop.f32.mrf.mxu1 }
 0x10b   : > { %v2851_v22 = vpop.f32.mrf.mxu0  ;;  %v848_v13 = vadd.f32 %v819_v60, %v717_v20  ;;  %v1092_v14 = vadd.f32 %v2254_v38, %v850_v17 }
 0x10c   : > { %v2245_v4 = vpop.f32.mrf.mxu1 }
 0x10d   : > { %v2853_v8 = vpop.f32.mrf.mxu0  ;;  %v853_v39 = vadd.f32 %v2245_v4, %v722_v32  ;;  %v1090_v23 = vadd.f32 %v1061_v59, %v848_v13  ;;  %v2874_v4 = vld [vmem:[%s2929_s2] ss:$0 sm:$0xff] }
 0x10e   : > { %v832_v42 = vpop.f32.mrf.mxu1 }
 0x10f   : > { %v2277_v43 = vpop.f32.mrf.mxu0  ;;  %v851_v48 = vadd.f32 %v832_v42, %v720_v63  ;;  %v1095_v38 = vadd.f32 %v2847_v54, %v853_v39 }
 0x110   : > { %v2246_v55 = vpop.f32.mrf.mxu1 }
 0x111   : > { %v1359_v1 = vpop.f32.mrf.mxu0  ;;  %v854_v16 = vadd.f32 %v2246_v55, %v723_v26  ;;  %v1093_v42 = vadd.f32 %v2849_v41, %v851_v48 }
 0x112   : > { %v835_v45 = vpop.f32.mrf.mxu1 }
 0x113   : > { %v2278_v46 = vpop.f32.mrf.mxu0  ;;  %v1096_v57 = vadd.f32 %v2851_v22, %v854_v16 }
 0x114   : > { %v2265_v47 = vpop.f32.mrf.mxu1 }
 0x115   : > { %v2855_v50 = vpop.f32.mrf.mxu0  ;;  %v1261_v27 = vadd.f32 %v2265_v47, %v1091_v12 }
 0x116   : > { %v1228_v51 = vpop.f32.mrf.mxu1 }
 0x117   : > { %v2857_v56 = vpop.f32.mrf.mxu0  ;;  %v1259_v24 = vadd.f32 %v1228_v51, %v1089_v5  ;;  %v1392_v44 = vadd.f32 %v2277_v43, %v1261_v27  ;;  %v852_v51 = vadd.f32 %v835_v45, %v721_v31 }
 0x118   : > { %v2266_v40 = vpop.f32.mrf.mxu1 }
 0x119   : > { %v2859_v2 = vpop.f32.mrf.mxu0  ;;  %v1262_v36 = vadd.f32 %v2266_v40, %v1092_v14  ;;  %v1390_v49 = vadd.f32 %v1359_v1, %v1259_v24  ;;  %v1094_v58 = vadd.f32 %v2853_v8, %v852_v51 }
 0x11a   : > { %v1231_v61 = vpop.f32.mrf.mxu1 }
 0x11b   : > { %v2861_v9 = vpop.f32.mrf.mxu0  ;;  %v1260_v33 = vadd.f32 %v1231_v61, %v1090_v23  ;;  %v1393_v28 = vadd.f32 %v2278_v46, %v1262_v36 }
 0x11c   : > { %v2269_v11 = vpop.f32.mrf.mxu1 }
 0x11d   : > { %v2863_v18 = vpop.f32.mrf.mxu0  ;;  %v1265_v1 = vadd.f32 %v2269_v11, %v1095_v38  ;;  %v1391_v46 = vadd.f32 %v2855_v50, %v1260_v33 }
 0x11e   : > { %v1244_v15 = vpop.f32.mrf.mxu1 }
 0x11f   : > { %v2301_v30 = vpop.f32.mrf.mxu0  ;;  %v1263_v21 = vadd.f32 %v1244_v15, %v1093_v42  ;;  %v1396_v10 = vadd.f32 %v2857_v56, %v1265_v1 }
 0x120   : > { %v2270_v35 = vpop.f32.mrf.mxu1 }
 0x121   : > { %v1771_v34 = vpop.f32.mrf.mxu0  ;;  %v1266_v11 = vadd.f32 %v2270_v35, %v1096_v57  ;;  %v1394_v15 = vadd.f32 %v2859_v2, %v1263_v21 }
 0x122   : > { %v1247_v29 = vpop.f32.mrf.mxu1 }
 0x123   : > { %v2302_v25 = vpop.f32.mrf.mxu0  ;;  %v1264_v12 = vadd.f32 %v1247_v29, %v1094_v58  ;;  %v1397_v24 = vadd.f32 %v2861_v9, %v1266_v11 }
 0x124   : > { %v2289_v19 = vpop.f32.mrf.mxu1 }
 0x125   : > { %v1634_v60 = vadd.f32 %v2289_v19, %v1392_v44  ;;  %v1774_v47 = vpop.f32.mrf.mxu0  ;;  %v1395_v2 = vadd.f32 %v2863_v18, %v1264_v12 }
 0x126   : > { %v1601_v43 = vpop.f32.mrf.mxu1 }
 0x127   : > { %v1804_v37 = vadd.f32 %v2301_v30, %v1634_v60  ;;  %v1632_v59 = vadd.f32 %v1601_v43, %v1390_v49  ;;  %v2305_v40 = vpop.f32.mrf.mxu0 }
 0x128   : > { %v2290_v53 = vpop.f32.mrf.mxu1 }
 0x129   : > { %v1819_v54 = vadd.f32 %v2874_v4, %v1804_v37  ;;  %v1802_v55 = vadd.f32 %v1771_v34, %v1632_v59  ;;  %v1635_v45 = vadd.f32 %v2290_v53, %v1393_v28  ;;  %v1787_v6 = vpop.f32.mrf.mxu0 }
 0x12a   : > { %v1604_v61 = vpop.f32.mrf.mxu1 }
 0x12b   : > { %vm1828_vm8 = vcmp.ge.f32.partialorder %v1819_v54, 0.0  ;;  %v1837_v41 = vmul.f32 %v2877_v52, %v1819_v54  ;;  %v1817_v62 = vadd.f32 %v2874_v4, %v1802_v55  ;;  %v1805_v0 = vadd.f32 %v2302_v25, %v1635_v45  ;;  %v2306_v39 = vpop.f32.mrf.mxu0 }
 0x12c   : > { %v1633_v17 = vadd.f32 %v1604_v61, %v1391_v46  ;;  %v2293_v20 = vpop.f32.mrf.mxu1 }
 0x12d   : > { %v1845_v22 = vsel %vm1828_vm8, %v1819_v54, %v1837_v41  ;;  %vm1826_vm9 = vcmp.ge.f32.partialorder %v1817_v62, 0.0  ;;  %v1835_v8 = vmul.f32 %v2877_v52, %v1817_v62  ;;  %v1820_v50 = vadd.f32 %v2874_v4, %v1805_v0  ;;  %v1790_v60 = vpop.f32.mrf.mxu0 }
 0x12e   : > { %v1853_v56 = vpack.c.bf16 %v1845_v22, %v1845_v22  ;;  %v1803_v5 = vadd.f32 %v1774_v47, %v1633_v17  ;;  %v1638_v27 = vadd.f32 %v2293_v20, %v1396_v10  ;;  %v1617_v7 = vpop.f32.mrf.mxu1 }
 0x12f   : > { %v1843_v30 = vsel %vm1826_vm9, %v1817_v62, %v1835_v8  ;;  %vm1829_vm10 = vcmp.ge.f32.partialorder %v1820_v50, 0.0  ;;  %v1838_v32 = vmul.f32 %v2877_v52, %v1820_v50  ;;  %v1636_v14 = vadd.f32 %v1617_v7, %v1394_v15 }
 0x130   : > { %1862 = vst.msk [vmem:[%s2890_s13 + $0x8] sm:$0xf] %vm1859_vm7, %v1853_v56  ;;  %v1851_v3 = vpack.c.bf16 %v1843_v30, %v1843_v30  ;;  %v1818_v13 = vadd.f32 %v2874_v4, %v1803_v5  ;;  %v1808_v35 = vadd.f32 %v2305_v40, %v1638_v27  ;;  %v2294_v63 = vpop.f32.mrf.mxu1 }
 0x131   : > { %v1846_v34 = vsel %vm1829_vm10, %v1820_v50, %v1838_v32  ;;  %v1806_v25 = vadd.f32 %v1787_v6, %v1636_v14  ;;  %v1639_v26 = vadd.f32 %v2294_v63, %v1397_v24 }
 0x132   : > { %1860 = vst.msk [vmem:[%s2890_s13] sm:$0xf] %vm1859_vm7, %v1851_v3  ;;  %v1854_v29 = vpack.c.bf16 %v1846_v34, %v1846_v34  ;;  %vm1827_vm11 = vcmp.ge.f32.partialorder %v1818_v13, 0.0  ;;  %v1836_v44 = vmul.f32 %v2877_v52, %v1818_v13  ;;  %v1823_v36 = vadd.f32 %v2874_v4, %v1808_v35  ;;  %v1620_v31 = vpop.f32.mrf.mxu1 }
 0x133   : > { %v1637_v23 = vadd.f32 %v1620_v31, %v1395_v2  ;;  %v1821_v19 = vadd.f32 %v2874_v4, %v1806_v25  ;;  %v1809_v49 = vadd.f32 %v2306_v39, %v1639_v26 }
 0x134   : > { %1863 = vst.msk [vmem:[%s2890_s13 + $0xc] sm:$0xf] %vm1859_vm7, %v1854_v29  ;;  %v1844_v9 = vsel %vm1827_vm11, %v1818_v13, %v1836_v44  ;;  %vm1832_vm12 = vcmp.ge.f32.partialorder %v1823_v36, 0.0  ;;  %v1841_v18 = vmul.f32 %v2877_v52, %v1823_v36 }
 0x135   : > { %v1852_v48 = vpack.c.bf16 %v1844_v9, %v1844_v9  ;;  %v1807_v38 = vadd.f32 %v1790_v60, %v1637_v23  ;;  %vm1830_vm13 = vcmp.ge.f32.partialorder %v1821_v19, 0.0  ;;  %v1839_v51 = vmul.f32 %v2877_v52, %v1821_v19 }
 0x136   : > { %v1849_v47 = vsel %vm1832_vm12, %v1823_v36, %v1841_v18  ;;  %v1824_v33 = vadd.f32 %v2874_v4, %v1809_v49 }
 0x137   : > { %1861 = vst.msk [vmem:[%s2890_s13 + $0x4] sm:$0xf] %vm1859_vm7, %v1852_v48  ;;  %v1857_v16 = vpack.c.bf16 %v1849_v47, %v1849_v47  ;;  %v1822_v43 = vadd.f32 %v2874_v4, %v1807_v38  ;;  %v1847_v28 = vsel %vm1830_vm13, %v1821_v19, %v1839_v51 }
 0x138   : > { %vm1833_vm14 = vcmp.ge.f32.partialorder %v1824_v33, 0.0  ;;  %v1842_v37 = vmul.f32 %v2877_v52, %v1824_v33  ;;  %v1855_v59 = vpack.c.bf16 %v1847_v28, %v1847_v28 }
 0x139   : > { %1866 = vst.msk [vmem:[%s2890_s13 + $0x18] sm:$0xf] %vm1859_vm7, %v1857_v16  ;;  %vm1831_vm15 = vcmp.ge.f32.partialorder %v1822_v43, 0.0  ;;  %v1840_v42 = vmul.f32 %v2877_v52, %v1822_v43 }
 0x13a   : > { %v1850_v1 = vsel %vm1833_vm14, %v1824_v33, %v1842_v37  ;;  %1864 = vst.msk [vmem:[%s2890_s13 + $0x10] sm:$0xf] %vm1859_vm7, %v1855_v59 }
 0x13b   : > { %v1858_v53 = vpack.c.bf16 %v1850_v1, %v1850_v1  ;;  %v1848_v54 = vsel %vm1831_vm15, %v1822_v43, %v1840_v42 }
 0x13c   : > { %v1856_v55 = vpack.c.bf16 %v1848_v54, %v1848_v54 }
 0x13d   : > { %1867 = vst.msk [vmem:[%s2890_s13 + $0x1c] sm:$0xf] %vm1859_vm7, %v1858_v53 }
 0x13e   : > { %1865 = vst.msk [vmem:[%s2890_s13 + $0x14] sm:$0xf] %vm1859_vm7, %v1856_v55 }
 0x13f PF: > { %s15_s17 = sadd.s32 1, %s2356_s17  }
 0x140   : > { %p12_p4 = scmp.ge.s32.totalorder %s15_s17, 4  }
 0x142   :  { %14 = sbr.rel (!%p12_p4) target bundleno = 2 (0x2), region = 76 }

// kernel: feedback_block_forward.15
= control target key start
LH: loop header
LB: loop body
LE: loop exit
PB: predicated region body
PF: predicated region fallthrough
CT: control target
= control target key end

     0   :  { %vm122_vm0 = vcmask 1043456   ;;  %vm97_vm1 = vcmask 64512   ;;  %s792_s2 = inlined_call_operand.vmem [shape: bf16[2,8,8], index: 2, kind: input, shape index: {}]   ;;  %s793_s1 = inlined_call_operand.vmem [shape: bf16[128,8], index: 1, kind: input, shape index: {}]   ;;  %s794_s0 = inlined_call_operand.vmem [shape: bf16[128,8], index: 0, kind: input, shape index: {}]   ;;  %s795_s3 = inlined_call_operand.vmem [shape: f32[1,8], index: 3, kind: input, shape index: {}]   ;;  %s796_s4 = inlined_call_operand.<no memory space> [shape: f32[1,1], index: 4, kind: input, shape index: {}]   ;;  %s797_s5 = inlined_call_operand.vmem [shape: f32[128,8], index: 5, kind: output, shape index: {}]  }
   0x1   :  { %v480_v0 = vld [vmem:[%s792_s2 + $0x4] sm:$0xf]  ;;  %v38_v1 = vld [vmem:[%s792_s2] sm:$0xf]  ;;  %v572_v6 = vld [vmem:[%s793_s1 + $0x8] sm:$0xff]   ;;  %v694_v25 = vstv %s796_s4 }
   0x2   :  { %568 = vmatprep.subr.msk.bf16.mxu0 %vm122_vm0, %v480_v0  ;;  %569 = vmatprep.subr.msk.bf16.mxu1 %vm122_vm0, %v38_v1  ;;  %v124_v2 = vsel %vm122_vm0, %v480_v0, 0  ;;  %v288_v3 = vsel %vm122_vm0, %v38_v1, 0  ;;  %v570_v4 = vld [vmem:[%s793_s1] sm:$0xff]   ;;  %v573_v7 = vld [vmem:[%s794_s0 + $0x8] sm:$0xff]   ;;  %v574_v8 = vld [vmem:[%s793_s1 + $0x10] sm:$0xff]  }
   0x3   :  { %v571_v5 = vld [vmem:[%s794_s0] sm:$0xff]   ;;  %533 = vmatpush3.bf16.msra.mxu0 %v124_v2  ;;  %551 = vmatpush3.bf16.msra.mxu1 %v288_v3  ;;  %v575_v9 = vld [vmem:[%s794_s0 + $0x10] sm:$0xff]   ;;  %v576_v10 = vld [vmem:[%s793_s1 + $0x18] sm:$0xff]  }
   0x4   :  { %534 = vmatprep.mubr.msk.bf16.mxu0 %vm97_vm1, %v570_v4  ;;  %552 = vmatprep.mubr.msk.bf16.mxu1 %vm97_vm1, %v571_v5  ;;  %v577_v11 = vld [vmem:[%s794_s0 + $0x18] sm:$0xff]   ;;  %v578_v12 = vld [vmem:[%s793_s1 + $0x20] sm:$0xff]   ;;  %v580_v14 = vld [vmem:[%s793_s1 + $0x28] sm:$0xff]  }
   0x5   :  { %v579_v13 = vld [vmem:[%s794_s0 + $0x20] sm:$0xff]   ;;  %v581_v15 = vld [vmem:[%s794_s0 + $0x28] sm:$0xff]   ;;  %v582_v16 = vld [vmem:[%s793_s1 + $0x30] sm:$0xff]  }
   0x6   :  { %535 = vmatmul.mubr.msk.bf16.vlgmr.msra.gmra.mxu0 %vm97_vm1, %v572_v6  ;;  %553 = vmatmul.mubr.msk.bf16.vlgmr.msra.gmra.mxu1 %vm97_vm1, %v573_v7  ;;  %v583_v17 = vld [vmem:[%s794_s0 + $0x30] sm:$0xff]   ;;  %v584_v18 = vld [vmem:[%s793_s1 + $0x38] sm:$0xff]   ;;  %v689_v22 = vld [vmem:[%s795_s3] ss:$0 sm:$0xff] }
   0x7   :  { %538 = vmatprep.mubr.msk.bf16.mxu0 %vm97_vm1, %v574_v8  ;;  %556 = vmatprep.mubr.msk.bf16.mxu1 %vm97_vm1, %v575_v9  ;;  %v585_v19 = vld [vmem:[%s794_s0 + $0x38] sm:$0xff]  }
   0xe   :  { %539 = vmatmul.mubr.msk.bf16.gmra.mxu0 %vm97_vm1, %v576_v10  ;;  %557 = vmatmul.mubr.msk.bf16.gmra.mxu1 %vm97_vm1, %v577_v11 }
   0xf   :  { %542 = vmatprep.mubr.msk.bf16.mxu0 %vm97_vm1, %v578_v12  ;;  %560 = vmatprep.mubr.msk.bf16.mxu1 %vm97_vm1, %v579_v13 }
  0x16   :  { %543 = vmatmul.mubr.msk.bf16.gmra.mxu0 %vm97_vm1, %v580_v14  ;;  %561 = vmatmul.mubr.msk.bf16.gmra.mxu1 %vm97_vm1, %v581_v15 }
  0x17   :  { %546 = vmatprep.mubr.msk.bf16.mxu0 %vm97_vm1, %v582_v16  ;;  %564 = vmatprep.mubr.msk.bf16.mxu1 %vm97_vm1, %v583_v17 }
  0x1e   :  { %547 = vmatmul.mubr.msk.bf16.gmra.mxu0 %vm97_vm1, %v584_v18  ;;  %565 = vmatmul.mubr.msk.bf16.gmra.mxu1 %vm97_vm1, %v585_v19 }
  0xc6   :  { %v536_v20 = vpop.f32.mrf.mxu0  ;;  %v554_v21 = vpop.f32.mrf.mxu1 }
  0xc7   :  { %v333_v23 = vadd.f32 %v554_v21, %v536_v20 }
  0xc8   :  { %v160_v24 = vpop.f32.mrf.mxu0  ;;  %v324_v26 = vpop.f32.mrf.mxu1 }
  0xc9   :  { %v396_v27 = vadd.f32 %v689_v22, %v333_v23  ;;  %v325_v28 = vadd.f32 %v324_v26, %v160_v24 }
  0xca   :  { %v537_v29 = vpop.f32.mrf.mxu0  ;;  %v555_v30 = vpop.f32.mrf.mxu1 }
  0xcb   :  { %vm413_vm2 = vcmp.ge.f32.partialorder %v396_v27, 0.0  ;;  %v430_v31 = vmul.f32 %v694_v25, %v396_v27  ;;  %v394_v32 = vadd.f32 %v689_v22, %v325_v28  ;;  %v336_v33 = vadd.f32 %v555_v30, %v537_v29 }
  0xcc   :  { %v163_v34 = vpop.f32.mrf.mxu0  ;;  %v327_v35 = vpop.f32.mrf.mxu1 }
  0xcd   :  { %v446_v36 = vsel %vm413_vm2, %v396_v27, %v430_v31  ;;  %vm411_vm3 = vcmp.ge.f32.partialorder %v394_v32, 0.0  ;;  %v428_v37 = vmul.f32 %v694_v25, %v394_v32  ;;  %v397_v38 = vadd.f32 %v689_v22, %v336_v33 }
  0xce   :  { %v540_v39 = vpop.f32.mrf.mxu0  ;;  %462 = vst.msk [vmem:[%s797_s5 + $0x10] sm:$0xff] %vm97_vm1, %v446_v36  ;;  %v328_v40 = vadd.f32 %v327_v35, %v163_v34  ;;  %v558_v41 = vpop.f32.mrf.mxu1 }
  0xcf   :  { %v444_v42 = vsel %vm411_vm3, %v394_v32, %v428_v37  ;;  %vm414_vm4 = vcmp.ge.f32.partialorder %v397_v38, 0.0  ;;  %v431_v43 = vmul.f32 %v694_v25, %v397_v38  ;;  %v349_v44 = vadd.f32 %v558_v41, %v540_v39 }
  0xd0   :  { %v176_v45 = vpop.f32.mrf.mxu0  ;;  %460 = vst.msk [vmem:[%s797_s5] sm:$0xff] %vm97_vm1, %v444_v42  ;;  %v395_v46 = vadd.f32 %v689_v22, %v328_v40  ;;  %v340_v47 = vpop.f32.mrf.mxu1 }
  0xd1   :  { %v447_v48 = vsel %vm414_vm4, %v397_v38, %v431_v43  ;;  %v400_v49 = vadd.f32 %v689_v22, %v349_v44  ;;  %v341_v50 = vadd.f32 %v340_v47, %v176_v45 }
  0xd2   :  { %v541_v51 = vpop.f32.mrf.mxu0  ;;  %463 = vst.msk [vmem:[%s797_s5 + $0x18] sm:$0xff] %vm97_vm1, %v447_v48  ;;  %vm412_vm5 = vcmp.ge.f32.partialorder %v395_v46, 0.0  ;;  %v429_v52 = vmul.f32 %v694_v25, %v395_v46  ;;  %v559_v53 = vpop.f32.mrf.mxu1 }
  0xd3   :  { %vm417_vm6 = vcmp.ge.f32.partialorder %v400_v49, 0.0  ;;  %v434_v54 = vmul.f32 %v694_v25, %v400_v49  ;;  %v398_v55 = vadd.f32 %v689_v22, %v341_v50  ;;  %v352_v56 = vadd.f32 %v559_v53, %v541_v51 }
  0xd4   :  { %v179_v57 = vpop.f32.mrf.mxu0  ;;  %v445_v58 = vsel %vm412_vm5, %v395_v46, %v429_v52  ;;  %v343_v59 = vpop.f32.mrf.mxu1 }
  0xd5   :  { %461 = vst.msk [vmem:[%s797_s5 + $0x8] sm:$0xff] %vm97_vm1, %v445_v58  ;;  %v450_v60 = vsel %vm417_vm6, %v400_v49, %v434_v54  ;;  %vm415_vm7 = vcmp.ge.f32.partialorder %v398_v55, 0.0  ;;  %v432_v61 = vmul.f32 %v694_v25, %v398_v55  ;;  %v401_v62 = vadd.f32 %v689_v22, %v352_v56 }
  0xd6   :  { %v544_v63 = vpop.f32.mrf.mxu0  ;;  %466 = vst.msk [vmem:[%s797_s5 + $0x30] sm:$0xff] %vm97_vm1, %v450_v60  ;;  %v344_v0 = vadd.f32 %v343_v59, %v179_v57  ;;  %v562_v1 = vpop.f32.mrf.mxu1 }
  0xd7   :  { %v448_v2 = vsel %vm415_vm7, %v398_v55, %v432_v61  ;;  %vm418_vm8 = vcmp.ge.f32.partialorder %v401_v62, 0.0  ;;  %v435_v3 = vmul.f32 %v694_v25, %v401_v62  ;;  %v365_v4 = vadd.f32 %v562_v1, %v544_v63 }
  0xd8   :  { %v192_v5 = vpop.f32.mrf.mxu0  ;;  %464 = vst.msk [vmem:[%s797_s5 + $0x20] sm:$0xff] %vm97_vm1, %v448_v2  ;;  %v399_v6 = vadd.f32 %v689_v22, %v344_v0  ;;  %v356_v7 = vpop.f32.mrf.mxu1 }
  0xd9   :  { %v451_v8 = vsel %vm418_vm8, %v401_v62, %v435_v3  ;;  %v404_v9 = vadd.f32 %v689_v22, %v365_v4  ;;  %v357_v10 = vadd.f32 %v356_v7, %v192_v5 }
  0xda   :  { %v545_v11 = vpop.f32.mrf.mxu0  ;;  %467 = vst.msk [vmem:[%s797_s5 + $0x38] sm:$0xff] %vm97_vm1, %v451_v8  ;;  %vm416_vm9 = vcmp.ge.f32.partialorder %v399_v6, 0.0  ;;  %v433_v12 = vmul.f32 %v694_v25, %v399_v6  ;;  %v563_v13 = vpop.f32.mrf.mxu1 }
  0xdb   :  { %vm421_vm10 = vcmp.ge.f32.partialorder %v404_v9, 0.0  ;;  %v438_v14 = vmul.f32 %v694_v25, %v404_v9  ;;  %v402_v15 = vadd.f32 %v689_v22, %v357_v10  ;;  %v368_v16 = vadd.f32 %v563_v13, %v545_v11 }
  0xdc   :  { %v195_v17 = vpop.f32.mrf.mxu0  ;;  %v449_v18 = vsel %vm416_vm9, %v399_v6, %v433_v12  ;;  %v359_v19 = vpop.f32.mrf.mxu1 }
  0xdd   :  { %465 = vst.msk [vmem:[%s797_s5 + $0x28] sm:$0xff] %vm97_vm1, %v449_v18  ;;  %v454_v20 = vsel %vm421_vm10, %v404_v9, %v438_v14  ;;  %vm419_vm11 = vcmp.ge.f32.partialorder %v402_v15, 0.0  ;;  %v436_v21 = vmul.f32 %v694_v25, %v402_v15  ;;  %v405_v23 = vadd.f32 %v689_v22, %v368_v16 }
  0xde   :  { %v548_v24 = vpop.f32.mrf.mxu0  ;;  %470 = vst.msk [vmem:[%s797_s5 + $0x50] sm:$0xff] %vm97_vm1, %v454_v20  ;;  %v360_v26 = vadd.f32 %v359_v19, %v195_v17  ;;  %v566_v27 = vpop.f32.mrf.mxu1 }
  0xdf   :  { %v452_v28 = vsel %vm419_vm11, %v402_v15, %v436_v21  ;;  %vm422_vm12 = vcmp.ge.f32.partialorder %v405_v23, 0.0  ;;  %v439_v29 = vmul.f32 %v694_v25, %v405_v23  ;;  %v381_v30 = vadd.f32 %v566_v27, %v548_v24 }
  0xe0   :  { %v208_v31 = vpop.f32.mrf.mxu0  ;;  %468 = vst.msk [vmem:[%s797_s5 + $0x40] sm:$0xff] %vm97_vm1, %v452_v28  ;;  %v403_v32 = vadd.f32 %v689_v22, %v360_v26  ;;  %v372_v33 = vpop.f32.mrf.mxu1 }
  0xe1   :  { %v455_v34 = vsel %vm422_vm12, %v405_v23, %v439_v29  ;;  %v408_v35 = vadd.f32 %v689_v22, %v381_v30  ;;  %v373_v36 = vadd.f32 %v372_v33, %v208_v31 }
  0xe2   :  { %v549_v37 = vpop.f32.mrf.mxu0  ;;  %471 = vst.msk [vmem:[%s797_s5 + $0x58] sm:$0xff] %vm97_vm1, %v455_v34  ;;  %vm420_vm13 = vcmp.ge.f32.partialorder %v403_v32, 0.0  ;;  %v437_v38 = vmul.f32 %v694_v25, %v403_v32  ;;  %v567_v39 = vpop.f32.mrf.mxu1 }
  0xe3   :  { %vm425_vm14 = vcmp.ge.f32.partialorder %v408_v35, 0.0  ;;  %v442_v40 = vmul.f32 %v694_v25, %v408_v35  ;;  %v406_v41 = vadd.f32 %v689_v22, %v373_v36  ;;  %v384_v42 = vadd.f32 %v567_v39, %v549_v37 }
  0xe4   :  { %v211_v43 = vpop.f32.mrf.mxu0  ;;  %v453_v44 = vsel %vm420_vm13, %v403_v32, %v437_v38  ;;  %v375_v45 = vpop.f32.mrf.mxu1 }
  0xe5   :  { %469 = vst.msk [vmem:[%s797_s5 + $0x48] sm:$0xff] %vm97_vm1, %v453_v44  ;;  %v458_v46 = vsel %vm425_vm14, %v408_v35, %v442_v40  ;;  %vm423_vm15 = vcmp.ge.f32.partialorder %v406_v41, 0.0  ;;  %v440_v47 = vmul.f32 %v694_v25, %v406_v41  ;;  %v409_v48 = vadd.f32 %v689_v22, %v384_v42 }
  0xe6   :  { %474 = vst.msk [vmem:[%s797_s5 + $0x70] sm:$0xff] %vm97_vm1, %v458_v46  ;;  %v376_v49 = vadd.f32 %v375_v45, %v211_v43 }
  0xe7   :  { %v456_v50 = vsel %vm423_vm15, %v406_v41, %v440_v47  ;;  %vm426_vm0 = vcmp.ge.f32.partialorder %v409_v48, 0.0  ;;  %v443_v51 = vmul.f32 %v694_v25, %v409_v48 }
  0xe8   :  { %472 = vst.msk [vmem:[%s797_s5 + $0x60] sm:$0xff] %vm97_vm1, %v456_v50  ;;  %v407_v52 = vadd.f32 %v689_v22, %v376_v49 }
  0xe9   :  { %v459_v53 = vsel %vm426_vm0, %v409_v48, %v443_v51 }
  0xea   :  { %475 = vst.msk [vmem:[%s797_s5 + $0x78] sm:$0xff] %vm97_vm1, %v459_v53  ;;  %vm424_vm2 = vcmp.ge.f32.partialorder %v407_v52, 0.0  ;;  %v441_v54 = vmul.f32 %v694_v25, %v407_v52 }
  0xec   :  { %v457_v55 = vsel %vm424_vm2, %v407_v52, %v441_v54 }
  0xed   :  { %473 = vst.msk [vmem:[%s797_s5 + $0x68] sm:$0xff] %vm97_vm1, %v457_v55 }

// kernel: feedback_block_forward.13
= control target key start
LH: loop header
LB: loop body
LE: loop exit
PB: predicated region body
PF: predicated region fallthrough
CT: control target
= control target key end

     0   :  { %vm410_vm0 = vcmask 1043456   ;;  %vm313_vm1 = vcmask 64512   ;;  %vm1772_vm3 = vcmask 60416   ;;  %s3046_s2 = inlined_call_operand.vmem [shape: bf16[2,8,8], index: 2, kind: input, shape index: {}]   ;;  %s3047_s1 = inlined_call_operand.vmem [shape: bf16[512,8], index: 1, kind: input, shape index: {}]   ;;  %s3048_s0 = inlined_call_operand.vmem [shape: bf16[512,8], index: 0, kind: input, shape index: {}]   ;;  %s3049_s3 = inlined_call_operand.vmem [shape: f32[1,8], index: 3, kind: input, shape index: {}]   ;;  %s3050_s4 = inlined_call_operand.<no memory space> [shape: f32[1,1], index: 4, kind: input, shape index: {}]   ;;  %s3051_s5 = inlined_call_operand.vmem [shape: bf16[512,8], index: 5, kind: output, shape index: {}]  }
   0x1   :  { %v1841_v0 = vld [vmem:[%s3046_s2 + $0x4] sm:$0xf]  ;;  %v86_v1 = vld [vmem:[%s3046_s2] sm:$0xf]  ;;  %v2301_v6 = vld [vmem:[%s3047_s1 + $0x8] sm:$0xff]  }
   0x2   :  { %2297 = vmatprep.subr.msk.bf16.mxu0 %vm410_vm0, %v1841_v0  ;;  %2298 = vmatprep.subr.msk.bf16.mxu1 %vm410_vm0, %v86_v1  ;;  %v412_v2 = vsel %vm410_vm0, %v1841_v0, 0  ;;  %v960_v3 = vsel %vm410_vm0, %v86_v1, 0  ;;  %v2299_v4 = vld [vmem:[%s3047_s1] sm:$0xff]   ;;  %v2302_v7 = vld [vmem:[%s3048_s0 + $0x8] sm:$0xff]   ;;  %v2303_v8 = vld [vmem:[%s3047_s1 + $0x10] sm:$0xff]  }
   0x3   :  { %v2300_v5 = vld [vmem:[%s3048_s0] sm:$0xff]   ;;  %2166 = vmatpush3.bf16.msra.mxu0 %v412_v2  ;;  %2232 = vmatpush3.bf16.msra.mxu1 %v960_v3  ;;  %v2304_v9 = vld [vmem:[%s3048_s0 + $0x10] sm:$0xff]   ;;  %v2305_v10 = vld [vmem:[%s3047_s1 + $0x18] sm:$0xff]  }
   0x4   :  { %2167 = vmatprep.mubr.msk.bf16.mxu0 %vm313_vm1, %v2299_v4  ;;  %2233 = vmatprep.mubr.msk.bf16.mxu1 %vm313_vm1, %v2300_v5  ;;  %v2306_v11 = vld [vmem:[%s3048_s0 + $0x18] sm:$0xff]   ;;  %v2307_v12 = vld [vmem:[%s3047_s1 + $0x20] sm:$0xff]   ;;  %v2309_v14 = vld [vmem:[%s3047_s1 + $0x28] sm:$0xff]  }
   0x5   :  { %v2308_v13 = vld [vmem:[%s3048_s0 + $0x20] sm:$0xff]   ;;  %v2310_v15 = vld [vmem:[%s3048_s0 + $0x28] sm:$0xff]   ;;  %v2311_v16 = vld [vmem:[%s3047_s1 + $0x30] sm:$0xff]  }
   0x6   :  { %2168 = vmatmul.mubr.msk.bf16.vlgmr.msra.gmra.mxu0 %vm313_vm1, %v2301_v6  ;;  %2234 = vmatmul.mubr.msk.bf16.vlgmr.msra.gmra.mxu1 %vm313_vm1, %v2302_v7  ;;  %v2312_v17 = vld [vmem:[%s3048_s0 + $0x30] sm:$0xff]   ;;  %v2313_v18 = vld [vmem:[%s3047_s1 + $0x38] sm:$0xff]   ;;  %v2315_v20 = vld [vmem:[%s3047_s1 + $0x40] sm:$0xff]  }
   0x7   :  { %2171 = vmatprep.mubr.msk.bf16.mxu0 %vm313_vm1, %v2303_v8  ;;  %2237 = vmatprep.mubr.msk.bf16.mxu1 %vm313_vm1, %v2304_v9  ;;  %v2314_v19 = vld [vmem:[%s3048_s0 + $0x38] sm:$0xff]   ;;  %v2316_v21 = vld [vmem:[%s3048_s0 + $0x40] sm:$0xff]   ;;  %v2317_v22 = vld [vmem:[%s3047_s1 + $0x48] sm:$0xff]   ;;  %v2664_v9 = vstv %s3050_s4 }
   0x8   :  { %v2318_v23 = vld [vmem:[%s3048_s0 + $0x48] sm:$0xff]   ;;  %v2319_v24 = vld [vmem:[%s3047_s1 + $0x50] sm:$0xff]   ;;  %v2321_v26 = vld [vmem:[%s3047_s1 + $0x58] sm:$0xff]  }
   0x9   :  { %v2320_v25 = vld [vmem:[%s3048_s0 + $0x50] sm:$0xff]   ;;  %v2322_v27 = vld [vmem:[%s3048_s0 + $0x58] sm:$0xff]   ;;  %v2323_v28 = vld [vmem:[%s3047_s1 + $0x60] sm:$0xff]  }
   0xa   :  { %v2324_v29 = vld [vmem:[%s3048_s0 + $0x60] sm:$0xff]   ;;  %v2325_v30 = vld [vmem:[%s3047_s1 + $0x68] sm:$0xff]   ;;  %v2327_v32 = vld [vmem:[%s3047_s1 + $0x70] sm:$0xff]  }
   0xb   :  { %v2326_v31 = vld [vmem:[%s3048_s0 + $0x68] sm:$0xff]   ;;  %v2328_v33 = vld [vmem:[%s3048_s0 + $0x70] sm:$0xff]   ;;  %v2329_v34 = vld [vmem:[%s3047_s1 + $0x78] sm:$0xff]  }
   0xc   :  { %v2330_v35 = vld [vmem:[%s3048_s0 + $0x78] sm:$0xff]   ;;  %v2331_v36 = vld [vmem:[%s3047_s1 + $0x80] sm:$0xff]   ;;  %v2333_v38 = vld [vmem:[%s3047_s1 + $0x88] sm:$0xff]  }
   0xd   :  { %v2332_v37 = vld [vmem:[%s3048_s0 + $0x80] sm:$0xff]   ;;  %v2334_v39 = vld [vmem:[%s3048_s0 + $0x88] sm:$0xff]   ;;  %v2335_v40 = vld [vmem:[%s3047_s1 + $0x90] sm:$0xff]  }
   0xe   :  { %2172 = vmatmul.mubr.msk.bf16.gmra.mxu0 %vm313_vm1, %v2305_v10  ;;  %2238 = vmatmul.mubr.msk.bf16.gmra.mxu1 %vm313_vm1, %v2306_v11  ;;  %v2336_v41 = vld [vmem:[%s3048_s0 + $0x90] sm:$0xff]   ;;  %v2337_v42 = vld [vmem:[%s3047_s1 + $0x98] sm:$0xff]   ;;  %v2339_v44 = vld [vmem:[%s3047_s1 + $0xa0] sm:$0xff]  }
   0xf   :  { %2175 = vmatprep.mubr.msk.bf16.mxu0 %vm313_vm1, %v2307_v12  ;;  %2241 = vmatprep.mubr.msk.bf16.mxu1 %vm313_vm1, %v2308_v13  ;;  %v2338_v43 = vld [vmem:[%s3048_s0 + $0x98] sm:$0xff]   ;;  %v2340_v45 = vld [vmem:[%s3048_s0 + $0xa0] sm:$0xff]   ;;  %v2341_v46 = vld [vmem:[%s3047_s1 + $0xa8] sm:$0xff]  }
  0x10   :  { %v2342_v47 = vld [vmem:[%s3048_s0 + $0xa8] sm:$0xff]   ;;  %v2343_v48 = vld [vmem:[%s3047_s1 + $0xb0] sm:$0xff]   ;;  %v2345_v50 = vld [vmem:[%s3047_s1 + $0xb8] sm:$0xff]  }
  0x11   :  { %v2344_v49 = vld [vmem:[%s3048_s0 + $0xb0] sm:$0xff]   ;;  %v2346_v51 = vld [vmem:[%s3048_s0 + $0xb8] sm:$0xff]   ;;  %v2347_v52 = vld [vmem:[%s3047_s1 + $0xc0] sm:$0xff]  }
  0x12   :  { %v2348_v53 = vld [vmem:[%s3048_s0 + $0xc0] sm:$0xff]   ;;  %v2349_v54 = vld [vmem:[%s3047_s1 + $0xc8] sm:$0xff]   ;;  %v2351_v56 = vld [vmem:[%s3047_s1 + $0xd0] sm:$0xff]  }
  0x13   :  { %v2350_v55 = vld [vmem:[%s3048_s0 + $0xc8] sm:$0xff]   ;;  %v2352_v57 = vld [vmem:[%s3048_s0 + $0xd0] sm:$0xff]   ;;  %v2353_v58 = vld [vmem:[%s3047_s1 + $0xd8] sm:$0xff]  }
  0x14   :  { %v2354_v59 = vld [vmem:[%s3048_s0 + $0xd8] sm:$0xff]   ;;  %v2355_v60 = vld [vmem:[%s3047_s1 + $0xe0] sm:$0xff]   ;;  %v2357_v62 = vld [vmem:[%s3047_s1 + $0xe8] sm:$0xff]  }
  0x15   :  { %v2356_v61 = vld [vmem:[%s3048_s0 + $0xe0] sm:$0xff]   ;;  %v2358_v63 = vld [vmem:[%s3048_s0 + $0xe8] sm:$0xff]   ;;  %v2359_v0 = vld [vmem:[%s3047_s1 + $0xf0] sm:$0xff]  }
  0x16   :  { %2176 = vmatmul.mubr.msk.bf16.gmra.mxu0 %vm313_vm1, %v2309_v14  ;;  %2242 = vmatmul.mubr.msk.bf16.gmra.mxu1 %vm313_vm1, %v2310_v15  ;;  %v2360_v1 = vld [vmem:[%s3048_s0 + $0xf0] sm:$0xff]   ;;  %v2361_v2 = vld [vmem:[%s3047_s1 + $0xf8] sm:$0xff]   ;;  %v2659_v6 = vld [vmem:[%s3049_s3] ss:$0 sm:$0xff] }
  0x17   :  { %2179 = vmatprep.mubr.msk.bf16.mxu0 %vm313_vm1, %v2311_v16  ;;  %2245 = vmatprep.mubr.msk.bf16.mxu1 %vm313_vm1, %v2312_v17  ;;  %v2362_v3 = vld [vmem:[%s3048_s0 + $0xf8] sm:$0xff]  }
  0x1e   :  { %2180 = vmatmul.mubr.msk.bf16.gmra.mxu0 %vm313_vm1, %v2313_v18  ;;  %2246 = vmatmul.mubr.msk.bf16.gmra.mxu1 %vm313_vm1, %v2314_v19 }
  0x1f   :  { %2183 = vmatprep.mubr.msk.bf16.mxu0 %vm313_vm1, %v2315_v20  ;;  %2249 = vmatprep.mubr.msk.bf16.mxu1 %vm313_vm1, %v2316_v21 }
  0x26   :  { %2184 = vmatmul.mubr.msk.bf16.gmra.mxu0 %vm313_vm1, %v2317_v22  ;;  %2250 = vmatmul.mubr.msk.bf16.gmra.mxu1 %vm313_vm1, %v2318_v23 }
  0x27   :  { %2187 = vmatprep.mubr.msk.bf16.mxu0 %vm313_vm1, %v2319_v24  ;;  %2253 = vmatprep.mubr.msk.bf16.mxu1 %vm313_vm1, %v2320_v25 }
  0x2e   :  { %2188 = vmatmul.mubr.msk.bf16.gmra.mxu0 %vm313_vm1, %v2321_v26  ;;  %2254 = vmatmul.mubr.msk.bf16.gmra.mxu1 %vm313_vm1, %v2322_v27 }
  0x2f   :  { %2191 = vmatprep.mubr.msk.bf16.mxu0 %vm313_vm1, %v2323_v28  ;;  %2257 = vmatprep.mubr.msk.bf16.mxu1 %vm313_vm1, %v2324_v29 }
  0x36   :  { %2192 = vmatmul.mubr.msk.bf16.gmra.mxu0 %vm313_vm1, %v2325_v30  ;;  %2258 = vmatmul.mubr.msk.bf16.gmra.mxu1 %vm313_vm1, %v2326_v31 }
  0x37   :  { %2195 = vmatprep.mubr.msk.bf16.mxu0 %vm313_vm1, %v2327_v32  ;;  %2261 = vmatprep.mubr.msk.bf16.mxu1 %vm313_vm1, %v2328_v33 }
  0x3e   :  { %2196 = vmatmul.mubr.msk.bf16.gmra.mxu0 %vm313_vm1, %v2329_v34  ;;  %2262 = vmatmul.mubr.msk.bf16.gmra.mxu1 %vm313_vm1, %v2330_v35 }
  0x3f   :  { %2199 = vmatprep.mubr.msk.bf16.mxu0 %vm313_vm1, %v2331_v36  ;;  %2265 = vmatprep.mubr.msk.bf16.mxu1 %vm313_vm1, %v2332_v37 }
  0x46   :  { %2200 = vmatmul.mubr.msk.bf16.gmra.mxu0 %vm313_vm1, %v2333_v38  ;;  %2266 = vmatmul.mubr.msk.bf16.gmra.mxu1 %vm313_vm1, %v2334_v39 }
  0x47   :  { %2203 = vmatprep.mubr.msk.bf16.mxu0 %vm313_vm1, %v2335_v40  ;;  %2269 = vmatprep.mubr.msk.bf16.mxu1 %vm313_vm1, %v2336_v41 }
  0x4e   :  { %2204 = vmatmul.mubr.msk.bf16.gmra.mxu0 %vm313_vm1, %v2337_v42  ;;  %2270 = vmatmul.mubr.msk.bf16.gmra.mxu1 %vm313_vm1, %v2338_v43 }
  0x4f   :  { %2207 = vmatprep.mubr.msk.bf16.mxu0 %vm313_vm1, %v2339_v44  ;;  %2273 = vmatprep.mubr.msk.bf16.mxu1 %vm313_vm1, %v2340_v45 }
  0x56   :  { %2208 = vmatmul.mubr.msk.bf16.gmra.mxu0 %vm313_vm1, %v2341_v46  ;;  %2274 = vmatmul.mubr.msk.bf16.gmra.mxu1 %vm313_vm1, %v2342_v47 }
  0x57   :  { %2211 = vmatprep.mubr.msk.bf16.mxu0 %vm313_vm1, %v2343_v48  ;;  %2277 = vmatprep.mubr.msk.bf16.mxu1 %vm313_vm1, %v2344_v49 }
  0x5e   :  { %2212 = vmatmul.mubr.msk.bf16.gmra.mxu0 %vm313_vm1, %v2345_v50  ;;  %2278 = vmatmul.mubr.msk.bf16.gmra.mxu1 %vm313_vm1, %v2346_v51 }
  0x5f   :  { %2215 = vmatprep.mubr.msk.bf16.mxu0 %vm313_vm1, %v2347_v52  ;;  %2281 = vmatprep.mubr.msk.bf16.mxu1 %vm313_vm1, %v2348_v53 }
  0x66   :  { %2216 = vmatmul.mubr.msk.bf16.gmra.mxu0 %vm313_vm1, %v2349_v54  ;;  %2282 = vmatmul.mubr.msk.bf16.gmra.mxu1 %vm313_vm1, %v2350_v55 }
  0x67   :  { %2219 = vmatprep.mubr.msk.bf16.mxu0 %vm313_vm1, %v2351_v56  ;;  %2285 = vmatprep.mubr.msk.bf16.mxu1 %vm313_vm1, %v2352_v57 }
  0x6e   :  { %2220 = vmatmul.mubr.msk.bf16.gmra.mxu0 %vm313_vm1, %v2353_v58  ;;  %2286 = vmatmul.mubr.msk.bf16.gmra.mxu1 %vm313_vm1, %v2354_v59 }
  0x6f   :  { %2223 = vmatprep.mubr.msk.bf16.mxu0 %vm313_vm1, %v2355_v60  ;;  %2289 = vmatprep.mubr.msk.bf16.mxu1 %vm313_vm1, %v2356_v61 }
  0x76   :  { %2224 = vmatmul.mubr.msk.bf16.gmra.mxu0 %vm313_vm1, %v2357_v62  ;;  %2290 = vmatmul.mubr.msk.bf16.gmra.mxu1 %vm313_vm1, %v2358_v63 }
  0x77   :  { %2227 = vmatprep.mubr.msk.bf16.mxu0 %vm313_vm1, %v2359_v0  ;;  %2293 = vmatprep.mubr.msk.bf16.mxu1 %vm313_vm1, %v2360_v1 }
  0x7e   :  { %2228 = vmatmul.mubr.msk.bf16.gmra.mxu0 %vm313_vm1, %v2361_v2  ;;  %2294 = vmatmul.mubr.msk.bf16.gmra.mxu1 %vm313_vm1, %v2362_v3 }
  0xc6   :  { %v2169_v4 = vpop.f32.mrf.mxu0  ;;  %v2235_v5 = vpop.f32.mrf.mxu1 }
  0xc7   :  { %v1005_v7 = vadd.f32 %v2235_v5, %v2169_v4 }
  0xc8   :  { %v448_v8 = vpop.f32.mrf.mxu0  ;;  %v996_v10 = vpop.f32.mrf.mxu1 }
  0xc9   :  { %v1260_v11 = vadd.f32 %v2659_v6, %v1005_v7  ;;  %v997_v12 = vadd.f32 %v996_v10, %v448_v8 }
  0xca   :  { %v2170_v13 = vpop.f32.mrf.mxu0  ;;  %v2236_v14 = vpop.f32.mrf.mxu1 }
  0xcb   :  { %vm1325_vm2 = vcmp.ge.f32.partialorder %v1260_v11, 0.0  ;;  %v1390_v15 = vmul.f32 %v2664_v9, %v1260_v11  ;;  %v1258_v16 = vadd.f32 %v2659_v6, %v997_v12  ;;  %v1008_v17 = vadd.f32 %v2236_v14, %v2170_v13 }
  0xcc   :  { %v451_v18 = vpop.f32.mrf.mxu0  ;;  %v999_v19 = vpop.f32.mrf.mxu1 }
  0xcd   :  { %v1454_v20 = vsel %vm1325_vm2, %v1260_v11, %v1390_v15  ;;  %vm1323_vm4 = vcmp.ge.f32.partialorder %v1258_v16, 0.0  ;;  %v1388_v21 = vmul.f32 %v2664_v9, %v1258_v16  ;;  %v1261_v22 = vadd.f32 %v2659_v6, %v1008_v17 }
  0xce   :  { %v2173_v23 = vpop.f32.mrf.mxu0  ;;  %v2037_v24 = vpack.c.bf16 %v1454_v20, %v1454_v20  ;;  %v1000_v25 = vadd.f32 %v999_v19, %v451_v18  ;;  %v2239_v26 = vpop.f32.mrf.mxu1 }
  0xcf   :  { %v1452_v27 = vsel %vm1323_vm4, %v1258_v16, %v1388_v21  ;;  %vm1326_vm5 = vcmp.ge.f32.partialorder %v1261_v22, 0.0  ;;  %v1391_v28 = vmul.f32 %v2664_v9, %v1261_v22  ;;  %v1021_v29 = vadd.f32 %v2239_v26, %v2173_v23 }
  0xd0   :  { %v464_v30 = vpop.f32.mrf.mxu0  ;;  %1775 = vst.msk [vmem:[%s3051_s5 + $0x8] sm:$0xf] %vm1772_vm3, %v2037_v24  ;;  %v2035_v31 = vpack.c.bf16 %v1452_v27, %v1452_v27  ;;  %v1259_v32 = vadd.f32 %v2659_v6, %v1000_v25  ;;  %v1012_v33 = vpop.f32.mrf.mxu1 }
  0xd1   :  { %v1455_v34 = vsel %vm1326_vm5, %v1261_v22, %v1391_v28  ;;  %v1264_v35 = vadd.f32 %v2659_v6, %v1021_v29  ;;  %v1013_v36 = vadd.f32 %v1012_v33, %v464_v30 }
  0xd2   :  { %v2174_v37 = vpop.f32.mrf.mxu0  ;;  %1773 = vst.msk [vmem:[%s3051_s5] sm:$0xf] %vm1772_vm3, %v2035_v31  ;;  %v2038_v38 = vpack.c.bf16 %v1455_v34, %v1455_v34  ;;  %vm1324_vm6 = vcmp.ge.f32.partialorder %v1259_v32, 0.0  ;;  %v1389_v39 = vmul.f32 %v2664_v9, %v1259_v32  ;;  %v2240_v40 = vpop.f32.mrf.mxu1 }
  0xd3   :  { %vm1329_vm7 = vcmp.ge.f32.partialorder %v1264_v35, 0.0  ;;  %v1394_v41 = vmul.f32 %v2664_v9, %v1264_v35  ;;  %v1262_v42 = vadd.f32 %v2659_v6, %v1013_v36  ;;  %v1024_v43 = vadd.f32 %v2240_v40, %v2174_v37 }
  0xd4   :  { %v467_v44 = vpop.f32.mrf.mxu0  ;;  %1776 = vst.msk [vmem:[%s3051_s5 + $0xc] sm:$0xf] %vm1772_vm3, %v2038_v38  ;;  %v1453_v45 = vsel %vm1324_vm6, %v1259_v32, %v1389_v39  ;;  %v1015_v46 = vpop.f32.mrf.mxu1 }
  0xd5   :  { %v2036_v47 = vpack.c.bf16 %v1453_v45, %v1453_v45  ;;  %v1458_v48 = vsel %vm1329_vm7, %v1264_v35, %v1394_v41  ;;  %vm1327_vm8 = vcmp.ge.f32.partialorder %v1262_v42, 0.0  ;;  %v1392_v49 = vmul.f32 %v2664_v9, %v1262_v42 }
  0xd6   :  { %v2177_v50 = vpop.f32.mrf.mxu0  ;;  %v2041_v51 = vpack.c.bf16 %v1458_v48, %v1458_v48  ;;  %v1265_v52 = vadd.f32 %v2659_v6, %v1024_v43  ;;  %v1016_v53 = vadd.f32 %v1015_v46, %v467_v44  ;;  %v2243_v54 = vpop.f32.mrf.mxu1 }
  0xd7   :  { %1774 = vst.msk [vmem:[%s3051_s5 + $0x4] sm:$0xf] %vm1772_vm3, %v2036_v47  ;;  %v1456_v55 = vsel %vm1327_vm8, %v1262_v42, %v1392_v49  ;;  %v1037_v56 = vadd.f32 %v2243_v54, %v2177_v50 }
  0xd8   :  { %v480_v57 = vpop.f32.mrf.mxu0  ;;  %1779 = vst.msk [vmem:[%s3051_s5 + $0x18] sm:$0xf] %vm1772_vm3, %v2041_v51  ;;  %v2039_v58 = vpack.c.bf16 %v1456_v55, %v1456_v55  ;;  %vm1330_vm9 = vcmp.ge.f32.partialorder %v1265_v52, 0.0  ;;  %v1395_v59 = vmul.f32 %v2664_v9, %v1265_v52  ;;  %v1263_v60 = vadd.f32 %v2659_v6, %v1016_v53  ;;  %v1028_v61 = vpop.f32.mrf.mxu1 }
  0xd9   :  { %v1268_v62 = vadd.f32 %v2659_v6, %v1037_v56  ;;  %v1029_v63 = vadd.f32 %v1028_v61, %v480_v57 }
  0xda   :  { %v2178_v0 = vpop.f32.mrf.mxu0  ;;  %1777 = vst.msk [vmem:[%s3051_s5 + $0x10] sm:$0xf] %vm1772_vm3, %v2039_v58  ;;  %v1459_v1 = vsel %vm1330_vm9, %v1265_v52, %v1395_v59  ;;  %vm1328_vm10 = vcmp.ge.f32.partialorder %v1263_v60, 0.0  ;;  %v1393_v2 = vmul.f32 %v2664_v9, %v1263_v60  ;;  %v2244_v3 = vpop.f32.mrf.mxu1 }
  0xdb   :  { %v2042_v4 = vpack.c.bf16 %v1459_v1, %v1459_v1  ;;  %vm1333_vm11 = vcmp.ge.f32.partialorder %v1268_v62, 0.0  ;;  %v1398_v5 = vmul.f32 %v2664_v9, %v1268_v62  ;;  %v1266_v7 = vadd.f32 %v2659_v6, %v1029_v63 }
  0xdc   :  { %v483_v8 = vpop.f32.mrf.mxu0  ;;  %v1457_v10 = vsel %vm1328_vm10, %v1263_v60, %v1393_v2  ;;  %v1040_v11 = vadd.f32 %v2244_v3, %v2178_v0  ;;  %v1031_v12 = vpop.f32.mrf.mxu1 }
  0xdd   :  { %1780 = vst.msk [vmem:[%s3051_s5 + $0x1c] sm:$0xf] %vm1772_vm3, %v2042_v4  ;;  %v2040_v13 = vpack.c.bf16 %v1457_v10, %v1457_v10  ;;  %v1462_v14 = vsel %vm1333_vm11, %v1268_v62, %v1398_v5  ;;  %vm1331_vm12 = vcmp.ge.f32.partialorder %v1266_v7, 0.0  ;;  %v1396_v15 = vmul.f32 %v2664_v9, %v1266_v7 }
  0xde   :  { %v2181_v16 = vpop.f32.mrf.mxu0  ;;  %v2045_v17 = vpack.c.bf16 %v1462_v14, %v1462_v14  ;;  %v1269_v18 = vadd.f32 %v2659_v6, %v1040_v11  ;;  %v1032_v19 = vadd.f32 %v1031_v12, %v483_v8  ;;  %v2247_v20 = vpop.f32.mrf.mxu1 }
  0xdf   :  { %1778 = vst.msk [vmem:[%s3051_s5 + $0x14] sm:$0xf] %vm1772_vm3, %v2040_v13  ;;  %v1460_v21 = vsel %vm1331_vm12, %v1266_v7, %v1396_v15  ;;  %v1053_v22 = vadd.f32 %v2247_v20, %v2181_v16 }
  0xe0   :  { %v496_v23 = vpop.f32.mrf.mxu0  ;;  %1783 = vst.msk [vmem:[%s3051_s5 + $0x28] sm:$0xf] %vm1772_vm3, %v2045_v17  ;;  %v2043_v24 = vpack.c.bf16 %v1460_v21, %v1460_v21  ;;  %vm1334_vm13 = vcmp.ge.f32.partialorder %v1269_v18, 0.0  ;;  %v1399_v25 = vmul.f32 %v2664_v9, %v1269_v18  ;;  %v1267_v26 = vadd.f32 %v2659_v6, %v1032_v19  ;;  %v1044_v27 = vpop.f32.mrf.mxu1 }
  0xe1   :  { %v1272_v28 = vadd.f32 %v2659_v6, %v1053_v22  ;;  %v1045_v29 = vadd.f32 %v1044_v27, %v496_v23 }
  0xe2   :  { %v2182_v30 = vpop.f32.mrf.mxu0  ;;  %1781 = vst.msk [vmem:[%s3051_s5 + $0x20] sm:$0xf] %vm1772_vm3, %v2043_v24  ;;  %v1463_v31 = vsel %vm1334_vm13, %v1269_v18, %v1399_v25  ;;  %vm1332_vm14 = vcmp.ge.f32.partialorder %v1267_v26, 0.0  ;;  %v1397_v32 = vmul.f32 %v2664_v9, %v1267_v26  ;;  %v2248_v33 = vpop.f32.mrf.mxu1 }
  0xe3   :  { %v2046_v34 = vpack.c.bf16 %v1463_v31, %v1463_v31  ;;  %vm1337_vm15 = vcmp.ge.f32.partialorder %v1272_v28, 0.0  ;;  %v1402_v35 = vmul.f32 %v2664_v9, %v1272_v28  ;;  %v1270_v36 = vadd.f32 %v2659_v6, %v1045_v29 }
  0xe4   :  { %v499_v37 = vpop.f32.mrf.mxu0  ;;  %v1461_v38 = vsel %vm1332_vm14, %v1267_v26, %v1397_v32  ;;  %v1056_v39 = vadd.f32 %v2248_v33, %v2182_v30  ;;  %v1047_v40 = vpop.f32.mrf.mxu1 }
  0xe5   :  { %1784 = vst.msk [vmem:[%s3051_s5 + $0x2c] sm:$0xf] %vm1772_vm3, %v2046_v34  ;;  %v2044_v41 = vpack.c.bf16 %v1461_v38, %v1461_v38  ;;  %v1466_v42 = vsel %vm1337_vm15, %v1272_v28, %v1402_v35  ;;  %vm1335_vm0 = vcmp.ge.f32.partialorder %v1270_v36, 0.0  ;;  %v1400_v43 = vmul.f32 %v2664_v9, %v1270_v36 }
  0xe6   :  { %v2185_v44 = vpop.f32.mrf.mxu0  ;;  %v2049_v45 = vpack.c.bf16 %v1466_v42, %v1466_v42  ;;  %v1273_v46 = vadd.f32 %v2659_v6, %v1056_v39  ;;  %v1048_v47 = vadd.f32 %v1047_v40, %v499_v37  ;;  %v2251_v48 = vpop.f32.mrf.mxu1 }
  0xe7   :  { %1782 = vst.msk [vmem:[%s3051_s5 + $0x24] sm:$0xf] %vm1772_vm3, %v2044_v41  ;;  %v1464_v49 = vsel %vm1335_vm0, %v1270_v36, %v1400_v43  ;;  %v1069_v50 = vadd.f32 %v2251_v48, %v2185_v44 }
  0xe8   :  { %v512_v51 = vpop.f32.mrf.mxu0  ;;  %1787 = vst.msk [vmem:[%s3051_s5 + $0x38] sm:$0xf] %vm1772_vm3, %v2049_v45  ;;  %v2047_v52 = vpack.c.bf16 %v1464_v49, %v1464_v49  ;;  %vm1338_vm1 = vcmp.ge.f32.partialorder %v1273_v46, 0.0  ;;  %v1403_v53 = vmul.f32 %v2664_v9, %v1273_v46  ;;  %v1271_v54 = vadd.f32 %v2659_v6, %v1048_v47  ;;  %v1060_v55 = vpop.f32.mrf.mxu1 }
  0xe9   :  { %v1276_v56 = vadd.f32 %v2659_v6, %v1069_v50  ;;  %v1061_v57 = vadd.f32 %v1060_v55, %v512_v51 }
  0xea   :  { %v2186_v58 = vpop.f32.mrf.mxu0  ;;  %1785 = vst.msk [vmem:[%s3051_s5 + $0x30] sm:$0xf] %vm1772_vm3, %v2047_v52  ;;  %v1467_v59 = vsel %vm1338_vm1, %v1273_v46, %v1403_v53  ;;  %vm1336_vm2 = vcmp.ge.f32.partialorder %v1271_v54, 0.0  ;;  %v1401_v60 = vmul.f32 %v2664_v9, %v1271_v54  ;;  %v2252_v61 = vpop.f32.mrf.mxu1 }
  0xeb   :  { %v2050_v62 = vpack.c.bf16 %v1467_v59, %v1467_v59  ;;  %vm1341_vm4 = vcmp.ge.f32.partialorder %v1276_v56, 0.0  ;;  %v1406_v63 = vmul.f32 %v2664_v9, %v1276_v56  ;;  %v1274_v0 = vadd.f32 %v2659_v6, %v1061_v57 }
  0xec   :  { %v515_v1 = vpop.f32.mrf.mxu0  ;;  %v1465_v2 = vsel %vm1336_vm2, %v1271_v54, %v1401_v60  ;;  %v1072_v3 = vadd.f32 %v2252_v61, %v2186_v58  ;;  %v1063_v4 = vpop.f32.mrf.mxu1 }
  0xed   :  { %1788 = vst.msk [vmem:[%s3051_s5 + $0x3c] sm:$0xf] %vm1772_vm3, %v2050_v62  ;;  %v2048_v5 = vpack.c.bf16 %v1465_v2, %v1465_v2  ;;  %v1470_v7 = vsel %vm1341_vm4, %v1276_v56, %v1406_v63  ;;  %vm1339_vm5 = vcmp.ge.f32.partialorder %v1274_v0, 0.0  ;;  %v1404_v8 = vmul.f32 %v2664_v9, %v1274_v0 }
  0xee   :  { %v2189_v10 = vpop.f32.mrf.mxu0  ;;  %v2053_v11 = vpack.c.bf16 %v1470_v7, %v1470_v7  ;;  %v1277_v12 = vadd.f32 %v2659_v6, %v1072_v3  ;;  %v1064_v13 = vadd.f32 %v1063_v4, %v515_v1  ;;  %v2255_v14 = vpop.f32.mrf.mxu1 }
  0xef   :  { %1786 = vst.msk [vmem:[%s3051_s5 + $0x34] sm:$0xf] %vm1772_vm3, %v2048_v5  ;;  %v1468_v15 = vsel %vm1339_vm5, %v1274_v0, %v1404_v8  ;;  %v1085_v16 = vadd.f32 %v2255_v14, %v2189_v10 }
  0xf0   :  { %v528_v17 = vpop.f32.mrf.mxu0  ;;  %1791 = vst.msk [vmem:[%s3051_s5 + $0x48] sm:$0xf] %vm1772_vm3, %v2053_v11  ;;  %v2051_v18 = vpack.c.bf16 %v1468_v15, %v1468_v15  ;;  %vm1342_vm6 = vcmp.ge.f32.partialorder %v1277_v12, 0.0  ;;  %v1407_v19 = vmul.f32 %v2664_v9, %v1277_v12  ;;  %v1275_v20 = vadd.f32 %v2659_v6, %v1064_v13  ;;  %v1076_v21 = vpop.f32.mrf.mxu1 }
  0xf1   :  { %v1280_v22 = vadd.f32 %v2659_v6, %v1085_v16  ;;  %v1077_v23 = vadd.f32 %v1076_v21, %v528_v17 }
  0xf2   :  { %v2190_v24 = vpop.f32.mrf.mxu0  ;;  %1789 = vst.msk [vmem:[%s3051_s5 + $0x40] sm:$0xf] %vm1772_vm3, %v2051_v18  ;;  %v1471_v25 = vsel %vm1342_vm6, %v1277_v12, %v1407_v19  ;;  %vm1340_vm7 = vcmp.ge.f32.partialorder %v1275_v20, 0.0  ;;  %v1405_v26 = vmul.f32 %v2664_v9, %v1275_v20  ;;  %v2256_v27 = vpop.f32.mrf.mxu1 }
  0xf3   :  { %v2054_v28 = vpack.c.bf16 %v1471_v25, %v1471_v25  ;;  %vm1345_vm8 = vcmp.ge.f32.partialorder %v1280_v22, 0.0  ;;  %v1410_v29 = vmul.f32 %v2664_v9, %v1280_v22  ;;  %v1278_v30 = vadd.f32 %v2659_v6, %v1077_v23 }
  0xf4   :  { %v531_v31 = vpop.f32.mrf.mxu0  ;;  %v1469_v32 = vsel %vm1340_vm7, %v1275_v20, %v1405_v26  ;;  %v1088_v33 = vadd.f32 %v2256_v27, %v2190_v24  ;;  %v1079_v34 = vpop.f32.mrf.mxu1 }
  0xf5   :  { %1792 = vst.msk [vmem:[%s3051_s5 + $0x4c] sm:$0xf] %vm1772_vm3, %v2054_v28  ;;  %v2052_v35 = vpack.c.bf16 %v1469_v32, %v1469_v32  ;;  %v1474_v36 = vsel %vm1345_vm8, %v1280_v22, %v1410_v29  ;;  %vm1343_vm9 = vcmp.ge.f32.partialorder %v1278_v30, 0.0  ;;  %v1408_v37 = vmul.f32 %v2664_v9, %v1278_v30 }
  0xf6   :  { %v2193_v38 = vpop.f32.mrf.mxu0  ;;  %v2057_v39 = vpack.c.bf16 %v1474_v36, %v1474_v36  ;;  %v1281_v40 = vadd.f32 %v2659_v6, %v1088_v33  ;;  %v1080_v41 = vadd.f32 %v1079_v34, %v531_v31  ;;  %v2259_v42 = vpop.f32.mrf.mxu1 }
  0xf7   :  { %1790 = vst.msk [vmem:[%s3051_s5 + $0x44] sm:$0xf] %vm1772_vm3, %v2052_v35  ;;  %v1472_v43 = vsel %vm1343_vm9, %v1278_v30, %v1408_v37  ;;  %v1101_v44 = vadd.f32 %v2259_v42, %v2193_v38 }
  0xf8   :  { %v544_v45 = vpop.f32.mrf.mxu0  ;;  %1795 = vst.msk [vmem:[%s3051_s5 + $0x58] sm:$0xf] %vm1772_vm3, %v2057_v39  ;;  %v2055_v46 = vpack.c.bf16 %v1472_v43, %v1472_v43  ;;  %vm1346_vm10 = vcmp.ge.f32.partialorder %v1281_v40, 0.0  ;;  %v1411_v47 = vmul.f32 %v2664_v9, %v1281_v40  ;;  %v1279_v48 = vadd.f32 %v2659_v6, %v1080_v41  ;;  %v1092_v49 = vpop.f32.mrf.mxu1 }
  0xf9   :  { %v1284_v50 = vadd.f32 %v2659_v6, %v1101_v44  ;;  %v1093_v51 = vadd.f32 %v1092_v49, %v544_v45 }
  0xfa   :  { %v2194_v52 = vpop.f32.mrf.mxu0  ;;  %1793 = vst.msk [vmem:[%s3051_s5 + $0x50] sm:$0xf] %vm1772_vm3, %v2055_v46  ;;  %v1475_v53 = vsel %vm1346_vm10, %v1281_v40, %v1411_v47  ;;  %vm1344_vm11 = vcmp.ge.f32.partialorder %v1279_v48, 0.0  ;;  %v1409_v54 = vmul.f32 %v2664_v9, %v1279_v48  ;;  %v2260_v55 = vpop.f32.mrf.mxu1 }
  0xfb   :  { %v2058_v56 = vpack.c.bf16 %v1475_v53, %v1475_v53  ;;  %vm1349_vm12 = vcmp.ge.f32.partialorder %v1284_v50, 0.0  ;;  %v1414_v57 = vmul.f32 %v2664_v9, %v1284_v50  ;;  %v1282_v58 = vadd.f32 %v2659_v6, %v1093_v51 }
  0xfc   :  { %v547_v59 = vpop.f32.mrf.mxu0  ;;  %v1473_v60 = vsel %vm1344_vm11, %v1279_v48, %v1409_v54  ;;  %v1104_v61 = vadd.f32 %v2260_v55, %v2194_v52  ;;  %v1095_v62 = vpop.f32.mrf.mxu1 }
  0xfd   :  { %1796 = vst.msk [vmem:[%s3051_s5 + $0x5c] sm:$0xf] %vm1772_vm3, %v2058_v56  ;;  %v2056_v63 = vpack.c.bf16 %v1473_v60, %v1473_v60  ;;  %v1478_v0 = vsel %vm1349_vm12, %v1284_v50, %v1414_v57  ;;  %vm1347_vm13 = vcmp.ge.f32.partialorder %v1282_v58, 0.0  ;;  %v1412_v1 = vmul.f32 %v2664_v9, %v1282_v58 }
  0xfe   :  { %v2197_v2 = vpop.f32.mrf.mxu0  ;;  %v2061_v3 = vpack.c.bf16 %v1478_v0, %v1478_v0  ;;  %v1285_v4 = vadd.f32 %v2659_v6, %v1104_v61  ;;  %v1096_v5 = vadd.f32 %v1095_v62, %v547_v59  ;;  %v2263_v7 = vpop.f32.mrf.mxu1 }
  0xff   :  { %1794 = vst.msk [vmem:[%s3051_s5 + $0x54] sm:$0xf] %vm1772_vm3, %v2056_v63  ;;  %v1476_v8 = vsel %vm1347_vm13, %v1282_v58, %v1412_v1  ;;  %v1117_v10 = vadd.f32 %v2263_v7, %v2197_v2 }
 0x100   :  { %v560_v11 = vpop.f32.mrf.mxu0  ;;  %1799 = vst.msk [vmem:[%s3051_s5 + $0x68] sm:$0xf] %vm1772_vm3, %v2061_v3  ;;  %v2059_v12 = vpack.c.bf16 %v1476_v8, %v1476_v8  ;;  %vm1350_vm14 = vcmp.ge.f32.partialorder %v1285_v4, 0.0  ;;  %v1415_v13 = vmul.f32 %v2664_v9, %v1285_v4  ;;  %v1283_v14 = vadd.f32 %v2659_v6, %v1096_v5  ;;  %v1108_v15 = vpop.f32.mrf.mxu1 }
 0x101   :  { %v1288_v16 = vadd.f32 %v2659_v6, %v1117_v10  ;;  %v1109_v17 = vadd.f32 %v1108_v15, %v560_v11 }
 0x102   :  { %v2198_v18 = vpop.f32.mrf.mxu0  ;;  %1797 = vst.msk [vmem:[%s3051_s5 + $0x60] sm:$0xf] %vm1772_vm3, %v2059_v12  ;;  %v1479_v19 = vsel %vm1350_vm14, %v1285_v4, %v1415_v13  ;;  %vm1348_vm15 = vcmp.ge.f32.partialorder %v1283_v14, 0.0  ;;  %v1413_v20 = vmul.f32 %v2664_v9, %v1283_v14  ;;  %v2264_v21 = vpop.f32.mrf.mxu1 }
 0x103   :  { %v2062_v22 = vpack.c.bf16 %v1479_v19, %v1479_v19  ;;  %vm1353_vm0 = vcmp.ge.f32.partialorder %v1288_v16, 0.0  ;;  %v1418_v23 = vmul.f32 %v2664_v9, %v1288_v16  ;;  %v1286_v24 = vadd.f32 %v2659_v6, %v1109_v17 }
 0x104   :  { %v563_v25 = vpop.f32.mrf.mxu0  ;;  %v1477_v26 = vsel %vm1348_vm15, %v1283_v14, %v1413_v20  ;;  %v1120_v27 = vadd.f32 %v2264_v21, %v2198_v18  ;;  %v1111_v28 = vpop.f32.mrf.mxu1 }
 0x105   :  { %1800 = vst.msk [vmem:[%s3051_s5 + $0x6c] sm:$0xf] %vm1772_vm3, %v2062_v22  ;;  %v2060_v29 = vpack.c.bf16 %v1477_v26, %v1477_v26  ;;  %v1482_v30 = vsel %vm1353_vm0, %v1288_v16, %v1418_v23  ;;  %vm1351_vm1 = vcmp.ge.f32.partialorder %v1286_v24, 0.0  ;;  %v1416_v31 = vmul.f32 %v2664_v9, %v1286_v24 }
 0x106   :  { %v2201_v32 = vpop.f32.mrf.mxu0  ;;  %v2065_v33 = vpack.c.bf16 %v1482_v30, %v1482_v30  ;;  %v1289_v34 = vadd.f32 %v2659_v6, %v1120_v27  ;;  %v1112_v35 = vadd.f32 %v1111_v28, %v563_v25  ;;  %v2267_v36 = vpop.f32.mrf.mxu1 }
 0x107   :  { %1798 = vst.msk [vmem:[%s3051_s5 + $0x64] sm:$0xf] %vm1772_vm3, %v2060_v29  ;;  %v1480_v37 = vsel %vm1351_vm1, %v1286_v24, %v1416_v31  ;;  %v1133_v38 = vadd.f32 %v2267_v36, %v2201_v32 }
 0x108   :  { %v576_v39 = vpop.f32.mrf.mxu0  ;;  %1803 = vst.msk [vmem:[%s3051_s5 + $0x78] sm:$0xf] %vm1772_vm3, %v2065_v33  ;;  %v2063_v40 = vpack.c.bf16 %v1480_v37, %v1480_v37  ;;  %vm1354_vm2 = vcmp.ge.f32.partialorder %v1289_v34, 0.0  ;;  %v1419_v41 = vmul.f32 %v2664_v9, %v1289_v34  ;;  %v1287_v42 = vadd.f32 %v2659_v6, %v1112_v35  ;;  %v1124_v43 = vpop.f32.mrf.mxu1 }
 0x109   :  { %v1292_v44 = vadd.f32 %v2659_v6, %v1133_v38  ;;  %v1125_v45 = vadd.f32 %v1124_v43, %v576_v39 }
 0x10a   :  { %v2202_v46 = vpop.f32.mrf.mxu0  ;;  %1801 = vst.msk [vmem:[%s3051_s5 + $0x70] sm:$0xf] %vm1772_vm3, %v2063_v40  ;;  %v1483_v47 = vsel %vm1354_vm2, %v1289_v34, %v1419_v41  ;;  %vm1352_vm4 = vcmp.ge.f32.partialorder %v1287_v42, 0.0  ;;  %v1417_v48 = vmul.f32 %v2664_v9, %v1287_v42  ;;  %v2268_v49 = vpop.f32.mrf.mxu1 }
 0x10b   :  { %v2066_v50 = vpack.c.bf16 %v1483_v47, %v1483_v47  ;;  %vm1357_vm5 = vcmp.ge.f32.partialorder %v1292_v44, 0.0  ;;  %v1422_v51 = vmul.f32 %v2664_v9, %v1292_v44  ;;  %v1290_v52 = vadd.f32 %v2659_v6, %v1125_v45 }
 0x10c   :  { %v579_v53 = vpop.f32.mrf.mxu0  ;;  %v1481_v54 = vsel %vm1352_vm4, %v1287_v42, %v1417_v48  ;;  %v1136_v55 = vadd.f32 %v2268_v49, %v2202_v46  ;;  %v1127_v56 = vpop.f32.mrf.mxu1 }
 0x10d   :  { %1804 = vst.msk [vmem:[%s3051_s5 + $0x7c] sm:$0xf] %vm1772_vm3, %v2066_v50  ;;  %v2064_v57 = vpack.c.bf16 %v1481_v54, %v1481_v54  ;;  %v1486_v58 = vsel %vm1357_vm5, %v1292_v44, %v1422_v51  ;;  %vm1355_vm6 = vcmp.ge.f32.partialorder %v1290_v52, 0.0  ;;  %v1420_v59 = vmul.f32 %v2664_v9, %v1290_v52 }
 0x10e   :  { %v2205_v60 = vpop.f32.mrf.mxu0  ;;  %v2069_v61 = vpack.c.bf16 %v1486_v58, %v1486_v58  ;;  %v1293_v62 = vadd.f32 %v2659_v6, %v1136_v55  ;;  %v1128_v63 = vadd.f32 %v1127_v56, %v579_v53  ;;  %v2271_v0 = vpop.f32.mrf.mxu1 }
 0x10f   :  { %1802 = vst.msk [vmem:[%s3051_s5 + $0x74] sm:$0xf] %vm1772_vm3, %v2064_v57  ;;  %v1484_v1 = vsel %vm1355_vm6, %v1290_v52, %v1420_v59  ;;  %v1149_v2 = vadd.f32 %v2271_v0, %v2205_v60 }
 0x110   :  { %v592_v3 = vpop.f32.mrf.mxu0  ;;  %1807 = vst.msk [vmem:[%s3051_s5 + $0x88] sm:$0xf] %vm1772_vm3, %v2069_v61  ;;  %v2067_v4 = vpack.c.bf16 %v1484_v1, %v1484_v1  ;;  %vm1358_vm7 = vcmp.ge.f32.partialorder %v1293_v62, 0.0  ;;  %v1423_v5 = vmul.f32 %v2664_v9, %v1293_v62  ;;  %v1291_v7 = vadd.f32 %v2659_v6, %v1128_v63  ;;  %v1140_v8 = vpop.f32.mrf.mxu1 }
 0x111   :  { %v1296_v10 = vadd.f32 %v2659_v6, %v1149_v2  ;;  %v1141_v11 = vadd.f32 %v1140_v8, %v592_v3 }
 0x112   :  { %v2206_v12 = vpop.f32.mrf.mxu0  ;;  %1805 = vst.msk [vmem:[%s3051_s5 + $0x80] sm:$0xf] %vm1772_vm3, %v2067_v4  ;;  %v1487_v13 = vsel %vm1358_vm7, %v1293_v62, %v1423_v5  ;;  %vm1356_vm8 = vcmp.ge.f32.partialorder %v1291_v7, 0.0  ;;  %v1421_v14 = vmul.f32 %v2664_v9, %v1291_v7  ;;  %v2272_v15 = vpop.f32.mrf.mxu1 }
 0x113   :  { %v2070_v16 = vpack.c.bf16 %v1487_v13, %v1487_v13  ;;  %vm1361_vm9 = vcmp.ge.f32.partialorder %v1296_v10, 0.0  ;;  %v1426_v17 = vmul.f32 %v2664_v9, %v1296_v10  ;;  %v1294_v18 = vadd.f32 %v2659_v6, %v1141_v11 }
 0x114   :  { %v595_v19 = vpop.f32.mrf.mxu0  ;;  %v1485_v20 = vsel %vm1356_vm8, %v1291_v7, %v1421_v14  ;;  %v1152_v21 = vadd.f32 %v2272_v15, %v2206_v12  ;;  %v1143_v22 = vpop.f32.mrf.mxu1 }
 0x115   :  { %1808 = vst.msk [vmem:[%s3051_s5 + $0x8c] sm:$0xf] %vm1772_vm3, %v2070_v16  ;;  %v2068_v23 = vpack.c.bf16 %v1485_v20, %v1485_v20  ;;  %v1490_v24 = vsel %vm1361_vm9, %v1296_v10, %v1426_v17  ;;  %vm1359_vm10 = vcmp.ge.f32.partialorder %v1294_v18, 0.0  ;;  %v1424_v25 = vmul.f32 %v2664_v9, %v1294_v18 }
 0x116   :  { %v2209_v26 = vpop.f32.mrf.mxu0  ;;  %v2073_v27 = vpack.c.bf16 %v1490_v24, %v1490_v24  ;;  %v1297_v28 = vadd.f32 %v2659_v6, %v1152_v21  ;;  %v1144_v29 = vadd.f32 %v1143_v22, %v595_v19  ;;  %v2275_v30 = vpop.f32.mrf.mxu1 }
 0x117   :  { %1806 = vst.msk [vmem:[%s3051_s5 + $0x84] sm:$0xf] %vm1772_vm3, %v2068_v23  ;;  %v1488_v31 = vsel %vm1359_vm10, %v1294_v18, %v1424_v25  ;;  %v1165_v32 = vadd.f32 %v2275_v30, %v2209_v26 }
 0x118   :  { %v608_v33 = vpop.f32.mrf.mxu0  ;;  %1811 = vst.msk [vmem:[%s3051_s5 + $0x98] sm:$0xf] %vm1772_vm3, %v2073_v27  ;;  %v2071_v34 = vpack.c.bf16 %v1488_v31, %v1488_v31  ;;  %vm1362_vm11 = vcmp.ge.f32.partialorder %v1297_v28, 0.0  ;;  %v1427_v35 = vmul.f32 %v2664_v9, %v1297_v28  ;;  %v1295_v36 = vadd.f32 %v2659_v6, %v1144_v29  ;;  %v1156_v37 = vpop.f32.mrf.mxu1 }
 0x119   :  { %v1300_v38 = vadd.f32 %v2659_v6, %v1165_v32  ;;  %v1157_v39 = vadd.f32 %v1156_v37, %v608_v33 }
 0x11a   :  { %v2210_v40 = vpop.f32.mrf.mxu0  ;;  %1809 = vst.msk [vmem:[%s3051_s5 + $0x90] sm:$0xf] %vm1772_vm3, %v2071_v34  ;;  %v1491_v41 = vsel %vm1362_vm11, %v1297_v28, %v1427_v35  ;;  %vm1360_vm12 = vcmp.ge.f32.partialorder %v1295_v36, 0.0  ;;  %v1425_v42 = vmul.f32 %v2664_v9, %v1295_v36  ;;  %v2276_v43 = vpop.f32.mrf.mxu1 }
 0x11b   :  { %v2074_v44 = vpack.c.bf16 %v1491_v41, %v1491_v41  ;;  %vm1365_vm13 = vcmp.ge.f32.partialorder %v1300_v38, 0.0  ;;  %v1430_v45 = vmul.f32 %v2664_v9, %v1300_v38  ;;  %v1298_v46 = vadd.f32 %v2659_v6, %v1157_v39 }
 0x11c   :  { %v611_v47 = vpop.f32.mrf.mxu0  ;;  %v1489_v48 = vsel %vm1360_vm12, %v1295_v36, %v1425_v42  ;;  %v1168_v49 = vadd.f32 %v2276_v43, %v2210_v40  ;;  %v1159_v50 = vpop.f32.mrf.mxu1 }
 0x11d   :  { %1812 = vst.msk [vmem:[%s3051_s5 + $0x9c] sm:$0xf] %vm1772_vm3, %v2074_v44  ;;  %v2072_v51 = vpack.c.bf16 %v1489_v48, %v1489_v48  ;;  %v1494_v52 = vsel %vm1365_vm13, %v1300_v38, %v1430_v45  ;;  %vm1363_vm14 = vcmp.ge.f32.partialorder %v1298_v46, 0.0  ;;  %v1428_v53 = vmul.f32 %v2664_v9, %v1298_v46 }
 0x11e   :  { %v2213_v54 = vpop.f32.mrf.mxu0  ;;  %v2077_v55 = vpack.c.bf16 %v1494_v52, %v1494_v52  ;;  %v1301_v56 = vadd.f32 %v2659_v6, %v1168_v49  ;;  %v1160_v57 = vadd.f32 %v1159_v50, %v611_v47  ;;  %v2279_v58 = vpop.f32.mrf.mxu1 }
 0x11f   :  { %1810 = vst.msk [vmem:[%s3051_s5 + $0x94] sm:$0xf] %vm1772_vm3, %v2072_v51  ;;  %v1492_v59 = vsel %vm1363_vm14, %v1298_v46, %v1428_v53  ;;  %v1181_v60 = vadd.f32 %v2279_v58, %v2213_v54 }
 0x120   :  { %v624_v61 = vpop.f32.mrf.mxu0  ;;  %1815 = vst.msk [vmem:[%s3051_s5 + $0xa8] sm:$0xf] %vm1772_vm3, %v2077_v55  ;;  %v2075_v62 = vpack.c.bf16 %v1492_v59, %v1492_v59  ;;  %vm1366_vm15 = vcmp.ge.f32.partialorder %v1301_v56, 0.0  ;;  %v1431_v63 = vmul.f32 %v2664_v9, %v1301_v56  ;;  %v1299_v0 = vadd.f32 %v2659_v6, %v1160_v57  ;;  %v1172_v1 = vpop.f32.mrf.mxu1 }
 0x121   :  { %v1304_v2 = vadd.f32 %v2659_v6, %v1181_v60  ;;  %v1173_v3 = vadd.f32 %v1172_v1, %v624_v61 }
 0x122   :  { %v2214_v4 = vpop.f32.mrf.mxu0  ;;  %1813 = vst.msk [vmem:[%s3051_s5 + $0xa0] sm:$0xf] %vm1772_vm3, %v2075_v62  ;;  %v1495_v5 = vsel %vm1366_vm15, %v1301_v56, %v1431_v63  ;;  %vm1364_vm0 = vcmp.ge.f32.partialorder %v1299_v0, 0.0  ;;  %v1429_v7 = vmul.f32 %v2664_v9, %v1299_v0  ;;  %v2280_v8 = vpop.f32.mrf.mxu1 }
 0x123   :  { %v2078_v10 = vpack.c.bf16 %v1495_v5, %v1495_v5  ;;  %vm1369_vm1 = vcmp.ge.f32.partialorder %v1304_v2, 0.0  ;;  %v1434_v11 = vmul.f32 %v2664_v9, %v1304_v2  ;;  %v1302_v12 = vadd.f32 %v2659_v6, %v1173_v3 }
 0x124   :  { %v627_v13 = vpop.f32.mrf.mxu0  ;;  %v1493_v14 = vsel %vm1364_vm0, %v1299_v0, %v1429_v7  ;;  %v1184_v15 = vadd.f32 %v2280_v8, %v2214_v4  ;;  %v1175_v16 = vpop.f32.mrf.mxu1 }
 0x125   :  { %1816 = vst.msk [vmem:[%s3051_s5 + $0xac] sm:$0xf] %vm1772_vm3, %v2078_v10  ;;  %v2076_v17 = vpack.c.bf16 %v1493_v14, %v1493_v14  ;;  %v1498_v18 = vsel %vm1369_vm1, %v1304_v2, %v1434_v11  ;;  %vm1367_vm2 = vcmp.ge.f32.partialorder %v1302_v12, 0.0  ;;  %v1432_v19 = vmul.f32 %v2664_v9, %v1302_v12 }
 0x126   :  { %v2217_v20 = vpop.f32.mrf.mxu0  ;;  %v2081_v21 = vpack.c.bf16 %v1498_v18, %v1498_v18  ;;  %v1305_v22 = vadd.f32 %v2659_v6, %v1184_v15  ;;  %v1176_v23 = vadd.f32 %v1175_v16, %v627_v13  ;;  %v2283_v24 = vpop.f32.mrf.mxu1 }
 0x127   :  { %1814 = vst.msk [vmem:[%s3051_s5 + $0xa4] sm:$0xf] %vm1772_vm3, %v2076_v17  ;;  %v1496_v25 = vsel %vm1367_vm2, %v1302_v12, %v1432_v19  ;;  %v1197_v26 = vadd.f32 %v2283_v24, %v2217_v20 }
 0x128   :  { %v640_v27 = vpop.f32.mrf.mxu0  ;;  %1819 = vst.msk [vmem:[%s3051_s5 + $0xb8] sm:$0xf] %vm1772_vm3, %v2081_v21  ;;  %v2079_v28 = vpack.c.bf16 %v1496_v25, %v1496_v25  ;;  %vm1370_vm4 = vcmp.ge.f32.partialorder %v1305_v22, 0.0  ;;  %v1435_v29 = vmul.f32 %v2664_v9, %v1305_v22  ;;  %v1303_v30 = vadd.f32 %v2659_v6, %v1176_v23  ;;  %v1188_v31 = vpop.f32.mrf.mxu1 }
 0x129   :  { %v1308_v32 = vadd.f32 %v2659_v6, %v1197_v26  ;;  %v1189_v33 = vadd.f32 %v1188_v31, %v640_v27 }
 0x12a   :  { %v2218_v34 = vpop.f32.mrf.mxu0  ;;  %1817 = vst.msk [vmem:[%s3051_s5 + $0xb0] sm:$0xf] %vm1772_vm3, %v2079_v28  ;;  %v1499_v35 = vsel %vm1370_vm4, %v1305_v22, %v1435_v29  ;;  %vm1368_vm5 = vcmp.ge.f32.partialorder %v1303_v30, 0.0  ;;  %v1433_v36 = vmul.f32 %v2664_v9, %v1303_v30  ;;  %v2284_v37 = vpop.f32.mrf.mxu1 }
 0x12b   :  { %v2082_v38 = vpack.c.bf16 %v1499_v35, %v1499_v35  ;;  %vm1373_vm6 = vcmp.ge.f32.partialorder %v1308_v32, 0.0  ;;  %v1438_v39 = vmul.f32 %v2664_v9, %v1308_v32  ;;  %v1306_v40 = vadd.f32 %v2659_v6, %v1189_v33 }
 0x12c   :  { %v643_v41 = vpop.f32.mrf.mxu0  ;;  %v1497_v42 = vsel %vm1368_vm5, %v1303_v30, %v1433_v36  ;;  %v1200_v43 = vadd.f32 %v2284_v37, %v2218_v34  ;;  %v1191_v44 = vpop.f32.mrf.mxu1 }
 0x12d   :  { %1820 = vst.msk [vmem:[%s3051_s5 + $0xbc] sm:$0xf] %vm1772_vm3, %v2082_v38  ;;  %v2080_v45 = vpack.c.bf16 %v1497_v42, %v1497_v42  ;;  %v1502_v46 = vsel %vm1373_vm6, %v1308_v32, %v1438_v39  ;;  %vm1371_vm7 = vcmp.ge.f32.partialorder %v1306_v40, 0.0  ;;  %v1436_v47 = vmul.f32 %v2664_v9, %v1306_v40 }
 0x12e   :  { %v2221_v48 = vpop.f32.mrf.mxu0  ;;  %v2085_v49 = vpack.c.bf16 %v1502_v46, %v1502_v46  ;;  %v1309_v50 = vadd.f32 %v2659_v6, %v1200_v43  ;;  %v1192_v51 = vadd.f32 %v1191_v44, %v643_v41  ;;  %v2287_v52 = vpop.f32.mrf.mxu1 }
 0x12f   :  { %1818 = vst.msk [vmem:[%s3051_s5 + $0xb4] sm:$0xf] %vm1772_vm3, %v2080_v45  ;;  %v1500_v53 = vsel %vm1371_vm7, %v1306_v40, %v1436_v47  ;;  %v1213_v54 = vadd.f32 %v2287_v52, %v2221_v48 }
 0x130   :  { %v656_v55 = vpop.f32.mrf.mxu0  ;;  %1823 = vst.msk [vmem:[%s3051_s5 + $0xc8] sm:$0xf] %vm1772_vm3, %v2085_v49  ;;  %v2083_v56 = vpack.c.bf16 %v1500_v53, %v1500_v53  ;;  %vm1374_vm8 = vcmp.ge.f32.partialorder %v1309_v50, 0.0  ;;  %v1439_v57 = vmul.f32 %v2664_v9, %v1309_v50  ;;  %v1307_v58 = vadd.f32 %v2659_v6, %v1192_v51  ;;  %v1204_v59 = vpop.f32.mrf.mxu1 }
 0x131   :  { %v1312_v60 = vadd.f32 %v2659_v6, %v1213_v54  ;;  %v1205_v61 = vadd.f32 %v1204_v59, %v656_v55 }
 0x132   :  { %v2222_v62 = vpop.f32.mrf.mxu0  ;;  %1821 = vst.msk [vmem:[%s3051_s5 + $0xc0] sm:$0xf] %vm1772_vm3, %v2083_v56  ;;  %v1503_v63 = vsel %vm1374_vm8, %v1309_v50, %v1439_v57  ;;  %vm1372_vm9 = vcmp.ge.f32.partialorder %v1307_v58, 0.0  ;;  %v1437_v0 = vmul.f32 %v2664_v9, %v1307_v58  ;;  %v2288_v1 = vpop.f32.mrf.mxu1 }
 0x133   :  { %v2086_v2 = vpack.c.bf16 %v1503_v63, %v1503_v63  ;;  %vm1377_vm10 = vcmp.ge.f32.partialorder %v1312_v60, 0.0  ;;  %v1442_v3 = vmul.f32 %v2664_v9, %v1312_v60  ;;  %v1310_v4 = vadd.f32 %v2659_v6, %v1205_v61 }
 0x134   :  { %v659_v5 = vpop.f32.mrf.mxu0  ;;  %v1501_v7 = vsel %vm1372_vm9, %v1307_v58, %v1437_v0  ;;  %v1216_v8 = vadd.f32 %v2288_v1, %v2222_v62  ;;  %v1207_v10 = vpop.f32.mrf.mxu1 }
 0x135   :  { %1824 = vst.msk [vmem:[%s3051_s5 + $0xcc] sm:$0xf] %vm1772_vm3, %v2086_v2  ;;  %v2084_v11 = vpack.c.bf16 %v1501_v7, %v1501_v7  ;;  %v1506_v12 = vsel %vm1377_vm10, %v1312_v60, %v1442_v3  ;;  %vm1375_vm11 = vcmp.ge.f32.partialorder %v1310_v4, 0.0  ;;  %v1440_v13 = vmul.f32 %v2664_v9, %v1310_v4 }
 0x136   :  { %v2225_v14 = vpop.f32.mrf.mxu0  ;;  %v2089_v15 = vpack.c.bf16 %v1506_v12, %v1506_v12  ;;  %v1313_v16 = vadd.f32 %v2659_v6, %v1216_v8  ;;  %v1208_v17 = vadd.f32 %v1207_v10, %v659_v5  ;;  %v2291_v18 = vpop.f32.mrf.mxu1 }
 0x137   :  { %1822 = vst.msk [vmem:[%s3051_s5 + $0xc4] sm:$0xf] %vm1772_vm3, %v2084_v11  ;;  %v1504_v19 = vsel %vm1375_vm11, %v1310_v4, %v1440_v13  ;;  %v1229_v20 = vadd.f32 %v2291_v18, %v2225_v14 }
 0x138   :  { %v672_v21 = vpop.f32.mrf.mxu0  ;;  %1827 = vst.msk [vmem:[%s3051_s5 + $0xd8] sm:$0xf] %vm1772_vm3, %v2089_v15  ;;  %v2087_v22 = vpack.c.bf16 %v1504_v19, %v1504_v19  ;;  %vm1378_vm12 = vcmp.ge.f32.partialorder %v1313_v16, 0.0  ;;  %v1443_v23 = vmul.f32 %v2664_v9, %v1313_v16  ;;  %v1311_v24 = vadd.f32 %v2659_v6, %v1208_v17  ;;  %v1220_v25 = vpop.f32.mrf.mxu1 }
 0x139   :  { %v1316_v26 = vadd.f32 %v2659_v6, %v1229_v20  ;;  %v1221_v27 = vadd.f32 %v1220_v25, %v672_v21  ;;  %v2363_v6 = vld [vmem:[%s3049_s3] ss:$0 sm:$0xff] }
 0x13a   :  { %v2226_v28 = vpop.f32.mrf.mxu0  ;;  %1825 = vst.msk [vmem:[%s3051_s5 + $0xd0] sm:$0xf] %vm1772_vm3, %v2087_v22  ;;  %v1507_v29 = vsel %vm1378_vm12, %v1313_v16, %v1443_v23  ;;  %vm1376_vm13 = vcmp.ge.f32.partialorder %v1311_v24, 0.0  ;;  %v1441_v30 = vmul.f32 %v2664_v9, %v1311_v24  ;;  %v2292_v31 = vpop.f32.mrf.mxu1 }
 0x13b   :  { %v2090_v32 = vpack.c.bf16 %v1507_v29, %v1507_v29  ;;  %vm1381_vm14 = vcmp.ge.f32.partialorder %v1316_v26, 0.0  ;;  %v1446_v33 = vmul.f32 %v2664_v9, %v1316_v26  ;;  %v1314_v34 = vadd.f32 %v2363_v6, %v1221_v27 }
 0x13c   :  { %v675_v35 = vpop.f32.mrf.mxu0  ;;  %v1505_v36 = vsel %vm1376_vm13, %v1311_v24, %v1441_v30  ;;  %v1232_v37 = vadd.f32 %v2292_v31, %v2226_v28  ;;  %v1223_v38 = vpop.f32.mrf.mxu1 }
 0x13d   :  { %1828 = vst.msk [vmem:[%s3051_s5 + $0xdc] sm:$0xf] %vm1772_vm3, %v2090_v32  ;;  %v2088_v39 = vpack.c.bf16 %v1505_v36, %v1505_v36  ;;  %v1510_v40 = vsel %vm1381_vm14, %v1316_v26, %v1446_v33  ;;  %vm1379_vm15 = vcmp.ge.f32.partialorder %v1314_v34, 0.0  ;;  %v1444_v41 = vmul.f32 %v2664_v9, %v1314_v34 }
 0x13e   :  { %v2229_v42 = vpop.f32.mrf.mxu0  ;;  %v2093_v43 = vpack.c.bf16 %v1510_v40, %v1510_v40  ;;  %v1317_v44 = vadd.f32 %v2363_v6, %v1232_v37  ;;  %v1224_v45 = vadd.f32 %v1223_v38, %v675_v35  ;;  %v2295_v46 = vpop.f32.mrf.mxu1 }
 0x13f   :  { %1826 = vst.msk [vmem:[%s3051_s5 + $0xd4] sm:$0xf] %vm1772_vm3, %v2088_v39  ;;  %v1508_v47 = vsel %vm1379_vm15, %v1314_v34, %v1444_v41  ;;  %v1245_v48 = vadd.f32 %v2295_v46, %v2229_v42 }
 0x140   :  { %v688_v49 = vpop.f32.mrf.mxu0  ;;  %1831 = vst.msk [vmem:[%s3051_s5 + $0xe8] sm:$0xf] %vm1772_vm3, %v2093_v43  ;;  %v2091_v50 = vpack.c.bf16 %v1508_v47, %v1508_v47  ;;  %vm1382_vm0 = vcmp.ge.f32.partialorder %v1317_v44, 0.0  ;;  %v1447_v51 = vmul.f32 %v2664_v9, %v1317_v44  ;;  %v1315_v52 = vadd.f32 %v2363_v6, %v1224_v45  ;;  %v1236_v53 = vpop.f32.mrf.mxu1 }
 0x141   :  { %v1320_v54 = vadd.f32 %v2363_v6, %v1245_v48  ;;  %v1237_v55 = vadd.f32 %v1236_v53, %v688_v49 }
 0x142   :  { %v2230_v56 = vpop.f32.mrf.mxu0  ;;  %1829 = vst.msk [vmem:[%s3051_s5 + $0xe0] sm:$0xf] %vm1772_vm3, %v2091_v50  ;;  %v1511_v57 = vsel %vm1382_vm0, %v1317_v44, %v1447_v51  ;;  %vm1380_vm1 = vcmp.ge.f32.partialorder %v1315_v52, 0.0  ;;  %v1445_v58 = vmul.f32 %v2664_v9, %v1315_v52  ;;  %v2296_v59 = vpop.f32.mrf.mxu1 }
 0x143   :  { %v2094_v60 = vpack.c.bf16 %v1511_v57, %v1511_v57  ;;  %vm1385_vm2 = vcmp.ge.f32.partialorder %v1320_v54, 0.0  ;;  %v1450_v61 = vmul.f32 %v2664_v9, %v1320_v54  ;;  %v1318_v62 = vadd.f32 %v2363_v6, %v1237_v55 }
 0x144   :  { %v691_v63 = vpop.f32.mrf.mxu0  ;;  %v1509_v0 = vsel %vm1380_vm1, %v1315_v52, %v1445_v58  ;;  %v1248_v1 = vadd.f32 %v2296_v59, %v2230_v56  ;;  %v1239_v2 = vpop.f32.mrf.mxu1 }
 0x145   :  { %1832 = vst.msk [vmem:[%s3051_s5 + $0xec] sm:$0xf] %vm1772_vm3, %v2094_v60  ;;  %v2092_v3 = vpack.c.bf16 %v1509_v0, %v1509_v0  ;;  %v1514_v4 = vsel %vm1385_vm2, %v1320_v54, %v1450_v61  ;;  %vm1383_vm4 = vcmp.ge.f32.partialorder %v1318_v62, 0.0  ;;  %v1448_v5 = vmul.f32 %v2664_v9, %v1318_v62 }
 0x146   :  { %v2097_v7 = vpack.c.bf16 %v1514_v4, %v1514_v4  ;;  %v1321_v8 = vadd.f32 %v2363_v6, %v1248_v1  ;;  %v1240_v10 = vadd.f32 %v1239_v2, %v691_v63 }
 0x147   :  { %1830 = vst.msk [vmem:[%s3051_s5 + $0xe4] sm:$0xf] %vm1772_vm3, %v2092_v3  ;;  %v1512_v11 = vsel %vm1383_vm4, %v1318_v62, %v1448_v5 }
 0x148   :  { %1835 = vst.msk [vmem:[%s3051_s5 + $0xf8] sm:$0xf] %vm1772_vm3, %v2097_v7  ;;  %v2095_v12 = vpack.c.bf16 %v1512_v11, %v1512_v11  ;;  %vm1386_vm5 = vcmp.ge.f32.partialorder %v1321_v8, 0.0  ;;  %v1451_v13 = vmul.f32 %v2664_v9, %v1321_v8  ;;  %v1319_v14 = vadd.f32 %v2363_v6, %v1240_v10 }
 0x14a   :  { %1833 = vst.msk [vmem:[%s3051_s5 + $0xf0] sm:$0xf] %vm1772_vm3, %v2095_v12  ;;  %v1515_v15 = vsel %vm1386_vm5, %v1321_v8, %v1451_v13  ;;  %vm1384_vm6 = vcmp.ge.f32.partialorder %v1319_v14, 0.0  ;;  %v1449_v16 = vmul.f32 %v2664_v9, %v1319_v14 }
 0x14b   :  { %v2098_v17 = vpack.c.bf16 %v1515_v15, %v1515_v15 }
 0x14c   :  { %v1513_v18 = vsel %vm1384_vm6, %v1319_v14, %v1449_v16 }
 0x14d   :  { %1836 = vst.msk [vmem:[%s3051_s5 + $0xfc] sm:$0xf] %vm1772_vm3, %v2098_v17  ;;  %v2096_v19 = vpack.c.bf16 %v1513_v18, %v1513_v18 }
 0x14f   :  { %1834 = vst.msk [vmem:[%s3051_s5 + $0xf4] sm:$0xf] %vm1772_vm3, %v2096_v19 }

</bundles_post_ra>
